<compile_context>
chip_gen: v7x
topology: tpu7x:2x2x1
jax: 0.10.0
libtpu: 0.0.40
codegen_flags: <defaults>
</compile_context>

<pallas_src>
import numpy as np
import jax
import jax.numpy as jnp
from jax.experimental import pallas as pl
from jax.experimental.pallas import tpu as pltpu

SENTENCE = ('Lorem ipsum dolor sit amet consectetur adipisicing elit sed do '
            'eiusmod tempor incididunt ut labore et dolore magna aliqua Ut '
            'enim ad minim veniam quis nostrud exercitation')
WORD_DICT = {w: i for i, w in enumerate(list(set(SENTENCE.split())))}
LEN_N = len(WORD_DICT)      # vocab size == input_size == output_size
N_HIDDEN = 5                # hidden size per direction
LANE = 128                  # one 128-lane vreg slot per gate
SUBLANE = 8


def _round_up(n, m):
    return ((n + m - 1) // m) * m


# ----------------------------- Pallas kernel --------------------------------
def bilstm_kernel(x_ref, wihf_ref, whhf_ref, bf_ref, wihb_ref, bb_ref,
                  wf_ref, wb_ref, bo_ref, out_ref):
    # x_ref:    [T*Bp, Dp]  time-major, batch padded to 8 rows, lanes padded
    # wihf_ref: [Dp, 4*G]   fwd input->hidden, gate g in lanes [g*G, g*G+H)
    # whhf_ref: [8, 4*G]    fwd hidden->hidden, row k = W_hh[:, k] per gate slot
    # bf_ref:   [1, 4*G]    fwd b_ih + b_hh (lane-aligned, zero outside slots)
    # wihb_ref: [Dp, 4*G]   bwd input->hidden (W_hh_bwd not needed)
    # bb_ref:   [1, 4*G]    bwd b_ih + b_hh
    # wf_ref:   [G, Dop]    output projection, forward half of W (zero-padded)
    # wb_ref:   [G, Dop]    output projection, backward half of W
    # bo_ref:   [1, Dop]    output bias (zero-padded)
    # out_ref:  [Bp, Dop]
    H = N_HIDDEN
    G = LANE
    TB = x_ref.shape[0]
    Bp = out_ref.shape[0]
    T = TB // Bp
    hi = jax.lax.Precision.HIGHEST

    x = x_ref[...]                                               # [T*Bp, Dp]

    # Hoisted input projection: ONE lane-dense MXU matmul covers all T steps.
    xw = jnp.dot(x, wihf_ref[...], precision=hi,
                 preferred_element_type=jnp.float32) + bf_ref[...]   # [T*Bp, 4G]

    # Hoist the sublane-broadcast W_hh rows (loop-invariant) out of the chain.
    whh = whhf_ref[...]                                          # [8, 4G]
    whh_rows = [jnp.broadcast_to(whh[k:k + 1, :], (Bp, 4 * G)) for k in range(H)]

    h = jnp.zeros((Bp, G), jnp.float32)   # lanes >= H stay exactly zero
    c = jnp.zeros((Bp, G), jnp.float32)

    # Forward recurrence, fully unrolled (T static & small). Per step: H
    # broadcast multiply-adds on the VPU (no MXU round trip on the serial
    # chain), 3 sigmoids + 2 tanh on vreg-aligned gate slots, 3 VPU fmas.
    for t in range(T):
        gates = xw[t * Bp:(t + 1) * Bp, :]          # aligned 8-row slab view
        for k in range(H):
            gates = gates + h[:, k:k + 1] * whh_rows[k]
        i_g = jax.nn.sigmoid(gates[:, 0 * G:1 * G])
        f_g = jax.nn.sigmoid(gates[:, 1 * G:2 * G])
        g_g = jnp.tanh(gates[:, 2 * G:3 * G])
        o_g = jax.nn.sigmoid(gates[:, 3 * G:4 * G])
        c = f_g * c + i_g * g_g
        h = o_g * jnp.tanh(c)
    h_fwd = h

    # Reverse direction contribution to output[-1]: exactly one LSTM step on
    # x[T-1] from a zero state (h0 = c0 = 0, so h @ W_hh_bwd and f*c vanish).
    pre_b = jnp.dot(x[(T - 1) * Bp:T * Bp, :], wihb_ref[...], precision=hi,
                    preferred_element_type=jnp.float32) + bb_ref[...]
    i_b = jax.nn.sigmoid(pre_b[:, 0 * G:1 * G])
    g_b = jnp.tanh(pre_b[:, 2 * G:3 * G])
    o_b = jax.nn.sigmoid(pre_b[:, 3 * G:4 * G])
    h_bwd = o_b * jnp.tanh(i_b * g_b)

    # Output projection without the lane concat: W split into fwd/bwd halves.
    out = (jnp.dot(h_fwd, wf_ref[...], precision=hi,
                   preferred_element_type=jnp.float32)
           + jnp.dot(h_bwd, wb_ref[...], precision=hi,
                     preferred_element_type=jnp.float32)
           + bo_ref[...])
    out_ref[...] = out.astype(out_ref.dtype)      # lane-dense [Bp, 128] store


# ------------------------------- wrapper -------------------------------------
def prepare_params(params):
    """One-time host-side packing of PyTorch-layout LSTM params.

    PyTorch stacks gates [i; f; g; o] along dim 0 of w_ih/w_hh/biases. Here
    each gate gets its own 128-lane slot: gate g occupies lanes
    [g*128, g*128 + H) of the packed 4*128 column axis; everything else is 0.
    """
    H = N_HIDDEN
    G = LANE
    assert H <= G
    D = int(params['w_ih_f'].shape[1])
    D_out = int(params['W'].shape[1])
    Dp = _round_up(D, LANE)
    Dop = _round_up(D_out, LANE)

    def pack_ih(w_ih, b_ih, b_hh):
        w = np.zeros((Dp, 4 * G), np.float32)
        b = np.zeros((1, 4 * G), np.float32)
        w_ih = np.asarray(w_ih, np.float32)
        bsum = np.asarray(b_ih, np.float32) + np.asarray(b_hh, np.float32)
        for g in range(4):
            w[:D, g * G:g * G + H] = w_ih[g * H:(g + 1) * H, :].T
            b[0, g * G:g * G + H] = bsum[g * H:(g + 1) * H]
        return jnp.asarray(w), jnp.asarray(b)

    def pack_hh(w_hh):
        w = np.zeros((SUBLANE, 4 * G), np.float32)   # rows padded to 8
        w_hh = np.asarray(w_hh, np.float32)
        for g in range(4):
            w[:H, g * G:g * G + H] = w_hh[g * H:(g + 1) * H, :].T
        return jnp.asarray(w)

    wih_f, b_f = pack_ih(params['w_ih_f'], params['b_ih_f'], params['b_hh_f'])
    wih_b, b_b = pack_ih(params['w_ih_b'], params['b_ih_b'], params['b_hh_b'])
    whh_f = pack_hh(params['w_hh_f'])
    # backward W_hh is not needed: output[-1]'s reverse step starts from a
    # zero hidden state, so h @ W_hh_bwd == 0.

    W = np.asarray(params['W'], np.float32)
    W_f = np.zeros((G, Dop), np.float32)
    W_b = np.zeros((G, Dop), np.float32)
    b_o = np.zeros((1, Dop), np.float32)
    W_f[:H, :D_out] = W[:H]
    W_b[:H, :D_out] = W[H:2 * H]
    b_o[0, :D_out] = np.asarray(params['b'], np.float32)

    return {'wih_f': wih_f, 'whh_f': whh_f, 'b_f': b_f,
            'wih_b': wih_b, 'b_b': b_b,
            'W_f': jnp.asarray(W_f), 'W_b': jnp.asarray(W_b),
            'b_o': jnp.asarray(b_o)}


@jax.jit
def bilstm_forward(X, packed):
    """X: [B, T, D] float32, packed = prepare_params(...) -> [B, D] float32."""
    B, T, D = X.shape
    Bp = _round_up(max(B, SUBLANE), SUBLANE)
    Dp = packed['wih_f'].shape[0]
    Dop = packed['W_f'].shape[1]

    # Time-major + pad batch to a full sublane group and features to a lane
    # multiple, all inside this jit (single fused layout op), then flatten so
    # each timestep is one aligned 8-row slab of [T*Bp, Dp].
    x_tm = jnp.transpose(X.astype(jnp.float32), (1, 0, 2))       # [T, B, D]
    x_tm = jnp.pad(x_tm, ((0, 0), (0, Bp - B), (0, Dp - D)))
    x_flat = x_tm.reshape(T * Bp, Dp)

    vmem = pl.BlockSpec(memory_space=pltpu.MemorySpace.VMEM)
    out = pl.pallas_call(
        bilstm_kernel,
        out_shape=jax.ShapeDtypeStruct((Bp, Dop), jnp.float32),
        in_specs=[vmem] * 9,
        out_specs=vmem,
    )(x_flat, packed['wih_f'], packed['whh_f'], packed['b_f'],
      packed['wih_b'], packed['b_b'],
      packed['W_f'], packed['W_b'], packed['b_o'])
    return out[:B, :D]


# -------------------------- pure-JAX reference --------------------------------
def bilstm_reference(X, params):
    """Full bidirectional LSTM in plain JAX, takes output[-1], projects."""
    B, T, D = X.shape
    H = N_HIDDEN
    with jax.default_matmul_precision('float32'):
        x_tm = jnp.transpose(X, (1, 0, 2))  # [T, B, D]

        def run_dir(xs, w_ih, w_hh, b_ih, b_hh):
            b = b_ih + b_hh

            def step(carry, x_t):
                h, c = carry
                z = x_t @ w_ih.T + h @ w_hh.T + b
                i = jax.nn.sigmoid(z[:, 0 * H:1 * H])
                f = jax.nn.sigmoid(z[:, 1 * H:2 * H])
                g = jnp.tanh(z[:, 2 * H:3 * H])
                o = jax.nn.sigmoid(z[:, 3 * H:4 * H])
                c_new = f * c + i * g
                h_new = o * jnp.tanh(c_new)
                return (h_new, c_new), h_new

            init = (jnp.zeros((B, H)), jnp.zeros((B, H)))
            _, hs = jax.lax.scan(step, init, xs)
            return hs                                    # [T, B, H]

        hs_f = run_dir(x_tm, params['w_ih_f'], params['w_hh_f'],
                       params['b_ih_f'], params['b_hh_f'])
        hs_b = run_dir(x_tm[::-1], params['w_ih_b'], params['w_hh_b'],
                       params['b_ih_b'], params['b_hh_b'])
        hs_b = hs_b[::-1]                                # align to time axis
        out_last = jnp.concatenate([hs_f[-1], hs_b[-1]], axis=-1)  # [B, 2H]
        return out_last @ params['W'] + params['b']


# ------------------------------ param init ------------------------------------
def init_params(key):
    D, H = LEN_N, N_HIDDEN
    k = 1.0 / np.sqrt(H)   # PyTorch nn.LSTM default init range
    keys = jax.random.split(key, 10)

    def u(kk, shape):
        return jax.random.uniform(kk, shape, jnp.float32, minval=-k, maxval=k)

    return {
        'w_ih_f': u(keys[0], (4 * H, D)), 'w_hh_f': u(keys[1], (4 * H, H)),
        'b_ih_f': u(keys[2], (4 * H,)),   'b_hh_f': u(keys[3], (4 * H,)),
        'w_ih_b': u(keys[4], (4 * H, D)), 'w_hh_b': u(keys[5], (4 * H, H)),
        'b_ih_b': u(keys[6], (4 * H,)),   'b_hh_b': u(keys[7], (4 * H,)),
        'W': jax.random.normal(keys[8], (2 * H, D), jnp.float32),
        'b': jax.random.normal(keys[9], (D,), jnp.float32),
    }


if __name__ == "__main__":
    key = jax.random.PRNGKey(0)
    k_param, k_data = jax.random.split(key)
    params = init_params(k_param)
    packed = prepare_params(params)          # one-time weight packing

    # Small input consistent with the module: batch=2, seq=8, one-hot vocab.
    B, T = 2, 8
    word_ids = jax.random.randint(k_data, (B, T), 0, LEN_N)
    X = jax.nn.one_hot(word_ids, LEN_N, dtype=jnp.float32)   # [B, T, LEN_N]

    out = bilstm_forward(X, packed)
    out = jax.block_until_ready(out)

    ref = bilstm_reference(X, params)
    assert out.shape == (B, LEN_N)
    np.testing.assert_allclose(np.asarray(out), np.asarray(ref),
                               rtol=2e-4, atol=2e-4)
    print("KERNEL_OK")
</pallas_src>

<mosaic_0001>
module attributes {stable_mosaic.version = 11 : i64} {
  func.func @bilstm_kernel(%arg0: memref<64x128xf32, #tpu.memory_space<vmem>>, %arg1: memref<128x512xf32, #tpu.memory_space<vmem>>, %arg2: memref<8x512xf32, #tpu.memory_space<vmem>>, %arg3: memref<1x512xf32, #tpu.memory_space<vmem>>, %arg4: memref<128x512xf32, #tpu.memory_space<vmem>>, %arg5: memref<1x512xf32, #tpu.memory_space<vmem>>, %arg6: memref<128x128xf32, #tpu.memory_space<vmem>>, %arg7: memref<128x128xf32, #tpu.memory_space<vmem>>, %arg8: memref<1x128xf32, #tpu.memory_space<vmem>>, %arg9: memref<8x128xf32, #tpu.memory_space<vmem>>) attributes {dimension_semantics = [], scalar_prefetch = 0 : i64, scratch_operands = 0 : i64, tpu.core_type = #tpu.core_type<tc>} {
    %c0 = arith.constant 0 : index
    %c0_0 = arith.constant 0 : index
    %0 = vector.load %arg0[%c0, %c0_0] : memref<64x128xf32, #tpu.memory_space<vmem>>, vector<64x128xf32>
    %c0_1 = arith.constant 0 : index
    %c0_2 = arith.constant 0 : index
    %1 = vector.load %arg1[%c0_1, %c0_2] : memref<128x512xf32, #tpu.memory_space<vmem>>, vector<128x512xf32>
    %cst = arith.constant dense<0.000000e+00> : vector<64x512xf32>
    %2 = tpu.matmul %0, %1, %cst {dimension_numbers = #tpu.dot_dimension_numbers<[1], [0], [0], [1], [0, 0, 1, 1], [], []>, precision = #tpu.contract_precision<fp32>} : vector<64x128xf32>, vector<128x512xf32>, vector<64x512xf32> -> vector<64x512xf32>
    %c0_3 = arith.constant 0 : index
    %c0_4 = arith.constant 0 : index
    %3 = vector.load %arg3[%c0_3, %c0_4] : memref<1x512xf32, #tpu.memory_space<vmem>>, vector<1x512xf32>
    %4 = vector.broadcast %3 : vector<1x512xf32> to vector<64x512xf32>
    %5 = arith.addf %2, %4 : vector<64x512xf32>
    %c0_5 = arith.constant 0 : index
    %c0_6 = arith.constant 0 : index
    %6 = vector.load %arg2[%c0_5, %c0_6] : memref<8x512xf32, #tpu.memory_space<vmem>>, vector<8x512xf32>
    %7 = vector.extract_strided_slice %6 {offsets = [0, 0], sizes = [1, 512], strides = [1, 1]} : vector<8x512xf32> to vector<1x512xf32>
    %8 = vector.shape_cast %7 : vector<1x512xf32> to vector<1x512xf32>
    %9 = vector.broadcast %8 : vector<1x512xf32> to vector<8x512xf32>
    %10 = vector.extract_strided_slice %6 {offsets = [1, 0], sizes = [1, 512], strides = [1, 1]} : vector<8x512xf32> to vector<1x512xf32>
    %11 = vector.shape_cast %10 : vector<1x512xf32> to vector<1x512xf32>
    %12 = vector.broadcast %11 : vector<1x512xf32> to vector<8x512xf32>
    %13 = vector.extract_strided_slice %6 {offsets = [2, 0], sizes = [1, 512], strides = [1, 1]} : vector<8x512xf32> to vector<1x512xf32>
    %14 = vector.shape_cast %13 : vector<1x512xf32> to vector<1x512xf32>
    %15 = vector.broadcast %14 : vector<1x512xf32> to vector<8x512xf32>
    %16 = vector.extract_strided_slice %6 {offsets = [3, 0], sizes = [1, 512], strides = [1, 1]} : vector<8x512xf32> to vector<1x512xf32>
    %17 = vector.shape_cast %16 : vector<1x512xf32> to vector<1x512xf32>
    %18 = vector.broadcast %17 : vector<1x512xf32> to vector<8x512xf32>
    %19 = vector.extract_strided_slice %6 {offsets = [4, 0], sizes = [1, 512], strides = [1, 1]} : vector<8x512xf32> to vector<1x512xf32>
    %20 = vector.shape_cast %19 : vector<1x512xf32> to vector<1x512xf32>
    %21 = vector.broadcast %20 : vector<1x512xf32> to vector<8x512xf32>
    %cst_7 = arith.constant 0.000000e+00 : f32
    %22 = vector.broadcast %cst_7 : f32 to vector<8x128xf32>
    %cst_8 = arith.constant 0.000000e+00 : f32
    %23 = vector.broadcast %cst_8 : f32 to vector<8x128xf32>
    %24 = vector.extract_strided_slice %5 {offsets = [0, 0], sizes = [8, 512], strides = [1, 1]} : vector<64x512xf32> to vector<8x512xf32>
    %25 = vector.extract_strided_slice %22 {offsets = [0, 0], sizes = [8, 1], strides = [1, 1]} : vector<8x128xf32> to vector<8x1xf32>
    %26 = vector.broadcast %25 : vector<8x1xf32> to vector<8x512xf32>
    %27 = arith.mulf %26, %9 : vector<8x512xf32>
    %28 = arith.addf %24, %27 : vector<8x512xf32>
    %29 = vector.extract_strided_slice %22 {offsets = [0, 1], sizes = [8, 1], strides = [1, 1]} : vector<8x128xf32> to vector<8x1xf32>
    %30 = vector.broadcast %29 : vector<8x1xf32> to vector<8x512xf32>
    %31 = arith.mulf %30, %12 : vector<8x512xf32>
    %32 = arith.addf %28, %31 : vector<8x512xf32>
    %33 = vector.extract_strided_slice %22 {offsets = [0, 2], sizes = [8, 1], strides = [1, 1]} : vector<8x128xf32> to vector<8x1xf32>
    %34 = vector.broadcast %33 : vector<8x1xf32> to vector<8x512xf32>
    %35 = arith.mulf %34, %15 : vector<8x512xf32>
    %36 = arith.addf %32, %35 : vector<8x512xf32>
    %37 = vector.extract_strided_slice %22 {offsets = [0, 3], sizes = [8, 1], strides = [1, 1]} : vector<8x128xf32> to vector<8x1xf32>
    %38 = vector.broadcast %37 : vector<8x1xf32> to vector<8x512xf32>
    %39 = arith.mulf %38, %18 : vector<8x512xf32>
    %40 = arith.addf %36, %39 : vector<8x512xf32>
    %41 = vector.extract_strided_slice %22 {offsets = [0, 4], sizes = [8, 1], strides = [1, 1]} : vector<8x128xf32> to vector<8x1xf32>
    %42 = vector.broadcast %41 : vector<8x1xf32> to vector<8x512xf32>
    %43 = arith.mulf %42, %21 : vector<8x512xf32>
    %44 = arith.addf %40, %43 : vector<8x512xf32>
    %45 = vector.extract_strided_slice %44 {offsets = [0, 0], sizes = [8, 128], strides = [1, 1]} : vector<8x512xf32> to vector<8x128xf32>
    %46 = arith.negf %45 : vector<8x128xf32>
    %47 = math.exp %46 : vector<8x128xf32>
    %cst_9 = arith.constant 1.000000e+00 : f32
    %48 = vector.broadcast %cst_9 : f32 to vector<8x128xf32>
    %49 = arith.addf %48, %47 : vector<8x128xf32>
    %50 = arith.divf %48, %49 : vector<8x128xf32>
    %51 = vector.extract_strided_slice %44 {offsets = [0, 128], sizes = [8, 128], strides = [1, 1]} : vector<8x512xf32> to vector<8x128xf32>
    %52 = arith.negf %51 : vector<8x128xf32>
    %53 = math.exp %52 : vector<8x128xf32>
    %cst_10 = arith.constant 1.000000e+00 : f32
    %54 = vector.broadcast %cst_10 : f32 to vector<8x128xf32>
    %55 = arith.addf %54, %53 : vector<8x128xf32>
    %56 = arith.divf %54, %55 : vector<8x128xf32>
    %57 = vector.extract_strided_slice %44 {offsets = [0, 256], sizes = [8, 128], strides = [1, 1]} : vector<8x512xf32> to vector<8x128xf32>
    %58 = math.tanh %57 : vector<8x128xf32>
    %59 = vector.extract_strided_slice %44 {offsets = [0, 384], sizes = [8, 128], strides = [1, 1]} : vector<8x512xf32> to vector<8x128xf32>
    %60 = arith.negf %59 : vector<8x128xf32>
    %61 = math.exp %60 : vector<8x128xf32>
    %cst_11 = arith.constant 1.000000e+00 : f32
    %62 = vector.broadcast %cst_11 : f32 to vector<8x128xf32>
    %63 = arith.addf %62, %61 : vector<8x128xf32>
    %64 = arith.divf %62, %63 : vector<8x128xf32>
    %65 = arith.mulf %56, %23 : vector<8x128xf32>
    %66 = arith.mulf %50, %58 : vector<8x128xf32>
    %67 = arith.addf %65, %66 : vector<8x128xf32>
    %68 = math.tanh %67 : vector<8x128xf32>
    %69 = arith.mulf %64, %68 : vector<8x128xf32>
    %70 = vector.extract_strided_slice %5 {offsets = [8, 0], sizes = [8, 512], strides = [1, 1]} : vector<64x512xf32> to vector<8x512xf32>
    %71 = vector.extract_strided_slice %69 {offsets = [0, 0], sizes = [8, 1], strides = [1, 1]} : vector<8x128xf32> to vector<8x1xf32>
    %72 = vector.broadcast %71 : vector<8x1xf32> to vector<8x512xf32>
    %73 = arith.mulf %72, %9 : vector<8x512xf32>
    %74 = arith.addf %70, %73 : vector<8x512xf32>
    %75 = vector.extract_strided_slice %69 {offsets = [0, 1], sizes = [8, 1], strides = [1, 1]} : vector<8x128xf32> to vector<8x1xf32>
    %76 = vector.broadcast %75 : vector<8x1xf32> to vector<8x512xf32>
    %77 = arith.mulf %76, %12 : vector<8x512xf32>
    %78 = arith.addf %74, %77 : vector<8x512xf32>
    %79 = vector.extract_strided_slice %69 {offsets = [0, 2], sizes = [8, 1], strides = [1, 1]} : vector<8x128xf32> to vector<8x1xf32>
    %80 = vector.broadcast %79 : vector<8x1xf32> to vector<8x512xf32>
    %81 = arith.mulf %80, %15 : vector<8x512xf32>
    %82 = arith.addf %78, %81 : vector<8x512xf32>
    %83 = vector.extract_strided_slice %69 {offsets = [0, 3], sizes = [8, 1], strides = [1, 1]} : vector<8x128xf32> to vector<8x1xf32>
    %84 = vector.broadcast %83 : vector<8x1xf32> to vector<8x512xf32>
    %85 = arith.mulf %84, %18 : vector<8x512xf32>
    %86 = arith.addf %82, %85 : vector<8x512xf32>
    %87 = vector.extract_strided_slice %69 {offsets = [0, 4], sizes = [8, 1], strides = [1, 1]} : vector<8x128xf32> to vector<8x1xf32>
    %88 = vector.broadcast %87 : vector<8x1xf32> to vector<8x512xf32>
    %89 = arith.mulf %88, %21 : vector<8x512xf32>
    %90 = arith.addf %86, %89 : vector<8x512xf32>
    %91 = vector.extract_strided_slice %90 {offsets = [0, 0], sizes = [8, 128], strides = [1, 1]} : vector<8x512xf32> to vector<8x128xf32>
    %92 = arith.negf %91 : vector<8x128xf32>
    %93 = math.exp %92 : vector<8x128xf32>
    %cst_12 = arith.constant 1.000000e+00 : f32
    %94 = vector.broadcast %cst_12 : f32 to vector<8x128xf32>
    %95 = arith.addf %94, %93 : vector<8x128xf32>
    %96 = arith.divf %94, %95 : vector<8x128xf32>
    %97 = vector.extract_strided_slice %90 {offsets = [0, 128], sizes = [8, 128], strides = [1, 1]} : vector<8x512xf32> to vector<8x128xf32>
    %98 = arith.negf %97 : vector<8x128xf32>
    %99 = math.exp %98 : vector<8x128xf32>
    %cst_13 = arith.constant 1.000000e+00 : f32
    %100 = vector.broadcast %cst_13 : f32 to vector<8x128xf32>
    %101 = arith.addf %100, %99 : vector<8x128xf32>
    %102 = arith.divf %100, %101 : vector<8x128xf32>
    %103 = vector.extract_strided_slice %90 {offsets = [0, 256], sizes = [8, 128], strides = [1, 1]} : vector<8x512xf32> to vector<8x128xf32>
    %104 = math.tanh %103 : vector<8x128xf32>
    %105 = vector.extract_strided_slice %90 {offsets = [0, 384], sizes = [8, 128], strides = [1, 1]} : vector<8x512xf32> to vector<8x128xf32>
    %106 = arith.negf %105 : vector<8x128xf32>
    %107 = math.exp %106 : vector<8x128xf32>
    %cst_14 = arith.constant 1.000000e+00 : f32
    %108 = vector.broadcast %cst_14 : f32 to vector<8x128xf32>
    %109 = arith.addf %108, %107 : vector<8x128xf32>
    %110 = arith.divf %108, %109 : vector<8x128xf32>
    %111 = arith.mulf %102, %67 : vector<8x128xf32>
    %112 = arith.mulf %96, %104 : vector<8x128xf32>
    %113 = arith.addf %111, %112 : vector<8x128xf32>
    %114 = math.tanh %113 : vector<8x128xf32>
    %115 = arith.mulf %110, %114 : vector<8x128xf32>
    %116 = vector.extract_strided_slice %5 {offsets = [16, 0], sizes = [8, 512], strides = [1, 1]} : vector<64x512xf32> to vector<8x512xf32>
    %117 = vector.extract_strided_slice %115 {offsets = [0, 0], sizes = [8, 1], strides = [1, 1]} : vector<8x128xf32> to vector<8x1xf32>
    %118 = vector.broadcast %117 : vector<8x1xf32> to vector<8x512xf32>
    %119 = arith.mulf %118, %9 : vector<8x512xf32>
    %120 = arith.addf %116, %119 : vector<8x512xf32>
    %121 = vector.extract_strided_slice %115 {offsets = [0, 1], sizes = [8, 1], strides = [1, 1]} : vector<8x128xf32> to vector<8x1xf32>
    %122 = vector.broadcast %121 : vector<8x1xf32> to vector<8x512xf32>
    %123 = arith.mulf %122, %12 : vector<8x512xf32>
    %124 = arith.addf %120, %123 : vector<8x512xf32>
    %125 = vector.extract_strided_slice %115 {offsets = [0, 2], sizes = [8, 1], strides = [1, 1]} : vector<8x128xf32> to vector<8x1xf32>
    %126 = vector.broadcast %125 : vector<8x1xf32> to vector<8x512xf32>
    %127 = arith.mulf %126, %15 : vector<8x512xf32>
    %128 = arith.addf %124, %127 : vector<8x512xf32>
    %129 = vector.extract_strided_slice %115 {offsets = [0, 3], sizes = [8, 1], strides = [1, 1]} : vector<8x128xf32> to vector<8x1xf32>
    %130 = vector.broadcast %129 : vector<8x1xf32> to vector<8x512xf32>
    %131 = arith.mulf %130, %18 : vector<8x512xf32>
    %132 = arith.addf %128, %131 : vector<8x512xf32>
    %133 = vector.extract_strided_slice %115 {offsets = [0, 4], sizes = [8, 1], strides = [1, 1]} : vector<8x128xf32> to vector<8x1xf32>
    %134 = vector.broadcast %133 : vector<8x1xf32> to vector<8x512xf32>
    %135 = arith.mulf %134, %21 : vector<8x512xf32>
    %136 = arith.addf %132, %135 : vector<8x512xf32>
    %137 = vector.extract_strided_slice %136 {offsets = [0, 0], sizes = [8, 128], strides = [1, 1]} : vector<8x512xf32> to vector<8x128xf32>
    %138 = arith.negf %137 : vector<8x128xf32>
    %139 = math.exp %138 : vector<8x128xf32>
    %cst_15 = arith.constant 1.000000e+00 : f32
    %140 = vector.broadcast %cst_15 : f32 to vector<8x128xf32>
    %141 = arith.addf %140, %139 : vector<8x128xf32>
    %142 = arith.divf %140, %141 : vector<8x128xf32>
    %143 = vector.extract_strided_slice %136 {offsets = [0, 128], sizes = [8, 128], strides = [1, 1]} : vector<8x512xf32> to vector<8x128xf32>
    %144 = arith.negf %143 : vector<8x128xf32>
    %145 = math.exp %144 : vector<8x128xf32>
    %cst_16 = arith.constant 1.000000e+00 : f32
    %146 = vector.broadcast %cst_16 : f32 to vector<8x128xf32>
    %147 = arith.addf %146, %145 : vector<8x128xf32>
    %148 = arith.divf %146, %147 : vector<8x128xf32>
    %149 = vector.extract_strided_slice %136 {offsets = [0, 256], sizes = [8, 128], strides = [1, 1]} : vector<8x512xf32> to vector<8x128xf32>
    %150 = math.tanh %149 : vector<8x128xf32>
    %151 = vector.extract_strided_slice %136 {offsets = [0, 384], sizes = [8, 128], strides = [1, 1]} : vector<8x512xf32> to vector<8x128xf32>
    %152 = arith.negf %151 : vector<8x128xf32>
    %153 = math.exp %152 : vector<8x128xf32>
    %cst_17 = arith.constant 1.000000e+00 : f32
    %154 = vector.broadcast %cst_17 : f32 to vector<8x128xf32>
    %155 = arith.addf %154, %153 : vector<8x128xf32>
    %156 = arith.divf %154, %155 : vector<8x128xf32>
    %157 = arith.mulf %148, %113 : vector<8x128xf32>
    %158 = arith.mulf %142, %150 : vector<8x128xf32>
    %159 = arith.addf %157, %158 : vector<8x128xf32>
    %160 = math.tanh %159 : vector<8x128xf32>
    %161 = arith.mulf %156, %160 : vector<8x128xf32>
    %162 = vector.extract_strided_slice %5 {offsets = [24, 0], sizes = [8, 512], strides = [1, 1]} : vector<64x512xf32> to vector<8x512xf32>
    %163 = vector.extract_strided_slice %161 {offsets = [0, 0], sizes = [8, 1], strides = [1, 1]} : vector<8x128xf32> to vector<8x1xf32>
    %164 = vector.broadcast %163 : vector<8x1xf32> to vector<8x512xf32>
    %165 = arith.mulf %164, %9 : vector<8x512xf32>
    %166 = arith.addf %162, %165 : vector<8x512xf32>
    %167 = vector.extract_strided_slice %161 {offsets = [0, 1], sizes = [8, 1], strides = [1, 1]} : vector<8x128xf32> to vector<8x1xf32>
    %168 = vector.broadcast %167 : vector<8x1xf32> to vector<8x512xf32>
    %169 = arith.mulf %168, %12 : vector<8x512xf32>
    %170 = arith.addf %166, %169 : vector<8x512xf32>
    %171 = vector.extract_strided_slice %161 {offsets = [0, 2], sizes = [8, 1], strides = [1, 1]} : vector<8x128xf32> to vector<8x1xf32>
    %172 = vector.broadcast %171 : vector<8x1xf32> to vector<8x512xf32>
    %173 = arith.mulf %172, %15 : vector<8x512xf32>
    %174 = arith.addf %170, %173 : vector<8x512xf32>
    %175 = vector.extract_strided_slice %161 {offsets = [0, 3], sizes = [8, 1], strides = [1, 1]} : vector<8x128xf32> to vector<8x1xf32>
    %176 = vector.broadcast %175 : vector<8x1xf32> to vector<8x512xf32>
    %177 = arith.mulf %176, %18 : vector<8x512xf32>
    %178 = arith.addf %174, %177 : vector<8x512xf32>
    %179 = vector.extract_strided_slice %161 {offsets = [0, 4], sizes = [8, 1], strides = [1, 1]} : vector<8x128xf32> to vector<8x1xf32>
    %180 = vector.broadcast %179 : vector<8x1xf32> to vector<8x512xf32>
    %181 = arith.mulf %180, %21 : vector<8x512xf32>
    %182 = arith.addf %178, %181 : vector<8x512xf32>
    %183 = vector.extract_strided_slice %182 {offsets = [0, 0], sizes = [8, 128], strides = [1, 1]} : vector<8x512xf32> to vector<8x128xf32>
    %184 = arith.negf %183 : vector<8x128xf32>
    %185 = math.exp %184 : vector<8x128xf32>
    %cst_18 = arith.constant 1.000000e+00 : f32
    %186 = vector.broadcast %cst_18 : f32 to vector<8x128xf32>
    %187 = arith.addf %186, %185 : vector<8x128xf32>
    %188 = arith.divf %186, %187 : vector<8x128xf32>
    %189 = vector.extract_strided_slice %182 {offsets = [0, 128], sizes = [8, 128], strides = [1, 1]} : vector<8x512xf32> to vector<8x128xf32>
    %190 = arith.negf %189 : vector<8x128xf32>
    %191 = math.exp %190 : vector<8x128xf32>
    %cst_19 = arith.constant 1.000000e+00 : f32
    %192 = vector.broadcast %cst_19 : f32 to vector<8x128xf32>
    %193 = arith.addf %192, %191 : vector<8x128xf32>
    %194 = arith.divf %192, %193 : vector<8x128xf32>
    %195 = vector.extract_strided_slice %182 {offsets = [0, 256], sizes = [8, 128], strides = [1, 1]} : vector<8x512xf32> to vector<8x128xf32>
    %196 = math.tanh %195 : vector<8x128xf32>
    %197 = vector.extract_strided_slice %182 {offsets = [0, 384], sizes = [8, 128], strides = [1, 1]} : vector<8x512xf32> to vector<8x128xf32>
    %198 = arith.negf %197 : vector<8x128xf32>
    %199 = math.exp %198 : vector<8x128xf32>
    %cst_20 = arith.constant 1.000000e+00 : f32
    %200 = vector.broadcast %cst_20 : f32 to vector<8x128xf32>
    %201 = arith.addf %200, %199 : vector<8x128xf32>
    %202 = arith.divf %200, %201 : vector<8x128xf32>
    %203 = arith.mulf %194, %159 : vector<8x128xf32>
    %204 = arith.mulf %188, %196 : vector<8x128xf32>
    %205 = arith.addf %203, %204 : vector<8x128xf32>
    %206 = math.tanh %205 : vector<8x128xf32>
    %207 = arith.mulf %202, %206 : vector<8x128xf32>
    %208 = vector.extract_strided_slice %5 {offsets = [32, 0], sizes = [8, 512], strides = [1, 1]} : vector<64x512xf32> to vector<8x512xf32>
    %209 = vector.extract_strided_slice %207 {offsets = [0, 0], sizes = [8, 1], strides = [1, 1]} : vector<8x128xf32> to vector<8x1xf32>
    %210 = vector.broadcast %209 : vector<8x1xf32> to vector<8x512xf32>
    %211 = arith.mulf %210, %9 : vector<8x512xf32>
    %212 = arith.addf %208, %211 : vector<8x512xf32>
    %213 = vector.extract_strided_slice %207 {offsets = [0, 1], sizes = [8, 1], strides = [1, 1]} : vector<8x128xf32> to vector<8x1xf32>
    %214 = vector.broadcast %213 : vector<8x1xf32> to vector<8x512xf32>
    %215 = arith.mulf %214, %12 : vector<8x512xf32>
    %216 = arith.addf %212, %215 : vector<8x512xf32>
    %217 = vector.extract_strided_slice %207 {offsets = [0, 2], sizes = [8, 1], strides = [1, 1]} : vector<8x128xf32> to vector<8x1xf32>
    %218 = vector.broadcast %217 : vector<8x1xf32> to vector<8x512xf32>
    %219 = arith.mulf %218, %15 : vector<8x512xf32>
    %220 = arith.addf %216, %219 : vector<8x512xf32>
    %221 = vector.extract_strided_slice %207 {offsets = [0, 3], sizes = [8, 1], strides = [1, 1]} : vector<8x128xf32> to vector<8x1xf32>
    %222 = vector.broadcast %221 : vector<8x1xf32> to vector<8x512xf32>
    %223 = arith.mulf %222, %18 : vector<8x512xf32>
    %224 = arith.addf %220, %223 : vector<8x512xf32>
    %225 = vector.extract_strided_slice %207 {offsets = [0, 4], sizes = [8, 1], strides = [1, 1]} : vector<8x128xf32> to vector<8x1xf32>
    %226 = vector.broadcast %225 : vector<8x1xf32> to vector<8x512xf32>
    %227 = arith.mulf %226, %21 : vector<8x512xf32>
    %228 = arith.addf %224, %227 : vector<8x512xf32>
    %229 = vector.extract_strided_slice %228 {offsets = [0, 0], sizes = [8, 128], strides = [1, 1]} : vector<8x512xf32> to vector<8x128xf32>
    %230 = arith.negf %229 : vector<8x128xf32>
    %231 = math.exp %230 : vector<8x128xf32>
    %cst_21 = arith.constant 1.000000e+00 : f32
    %232 = vector.broadcast %cst_21 : f32 to vector<8x128xf32>
    %233 = arith.addf %232, %231 : vector<8x128xf32>
    %234 = arith.divf %232, %233 : vector<8x128xf32>
    %235 = vector.extract_strided_slice %228 {offsets = [0, 128], sizes = [8, 128], strides = [1, 1]} : vector<8x512xf32> to vector<8x128xf32>
    %236 = arith.negf %235 : vector<8x128xf32>
    %237 = math.exp %236 : vector<8x128xf32>
    %cst_22 = arith.constant 1.000000e+00 : f32
    %238 = vector.broadcast %cst_22 : f32 to vector<8x128xf32>
    %239 = arith.addf %238, %237 : vector<8x128xf32>
    %240 = arith.divf %238, %239 : vector<8x128xf32>
    %241 = vector.extract_strided_slice %228 {offsets = [0, 256], sizes = [8, 128], strides = [1, 1]} : vector<8x512xf32> to vector<8x128xf32>
    %242 = math.tanh %241 : vector<8x128xf32>
    %243 = vector.extract_strided_slice %228 {offsets = [0, 384], sizes = [8, 128], strides = [1, 1]} : vector<8x512xf32> to vector<8x128xf32>
    %244 = arith.negf %243 : vector<8x128xf32>
    %245 = math.exp %244 : vector<8x128xf32>
    %cst_23 = arith.constant 1.000000e+00 : f32
    %246 = vector.broadcast %cst_23 : f32 to vector<8x128xf32>
    %247 = arith.addf %246, %245 : vector<8x128xf32>
    %248 = arith.divf %246, %247 : vector<8x128xf32>
    %249 = arith.mulf %240, %205 : vector<8x128xf32>
    %250 = arith.mulf %234, %242 : vector<8x128xf32>
    %251 = arith.addf %249, %250 : vector<8x128xf32>
    %252 = math.tanh %251 : vector<8x128xf32>
    %253 = arith.mulf %248, %252 : vector<8x128xf32>
    %254 = vector.extract_strided_slice %5 {offsets = [40, 0], sizes = [8, 512], strides = [1, 1]} : vector<64x512xf32> to vector<8x512xf32>
    %255 = vector.extract_strided_slice %253 {offsets = [0, 0], sizes = [8, 1], strides = [1, 1]} : vector<8x128xf32> to vector<8x1xf32>
    %256 = vector.broadcast %255 : vector<8x1xf32> to vector<8x512xf32>
    %257 = arith.mulf %256, %9 : vector<8x512xf32>
    %258 = arith.addf %254, %257 : vector<8x512xf32>
    %259 = vector.extract_strided_slice %253 {offsets = [0, 1], sizes = [8, 1], strides = [1, 1]} : vector<8x128xf32> to vector<8x1xf32>
    %260 = vector.broadcast %259 : vector<8x1xf32> to vector<8x512xf32>
    %261 = arith.mulf %260, %12 : vector<8x512xf32>
    %262 = arith.addf %258, %261 : vector<8x512xf32>
    %263 = vector.extract_strided_slice %253 {offsets = [0, 2], sizes = [8, 1], strides = [1, 1]} : vector<8x128xf32> to vector<8x1xf32>
    %264 = vector.broadcast %263 : vector<8x1xf32> to vector<8x512xf32>
    %265 = arith.mulf %264, %15 : vector<8x512xf32>
    %266 = arith.addf %262, %265 : vector<8x512xf32>
    %267 = vector.extract_strided_slice %253 {offsets = [0, 3], sizes = [8, 1], strides = [1, 1]} : vector<8x128xf32> to vector<8x1xf32>
    %268 = vector.broadcast %267 : vector<8x1xf32> to vector<8x512xf32>
    %269 = arith.mulf %268, %18 : vector<8x512xf32>
    %270 = arith.addf %266, %269 : vector<8x512xf32>
    %271 = vector.extract_strided_slice %253 {offsets = [0, 4], sizes = [8, 1], strides = [1, 1]} : vector<8x128xf32> to vector<8x1xf32>
    %272 = vector.broadcast %271 : vector<8x1xf32> to vector<8x512xf32>
    %273 = arith.mulf %272, %21 : vector<8x512xf32>
    %274 = arith.addf %270, %273 : vector<8x512xf32>
    %275 = vector.extract_strided_slice %274 {offsets = [0, 0], sizes = [8, 128], strides = [1, 1]} : vector<8x512xf32> to vector<8x128xf32>
    %276 = arith.negf %275 : vector<8x128xf32>
    %277 = math.exp %276 : vector<8x128xf32>
    %cst_24 = arith.constant 1.000000e+00 : f32
    %278 = vector.broadcast %cst_24 : f32 to vector<8x128xf32>
    %279 = arith.addf %278, %277 : vector<8x128xf32>
    %280 = arith.divf %278, %279 : vector<8x128xf32>
    %281 = vector.extract_strided_slice %274 {offsets = [0, 128], sizes = [8, 128], strides = [1, 1]} : vector<8x512xf32> to vector<8x128xf32>
    %282 = arith.negf %281 : vector<8x128xf32>
    %283 = math.exp %282 : vector<8x128xf32>
    %cst_25 = arith.constant 1.000000e+00 : f32
    %284 = vector.broadcast %cst_25 : f32 to vector<8x128xf32>
    %285 = arith.addf %284, %283 : vector<8x128xf32>
    %286 = arith.divf %284, %285 : vector<8x128xf32>
    %287 = vector.extract_strided_slice %274 {offsets = [0, 256], sizes = [8, 128], strides = [1, 1]} : vector<8x512xf32> to vector<8x128xf32>
    %288 = math.tanh %287 : vector<8x128xf32>
    %289 = vector.extract_strided_slice %274 {offsets = [0, 384], sizes = [8, 128], strides = [1, 1]} : vector<8x512xf32> to vector<8x128xf32>
    %290 = arith.negf %289 : vector<8x128xf32>
    %291 = math.exp %290 : vector<8x128xf32>
    %cst_26 = arith.constant 1.000000e+00 : f32
    %292 = vector.broadcast %cst_26 : f32 to vector<8x128xf32>
    %293 = arith.addf %292, %291 : vector<8x128xf32>
    %294 = arith.divf %292, %293 : vector<8x128xf32>
    %295 = arith.mulf %286, %251 : vector<8x128xf32>
    %296 = arith.mulf %280, %288 : vector<8x128xf32>
    %297 = arith.addf %295, %296 : vector<8x128xf32>
    %298 = math.tanh %297 : vector<8x128xf32>
    %299 = arith.mulf %294, %298 : vector<8x128xf32>
    %300 = vector.extract_strided_slice %5 {offsets = [48, 0], sizes = [8, 512], strides = [1, 1]} : vector<64x512xf32> to vector<8x512xf32>
    %301 = vector.extract_strided_slice %299 {offsets = [0, 0], sizes = [8, 1], strides = [1, 1]} : vector<8x128xf32> to vector<8x1xf32>
    %302 = vector.broadcast %301 : vector<8x1xf32> to vector<8x512xf32>
    %303 = arith.mulf %302, %9 : vector<8x512xf32>
    %304 = arith.addf %300, %303 : vector<8x512xf32>
    %305 = vector.extract_strided_slice %299 {offsets = [0, 1], sizes = [8, 1], strides = [1, 1]} : vector<8x128xf32> to vector<8x1xf32>
    %306 = vector.broadcast %305 : vector<8x1xf32> to vector<8x512xf32>
    %307 = arith.mulf %306, %12 : vector<8x512xf32>
    %308 = arith.addf %304, %307 : vector<8x512xf32>
    %309 = vector.extract_strided_slice %299 {offsets = [0, 2], sizes = [8, 1], strides = [1, 1]} : vector<8x128xf32> to vector<8x1xf32>
    %310 = vector.broadcast %309 : vector<8x1xf32> to vector<8x512xf32>
    %311 = arith.mulf %310, %15 : vector<8x512xf32>
    %312 = arith.addf %308, %311 : vector<8x512xf32>
    %313 = vector.extract_strided_slice %299 {offsets = [0, 3], sizes = [8, 1], strides = [1, 1]} : vector<8x128xf32> to vector<8x1xf32>
    %314 = vector.broadcast %313 : vector<8x1xf32> to vector<8x512xf32>
    %315 = arith.mulf %314, %18 : vector<8x512xf32>
    %316 = arith.addf %312, %315 : vector<8x512xf32>
    %317 = vector.extract_strided_slice %299 {offsets = [0, 4], sizes = [8, 1], strides = [1, 1]} : vector<8x128xf32> to vector<8x1xf32>
    %318 = vector.broadcast %317 : vector<8x1xf32> to vector<8x512xf32>
    %319 = arith.mulf %318, %21 : vector<8x512xf32>
    %320 = arith.addf %316, %319 : vector<8x512xf32>
    %321 = vector.extract_strided_slice %320 {offsets = [0, 0], sizes = [8, 128], strides = [1, 1]} : vector<8x512xf32> to vector<8x128xf32>
    %322 = arith.negf %321 : vector<8x128xf32>
    %323 = math.exp %322 : vector<8x128xf32>
    %cst_27 = arith.constant 1.000000e+00 : f32
    %324 = vector.broadcast %cst_27 : f32 to vector<8x128xf32>
    %325 = arith.addf %324, %323 : vector<8x128xf32>
    %326 = arith.divf %324, %325 : vector<8x128xf32>
    %327 = vector.extract_strided_slice %320 {offsets = [0, 128], sizes = [8, 128], strides = [1, 1]} : vector<8x512xf32> to vector<8x128xf32>
    %328 = arith.negf %327 : vector<8x128xf32>
    %329 = math.exp %328 : vector<8x128xf32>
    %cst_28 = arith.constant 1.000000e+00 : f32
    %330 = vector.broadcast %cst_28 : f32 to vector<8x128xf32>
    %331 = arith.addf %330, %329 : vector<8x128xf32>
    %332 = arith.divf %330, %331 : vector<8x128xf32>
    %333 = vector.extract_strided_slice %320 {offsets = [0, 256], sizes = [8, 128], strides = [1, 1]} : vector<8x512xf32> to vector<8x128xf32>
    %334 = math.tanh %333 : vector<8x128xf32>
    %335 = vector.extract_strided_slice %320 {offsets = [0, 384], sizes = [8, 128], strides = [1, 1]} : vector<8x512xf32> to vector<8x128xf32>
    %336 = arith.negf %335 : vector<8x128xf32>
    %337 = math.exp %336 : vector<8x128xf32>
    %cst_29 = arith.constant 1.000000e+00 : f32
    %338 = vector.broadcast %cst_29 : f32 to vector<8x128xf32>
    %339 = arith.addf %338, %337 : vector<8x128xf32>
    %340 = arith.divf %338, %339 : vector<8x128xf32>
    %341 = arith.mulf %332, %297 : vector<8x128xf32>
    %342 = arith.mulf %326, %334 : vector<8x128xf32>
    %343 = arith.addf %341, %342 : vector<8x128xf32>
    %344 = math.tanh %343 : vector<8x128xf32>
    %345 = arith.mulf %340, %344 : vector<8x128xf32>
    %346 = vector.extract_strided_slice %5 {offsets = [56, 0], sizes = [8, 512], strides = [1, 1]} : vector<64x512xf32> to vector<8x512xf32>
    %347 = vector.extract_strided_slice %345 {offsets = [0, 0], sizes = [8, 1], strides = [1, 1]} : vector<8x128xf32> to vector<8x1xf32>
    %348 = vector.broadcast %347 : vector<8x1xf32> to vector<8x512xf32>
    %349 = arith.mulf %348, %9 : vector<8x512xf32>
    %350 = arith.addf %346, %349 : vector<8x512xf32>
    %351 = vector.extract_strided_slice %345 {offsets = [0, 1], sizes = [8, 1], strides = [1, 1]} : vector<8x128xf32> to vector<8x1xf32>
    %352 = vector.broadcast %351 : vector<8x1xf32> to vector<8x512xf32>
    %353 = arith.mulf %352, %12 : vector<8x512xf32>
    %354 = arith.addf %350, %353 : vector<8x512xf32>
    %355 = vector.extract_strided_slice %345 {offsets = [0, 2], sizes = [8, 1], strides = [1, 1]} : vector<8x128xf32> to vector<8x1xf32>
    %356 = vector.broadcast %355 : vector<8x1xf32> to vector<8x512xf32>
    %357 = arith.mulf %356, %15 : vector<8x512xf32>
    %358 = arith.addf %354, %357 : vector<8x512xf32>
    %359 = vector.extract_strided_slice %345 {offsets = [0, 3], sizes = [8, 1], strides = [1, 1]} : vector<8x128xf32> to vector<8x1xf32>
    %360 = vector.broadcast %359 : vector<8x1xf32> to vector<8x512xf32>
    %361 = arith.mulf %360, %18 : vector<8x512xf32>
    %362 = arith.addf %358, %361 : vector<8x512xf32>
    %363 = vector.extract_strided_slice %345 {offsets = [0, 4], sizes = [8, 1], strides = [1, 1]} : vector<8x128xf32> to vector<8x1xf32>
    %364 = vector.broadcast %363 : vector<8x1xf32> to vector<8x512xf32>
    %365 = arith.mulf %364, %21 : vector<8x512xf32>
    %366 = arith.addf %362, %365 : vector<8x512xf32>
    %367 = vector.extract_strided_slice %366 {offsets = [0, 0], sizes = [8, 128], strides = [1, 1]} : vector<8x512xf32> to vector<8x128xf32>
    %368 = arith.negf %367 : vector<8x128xf32>
    %369 = math.exp %368 : vector<8x128xf32>
    %cst_30 = arith.constant 1.000000e+00 : f32
    %370 = vector.broadcast %cst_30 : f32 to vector<8x128xf32>
    %371 = arith.addf %370, %369 : vector<8x128xf32>
    %372 = arith.divf %370, %371 : vector<8x128xf32>
    %373 = vector.extract_strided_slice %366 {offsets = [0, 128], sizes = [8, 128], strides = [1, 1]} : vector<8x512xf32> to vector<8x128xf32>
    %374 = arith.negf %373 : vector<8x128xf32>
    %375 = math.exp %374 : vector<8x128xf32>
    %cst_31 = arith.constant 1.000000e+00 : f32
    %376 = vector.broadcast %cst_31 : f32 to vector<8x128xf32>
    %377 = arith.addf %376, %375 : vector<8x128xf32>
    %378 = arith.divf %376, %377 : vector<8x128xf32>
    %379 = vector.extract_strided_slice %366 {offsets = [0, 256], sizes = [8, 128], strides = [1, 1]} : vector<8x512xf32> to vector<8x128xf32>
    %380 = math.tanh %379 : vector<8x128xf32>
    %381 = vector.extract_strided_slice %366 {offsets = [0, 384], sizes = [8, 128], strides = [1, 1]} : vector<8x512xf32> to vector<8x128xf32>
    %382 = arith.negf %381 : vector<8x128xf32>
    %383 = math.exp %382 : vector<8x128xf32>
    %cst_32 = arith.constant 1.000000e+00 : f32
    %384 = vector.broadcast %cst_32 : f32 to vector<8x128xf32>
    %385 = arith.addf %384, %383 : vector<8x128xf32>
    %386 = arith.divf %384, %385 : vector<8x128xf32>
    %387 = arith.mulf %378, %343 : vector<8x128xf32>
    %388 = arith.mulf %372, %380 : vector<8x128xf32>
    %389 = arith.addf %387, %388 : vector<8x128xf32>
    %390 = math.tanh %389 : vector<8x128xf32>
    %391 = arith.mulf %386, %390 : vector<8x128xf32>
    %392 = vector.extract_strided_slice %0 {offsets = [56, 0], sizes = [8, 128], strides = [1, 1]} : vector<64x128xf32> to vector<8x128xf32>
    %c0_33 = arith.constant 0 : index
    %c0_34 = arith.constant 0 : index
    %393 = vector.load %arg4[%c0_33, %c0_34] : memref<128x512xf32, #tpu.memory_space<vmem>>, vector<128x512xf32>
    %cst_35 = arith.constant dense<0.000000e+00> : vector<8x512xf32>
    %394 = tpu.matmul %392, %393, %cst_35 {dimension_numbers = #tpu.dot_dimension_numbers<[1], [0], [0], [1], [0, 0, 1, 1], [], []>, precision = #tpu.contract_precision<fp32>} : vector<8x128xf32>, vector<128x512xf32>, vector<8x512xf32> -> vector<8x512xf32>
    %c0_36 = arith.constant 0 : index
    %c0_37 = arith.constant 0 : index
    %395 = vector.load %arg5[%c0_36, %c0_37] : memref<1x512xf32, #tpu.memory_space<vmem>>, vector<1x512xf32>
    %396 = vector.broadcast %395 : vector<1x512xf32> to vector<8x512xf32>
    %397 = arith.addf %394, %396 : vector<8x512xf32>
    %398 = vector.extract_strided_slice %397 {offsets = [0, 0], sizes = [8, 128], strides = [1, 1]} : vector<8x512xf32> to vector<8x128xf32>
    %399 = arith.negf %398 : vector<8x128xf32>
    %400 = math.exp %399 : vector<8x128xf32>
    %cst_38 = arith.constant 1.000000e+00 : f32
    %401 = vector.broadcast %cst_38 : f32 to vector<8x128xf32>
    %402 = arith.addf %401, %400 : vector<8x128xf32>
    %403 = arith.divf %401, %402 : vector<8x128xf32>
    %404 = vector.extract_strided_slice %397 {offsets = [0, 256], sizes = [8, 128], strides = [1, 1]} : vector<8x512xf32> to vector<8x128xf32>
    %405 = math.tanh %404 : vector<8x128xf32>
    %406 = vector.extract_strided_slice %397 {offsets = [0, 384], sizes = [8, 128], strides = [1, 1]} : vector<8x512xf32> to vector<8x128xf32>
    %407 = arith.negf %406 : vector<8x128xf32>
    %408 = math.exp %407 : vector<8x128xf32>
    %cst_39 = arith.constant 1.000000e+00 : f32
    %409 = vector.broadcast %cst_39 : f32 to vector<8x128xf32>
    %410 = arith.addf %409, %408 : vector<8x128xf32>
    %411 = arith.divf %409, %410 : vector<8x128xf32>
    %412 = arith.mulf %403, %405 : vector<8x128xf32>
    %413 = math.tanh %412 : vector<8x128xf32>
    %414 = arith.mulf %411, %413 : vector<8x128xf32>
    %c0_40 = arith.constant 0 : index
    %c0_41 = arith.constant 0 : index
    %415 = vector.load %arg6[%c0_40, %c0_41] : memref<128x128xf32, #tpu.memory_space<vmem>>, vector<128x128xf32>
    %cst_42 = arith.constant dense<0.000000e+00> : vector<8x128xf32>
    %416 = tpu.matmul %391, %415, %cst_42 {dimension_numbers = #tpu.dot_dimension_numbers<[1], [0], [0], [1], [0, 0, 1, 1], [], []>, precision = #tpu.contract_precision<fp32>} : vector<8x128xf32>, vector<128x128xf32>, vector<8x128xf32> -> vector<8x128xf32>
    %c0_43 = arith.constant 0 : index
    %c0_44 = arith.constant 0 : index
    %417 = vector.load %arg7[%c0_43, %c0_44] : memref<128x128xf32, #tpu.memory_space<vmem>>, vector<128x128xf32>
    %cst_45 = arith.constant dense<0.000000e+00> : vector<8x128xf32>
    %418 = tpu.matmul %414, %417, %cst_45 {dimension_numbers = #tpu.dot_dimension_numbers<[1], [0], [0], [1], [0, 0, 1, 1], [], []>, precision = #tpu.contract_precision<fp32>} : vector<8x128xf32>, vector<128x128xf32>, vector<8x128xf32> -> vector<8x128xf32>
    %419 = arith.addf %416, %418 : vector<8x128xf32>
    %c0_46 = arith.constant 0 : index
    %c0_47 = arith.constant 0 : index
    %420 = vector.load %arg8[%c0_46, %c0_47] : memref<1x128xf32, #tpu.memory_space<vmem>>, vector<1x128xf32>
    %421 = vector.broadcast %420 : vector<1x128xf32> to vector<8x128xf32>
    %422 = arith.addf %419, %421 : vector<8x128xf32>
    %c0_48 = arith.constant 0 : index
    %c0_49 = arith.constant 0 : index
    %423 = vector.load %arg9[%c0_48, %c0_49] : memref<8x128xf32, #tpu.memory_space<vmem>>, vector<8x128xf32>
    tpu.vector_store %arg9[%c0_48, %c0_49], %422 {strides = array<i32>} : memref<8x128xf32, #tpu.memory_space<vmem>>, vector<8x128xf32>,
    return
  }
}

</mosaic_0001>

<bundles_post_ra>
// kernel: bilstm_forward.1
= control target key start
LH: loop header
LB: loop body
LE: loop exit
PB: predicated region body
PF: predicated region fallthrough
CT: control target
= control target key end

     0   :  { %14 = vsyncpa [#allocation3], 0  ;;  %s11838_s0 = inlined_call_operand.vmem [shape: f32[64,128], index: 0, kind: input, shape index: {}]   ;;  %s11839_s1 = inlined_call_operand.hbm [shape: f32[128,512], index: 1, kind: input, shape index: {}]   ;;  %s11840_s2 = inlined_call_operand.vmem [shape: f32[8,512], index: 2, kind: input, shape index: {}]   ;;  %s11841_s3 = inlined_call_operand.vmem [shape: f32[1,512], index: 3, kind: input, shape index: {}]   ;;  %s11842_s4 = inlined_call_operand.hbm [shape: f32[128,512], index: 4, kind: input, shape index: {}]   ;;  %s11843_s5 = inlined_call_operand.vmem [shape: f32[1,512], index: 5, kind: input, shape index: {}]   ;;  %s11844_s6 = inlined_call_operand.hbm [shape: f32[128,128], index: 6, kind: input, shape index: {}]   ;;  %s11845_s7 = inlined_call_operand.hbm [shape: f32[128,128], index: 7, kind: input, shape index: {}]   ;;  %s11846_s8 = inlined_call_operand.vmem [shape: f32[1,128], index: 8, kind: input, shape index: {}]   ;;  %s11847_s9 = inlined_call_operand.vmem [shape: f32[8,128], index: 9, kind: output, shape index: {}]  }
   0x1   :  { %15 = vsyncpa [#allocation5], 0 }
   0x2   :  { %16 = vsyncpa [#allocation8], 0  ;;  %s8659_s30 = smov [#allocation4]   ;;  %s8660_s11 = smov [#allocation2]  }
   0x3   :  { %s40_s10 = sshll.u32 %s8659_s30, 4  ;;  %s24_s12 = sshll.u32 %s8660_s11, 4  ;;  %s41_s10 = int_to_ptr.vmem [resolvable:$true] %s40_s10  ;;  %s8725_s12 = int_to_ptr.vmem [resolvable:$true] %s24_s12 }
   0x4   :  { %s8565_s15 = scalar_lea.hbm %s11842_s4, 8192 }
   0x5   :  { %p8566_p0 = scmp.ne.s32.totalorder %s11842_s4, %s8565_s15  ;;  %p8569_p1 = scmp.lt.u32.totalorder %s8565_s15, %s11842_s4 }
   0x7   :  { %p8571_p2 = pnand %p8569_p1, %p8566_p0 }
   0x9   :  { %8574 = shalt.err (!%p8571_p2)
}
   0xa   :  { %s8575_s20 = scalar_lea.vmem %s41_s10, 8192  ;;  %p8580_p4 = scmp.lt.s32.totalorder %s41_s10, %s41_s10 }
   0xb   :  { %p8576_p3 = scmp.ne.s32.totalorder %s41_s10, %s8575_s20  ;;  %p8581_p5 = scmp.lt.s32.totalorder %s8575_s20, %s8575_s20 }
   0xd   :  { %p8582_p6 = por %p8581_p5, %p8580_p4 }
   0xf   :  { %p8583_p7 = pnand %p8582_p6, %p8576_p3 }
  0x11   :  { %8586 = shalt.err (!%p8583_p7)
}
  0x12   :  { %s8661_s21 = smov 512   ;;  %s8662_s22 = smov 32  }
  0x13   :  { %46 = dma.hbm_to_vmem [thread:$0]  %s11842_s4, 8192, %s41_s10, [#allocation5], %s8661_s21, %s8661_s21, %s8662_s22  }
  0x14   :  { %s8587_s27 = scalar_lea.hbm %s11839_s1, 8192 }
  0x15   :  { %p8588_p8 = scmp.ne.s32.totalorder %s11839_s1, %s8587_s27  ;;  %p8591_p9 = scmp.lt.u32.totalorder %s8587_s27, %s11839_s1 }
  0x17   :  { %p8593_p10 = pnand %p8591_p9, %p8588_p8 }
  0x19   :  { %8596 = shalt.err (!%p8593_p10)
}
  0x1a   :  { %s8597_s13 = scalar_lea.vmem %s8725_s12, 8192  ;;  %p8602_p12 = scmp.lt.s32.totalorder %s8725_s12, %s8725_s12 }
  0x1b   :  { %p8598_p11 = scmp.ne.s32.totalorder %s8725_s12, %s8597_s13  ;;  %p8603_p13 = scmp.lt.s32.totalorder %s8597_s13, %s8597_s13 }
  0x1d   :  { %p8604_p0 = por %p8603_p13, %p8602_p12 }
  0x1f   :  { %p8605_p1 = pnand %p8604_p0, %p8598_p11 }
  0x21   :  { %8608 = shalt.err (!%p8605_p1)
}
  0x22   :  { %30 = dma.hbm_to_vmem [thread:$0]  %s11839_s1, 8192, %s8725_s12, [#allocation3], %s8661_s21, %s8661_s21, %s8662_s22  }
  0x23   :  { %s8663_s14 = smov [#allocation6]   ;;  %s8609_s18 = scalar_lea.hbm %s11844_s6, 2048 }
  0x24   :  { %s54_s15 = sshll.u32 %s8663_s14, 4  ;;  %p8610_p2 = scmp.ne.s32.totalorder %s11844_s6, %s8609_s18  ;;  %s55_s15 = int_to_ptr.vmem [resolvable:$true] %s54_s15 }
  0x25   :  { %p8613_p3 = scmp.lt.u32.totalorder %s8609_s18, %s11844_s6 }
  0x27   :  { %p8615_p4 = pnand %p8613_p3, %p8610_p2 }
  0x29   :  { %8618 = shalt.err (!%p8615_p4)
}
  0x2a   :  { %s8619_s25 = scalar_lea.vmem %s55_s15, 2048  ;;  %p8624_p6 = scmp.lt.s32.totalorder %s55_s15, %s55_s15 }
  0x2b   :  { %p8620_p5 = scmp.ne.s32.totalorder %s55_s15, %s8619_s25  ;;  %p8625_p7 = scmp.lt.s32.totalorder %s8619_s25, %s8619_s25 }
  0x2d   :  { %p8626_p8 = por %p8625_p7, %p8624_p6 }
  0x2f   :  { %p8627_p9 = pnand %p8626_p8, %p8620_p5 }
  0x31   :  { %8630 = shalt.err (!%p8627_p9)
}
  0x32   :  { %s8664_s1 = smov 128   ;;  %s8665_s12 = smov 8  }
  0x33   :  { %60 = dma.hbm_to_vmem [thread:$0]  %s11844_s6, 2048, %s55_s15, [#allocation5], %s8664_s1, %s8664_s1, %s8665_s12  }
  0x34   :  { %s8666_s26 = smov [#allocation7]   ;;  %s8631_s30 = scalar_lea.hbm %s11845_s7, 2048 }
  0x35   :  { %s66_s27 = sshll.u32 %s8666_s26, 4  ;;  %p8632_p10 = scmp.ne.s32.totalorder %s11845_s7, %s8631_s30  ;;  %s67_s27 = int_to_ptr.vmem [resolvable:$true] %s66_s27 }
  0x36   :  { %p8635_p11 = scmp.lt.u32.totalorder %s8631_s30, %s11845_s7 }
  0x38   :  { %p8637_p12 = pnand %p8635_p11, %p8632_p10 }
  0x3a   :  { %8640 = shalt.err (!%p8637_p12)
}
  0x3b   :  { %s8641_s14 = scalar_lea.vmem %s67_s27, 2048  ;;  %p8646_p0 = scmp.lt.s32.totalorder %s67_s27, %s67_s27 }
  0x3c   :  { %p8642_p13 = scmp.ne.s32.totalorder %s67_s27, %s8641_s14  ;;  %p8647_p1 = scmp.lt.s32.totalorder %s8641_s14, %s8641_s14 }
  0x3e   :  { %p8648_p2 = por %p8647_p1, %p8646_p0 }
  0x40   :  { %p8649_p3 = pnand %p8648_p2, %p8642_p13 }
  0x42   :  { %8652 = shalt.err (!%p8649_p3)
}
  0x43   :  { %72 = dma.hbm_to_vmem [thread:$0]  %s11845_s7, 2048, %s67_s27, [#allocation8], %s8664_s1, %s8664_s1, %s8665_s12  }
  0x44   :  { %8653 = dma.done.wait [#allocation3], 8192  }
  0x45   :  { %8654 = vsyncadd [#allocation3], 4294959104 }
  0x46   :  { %8655 = dma.done.wait [#allocation5], 10240  }
  0x47   :  { %8656 = vsyncadd [#allocation5], 4294957056 }
  0x48   :  { %8657 = dma.done.wait [#allocation8], 2048  }
  0x49   :  { %8658 = vsyncadd [#allocation8], 4294965248  ;;  %v11848_v0 = vmov 0.0   ;;  %v96_v1 = vld [vmem:[#allocation2 + $0x8] sm:$0xff]  ;;  %v98_v3 = vld [vmem:[#allocation2 + $0x18] sm:$0xff]  ;;  %vm8674_vm0 = vmmov 0  }
  0x4a   :  { %277 = vmatprep.mubr.f32.mxu0 %v11848_v0  ;;  %1475 = vmatprep.mubr.f32.mxu1 %v11848_v0  ;;  %v100_v2 = vld [vmem:[#allocation2 + $0x28] sm:$0xff]  ;;  %v181_v4 = vand.u32 4294901760, %v96_v1  ;;  %v102_v6 = vld [vmem:[#allocation2 + $0x38] sm:$0xff]  ;;  %v1379_v7 = vand.u32 4294901760, %v98_v3  ;;  %v95_v8 = vld [vmem:[#allocation2] sm:$0xff] }
  0x4b   :  { %v185_v5 = vand.u32 4294901760, %v100_v2  ;;  %v99_v9 = vld [vmem:[#allocation2 + $0x20] sm:$0xff]  ;;  %v1383_v10 = vand.u32 4294901760, %v102_v6  ;;  %v183_v11 = vand.u32 4294901760, %v95_v8  ;;  %v97_v13 = vld [vmem:[#allocation2 + $0x10] sm:$0xff]  ;;  %v104_v15 = vld [vmem:[#allocation2 + $0x48] sm:$0xff] }
  0x4c   :  { %v187_v12 = vand.u32 4294901760, %v99_v9  ;;  %v101_v14 = vld [vmem:[#allocation2 + $0x30] sm:$0xff]  ;;  %v8784_v17 = vsub.f32 %v96_v1, %v181_v4  ;;  %v8788_v19 = vsub.f32 %v98_v3, %v1379_v7  ;;  %v108_v20 = vld [vmem:[#allocation2 + $0x68] sm:$0xff]  ;;  %v106_v21 = vld [vmem:[#allocation2 + $0x58] sm:$0xff]  ;;  %v1381_v29 = vand.u32 4294901760, %v97_v13 }
  0x4d   :  { %v8782_v16 = vpack.c.bf16 %v185_v5, %v181_v4  ;;  %v8786_v18 = vsub.f32 %v100_v2, %v185_v5  ;;  %v110_v22 = vld [vmem:[#allocation2 + $0x78] sm:$0xff]  ;;  %v8790_v23 = vpack.c.bf16 %v1383_v10, %v1379_v7  ;;  %v8792_v24 = vsub.f32 %v102_v6, %v1383_v10  ;;  %v103_v27 = vld [vmem:[#allocation2 + $0x40] sm:$0xff]  ;;  %v105_v37 = vld [vmem:[#allocation2 + $0x50] sm:$0xff] }
  0x4e   :  { %12411 = vst [vmem:[#allocation13_spill] sm:$0xff] %v8784_v17  ;;  %12413 = vst [vmem:[#allocation15_spill] sm:$0xff] %v8788_v19  ;;  %v8794_v25 = vpack.c.bf16 %v187_v12, %v183_v11  ;;  %v8796_v26 = vsub.f32 %v95_v8, %v183_v11  ;;  %v8799_v28 = vsub.f32 %v99_v9, %v187_v12  ;;  %v1385_v30 = vand.u32 4294901760, %v101_v14  ;;  %v107_v32 = vld [vmem:[#allocation2 + $0x60] sm:$0xff]  ;;  %v109_v38 = vld [vmem:[#allocation2 + $0x70] sm:$0xff] }
  0x4f   :  { %12410 = vst [vmem:[#allocation12_spill] sm:$0xff] %v8782_v16  ;;  %12412 = vst [vmem:[#allocation14_spill] sm:$0xff] %v8786_v18  ;;  %7103 = vmatprep.subr.bf16.mxu0 %v8782_v16  ;;  %v189_v31 = vand.u32 4294901760, %v104_v15  ;;  %7295 = vmatprep.subr.bf16.mxu1 %v8790_v23  ;;  %v193_v33 = vand.u32 4294901760, %v108_v20  ;;  %v1387_v34 = vand.u32 4294901760, %v106_v21  ;;  %v1391_v35 = vand.u32 4294901760, %v110_v22 }
  0x50   :  { %12414 = vst [vmem:[#allocation16_spill] sm:$0xff] %v8790_v23  ;;  %12415 = vst [vmem:[#allocation17_spill] sm:$0xff] %v8792_v24  ;;  %7105 = vmatpush1.bf16.msra.mxu0 %v8794_v25  ;;  %v191_v36 = vand.u32 4294901760, %v103_v27  ;;  %v8803_v39 = vpack.c.bf16 %v1385_v30, %v1381_v29  ;;  %v8805_v40 = vsub.f32 %v97_v13, %v1381_v29  ;;  %v112_v43 = vld [vmem:[#allocation2 + $0x88] sm:$0xff]  ;;  %v114_v45 = vld [vmem:[#allocation2 + $0x98] sm:$0xff]  ;;  %v195_v52 = vand.u32 4294901760, %v107_v32 }
  0x51   :  { %12416 = vst [vmem:[#allocation18_spill] sm:$0xff] %v8794_v25  ;;  %12417 = vst [vmem:[#allocation19_spill] sm:$0xff] %v8796_v26  ;;  %v8807_v41 = vsub.f32 %v101_v14, %v1385_v30  ;;  %v8809_v42 = vsub.f32 %v104_v15, %v189_v31  ;;  %v116_v44 = vld [vmem:[#allocation2 + $0xa8] sm:$0xff]  ;;  %v8811_v46 = vpack.c.bf16 %v193_v33, %v189_v31  ;;  %v118_v50 = vld [vmem:[#allocation2 + $0xb8] sm:$0xff]  ;;  %v1389_v54 = vand.u32 4294901760, %v105_v37 }
  0x52   :  { %12418 = vst [vmem:[#allocation20_spill] sm:$0xff] %v8799_v28  ;;  %12419 = vst [vmem:[#allocation21_spill] sm:$0xff] %v8803_v39  ;;  %v8813_v47 = vsub.f32 %v108_v20, %v193_v33  ;;  %v8815_v48 = vpack.c.bf16 %v1391_v35, %v1387_v34  ;;  %v8817_v49 = vsub.f32 %v106_v21, %v1387_v34  ;;  %7297 = vmatpush1.bf16.msra.mxu1 %v8803_v39  ;;  %v111_v59 = vld [vmem:[#allocation2 + $0x80] sm:$0xff]  ;;  %v113_v2 = vld [vmem:[#allocation2 + $0x90] sm:$0xff] }
  0x53   :  { %12420 = vst [vmem:[#allocation22_spill] sm:$0xff] %v8805_v40  ;;  %12421 = vst [vmem:[#allocation23_spill] sm:$0xff] %v8807_v41  ;;  %v8820_v51 = vsub.f32 %v110_v22, %v1391_v35  ;;  %v8822_v53 = vsub.f32 %v103_v27, %v191_v36  ;;  %7107 = vmatprep.subr.bf16.mxu0 %v8811_v46  ;;  %v1393_v55 = vand.u32 4294901760, %v109_v38  ;;  %v197_v56 = vand.u32 4294901760, %v112_v43  ;;  %v115_v60 = vld [vmem:[#allocation2 + $0xa0] sm:$0xff]  ;;  %v117_v3 = vld [vmem:[#allocation2 + $0xb0] sm:$0xff] }
  0x54   :  { %12422 = vst [vmem:[#allocation24_spill] sm:$0xff] %v8809_v42  ;;  %12423 = vst [vmem:[#allocation25_spill] sm:$0xff] %v8811_v46  ;;  %7299 = vmatprep.subr.bf16.mxu1 %v8815_v48  ;;  %v201_v57 = vand.u32 4294901760, %v116_v44  ;;  %v1395_v58 = vand.u32 4294901760, %v114_v45  ;;  %v8826_v61 = vpack.c.bf16 %v195_v52, %v191_v36  ;;  %v8828_v62 = vsub.f32 %v107_v32, %v195_v52  ;;  %v120_v4 = vld [vmem:[#allocation2 + $0xc8] sm:$0xff]  ;;  %v122_v10 = vld [vmem:[#allocation2 + $0xd8] sm:$0xff] }
  0x55   :  { %12424 = vst [vmem:[#allocation26_spill] sm:$0xff] %v8813_v47  ;;  %12425 = vst [vmem:[#allocation27_spill] sm:$0xff] %v8815_v48  ;;  %v8830_v63 = vsub.f32 %v105_v37, %v1389_v54  ;;  %v1399_v1 = vand.u32 4294901760, %v118_v50  ;;  %v8832_v5 = vpack.c.bf16 %v1393_v55, %v1389_v54  ;;  %v8834_v6 = vsub.f32 %v109_v38, %v1393_v55  ;;  %v124_v9 = vld [vmem:[#allocation2 + $0xe8] sm:$0xff]  ;;  %v126_v11 = vld [vmem:[#allocation2 + $0xf8] sm:$0xff] }
  0x56   :  { %12426 = vst [vmem:[#allocation28_spill] sm:$0xff] %v8817_v49  ;;  %12427 = vst [vmem:[#allocation29_spill] sm:$0xff] %v8820_v51  ;;  %v8836_v7 = vpack.c.bf16 %v201_v57, %v197_v56  ;;  %v8838_v8 = vsub.f32 %v112_v43, %v197_v56  ;;  %7109 = vmatpush1.bf16.msra.mxu0 %v8826_v61  ;;  %v8841_v12 = vsub.f32 %v116_v44, %v201_v57  ;;  %v119_v33 = vld [vmem:[#allocation2 + $0xc0] sm:$0xff]  ;;  %v121_v43 = vld [vmem:[#allocation2 + $0xd0] sm:$0xff] }
  0x57   :  { %12428 = vst [vmem:[#allocation30_spill] sm:$0xff] %v8822_v53  ;;  %12429 = vst [vmem:[#allocation31_spill] sm:$0xff] %v8826_v61  ;;  %v8843_v13 = vpack.c.bf16 %v1399_v1, %v1395_v58  ;;  %v8845_v14 = vsub.f32 %v114_v45, %v1395_v58  ;;  %v8847_v15 = vsub.f32 %v118_v50, %v1399_v1  ;;  %7301 = vmatpush1.bf16.msra.mxu1 %v8832_v5  ;;  %v123_v38 = vld [vmem:[#allocation2 + $0xe0] sm:$0xff]  ;;  %v125_v44 = vld [vmem:[#allocation2 + $0xf0] sm:$0xff] }
  0x58   :  { %12430 = vst [vmem:[#allocation32_spill] sm:$0xff] %v8828_v62  ;;  %12431 = vst [vmem:[#allocation33_spill] sm:$0xff] %v8832_v5  ;;  %7111 = vmatprep.subr.bf16.mxu0 %v8836_v7  ;;  %v199_v20 = vand.u32 4294901760, %v111_v59  ;;  %v203_v21 = vand.u32 4294901760, %v115_v60  ;;  %v1397_v22 = vand.u32 4294901760, %v113_v2  ;;  %v1401_v27 = vand.u32 4294901760, %v117_v3 }
  0x59   :  { %12432 = vst [vmem:[#allocation34_spill] sm:$0xff] %v8836_v7  ;;  %12433 = vst [vmem:[#allocation35_spill] sm:$0xff] %v8843_v13  ;;  %7303 = vmatprep.subr.bf16.mxu1 %v8843_v13  ;;  %v205_v29 = vand.u32 4294901760, %v120_v4  ;;  %v209_v30 = vand.u32 4294901760, %v124_v9  ;;  %v1403_v31 = vand.u32 4294901760, %v122_v10  ;;  %v1407_v32 = vand.u32 4294901760, %v126_v11 }
  0x5a   :  { %v8852_v34 = vpack.c.bf16 %v203_v21, %v199_v20  ;;  %v8854_v35 = vsub.f32 %v111_v59, %v199_v20  ;;  %v8856_v36 = vsub.f32 %v115_v60, %v203_v21  ;;  %v8858_v37 = vpack.c.bf16 %v1401_v27, %v1397_v22  ;;  %v128_v55 = vld [vmem:[#allocation2 + $0x108] sm:$0xff]  ;;  %v130_v57 = vld [vmem:[#allocation2 + $0x118] sm:$0xff]  ;;  %v131_v0 = vld [vmem:[#allocation2 + $0x120] sm:$0xff] }
  0x5b   :  { %v8860_v45 = vsub.f32 %v113_v2, %v1397_v22  ;;  %v8862_v50 = vsub.f32 %v117_v3, %v1401_v27  ;;  %v8864_v52 = vpack.c.bf16 %v209_v30, %v205_v29  ;;  %v8866_v54 = vsub.f32 %v120_v4, %v205_v29  ;;  %v132_v56 = vld [vmem:[#allocation2 + $0x128] sm:$0xff]  ;;  %v134_v21 = vld [vmem:[#allocation2 + $0x138] sm:$0xff]  ;;  %v137_v39 = vld [vmem:[#allocation2 + $0x150] sm:$0xff] }
  0x5c   :  { %12434 = vst [vmem:[#allocation36_spill] sm:$0xff] %v8852_v34  ;;  %12435 = vst [vmem:[#allocation37_spill] sm:$0xff] %v8858_v37  ;;  %7113 = vmatpush1.bf16.msra.mxu0 %v8852_v34  ;;  %7305 = vmatpush1.bf16.msra.mxu1 %v8858_v37  ;;  %v8870_v58 = vsub.f32 %v124_v9, %v209_v30  ;;  %v8872_v59 = vpack.c.bf16 %v1407_v32, %v1403_v31  ;;  %v207_v1 = vand.u32 4294901760, %v119_v33  ;;  %v127_v30 = vld [vmem:[#allocation2 + $0x100] sm:$0xff]  ;;  %v136_v34 = vld [vmem:[#allocation2 + $0x148] sm:$0xff] }
  0x5d   :  { %12436 = vst [vmem:[#allocation38_spill] sm:$0xff] %v8864_v52  ;;  %v8874_v60 = vsub.f32 %v122_v10, %v1403_v31  ;;  %7115 = vmatprep.subr.bf16.mxu0 %v8864_v52  ;;  %v8877_v2 = vsub.f32 %v126_v11, %v1407_v32  ;;  %v211_v3 = vand.u32 4294901760, %v123_v38  ;;  %v1405_v4 = vand.u32 4294901760, %v121_v43  ;;  %v129_v10 = vld [vmem:[#allocation2 + $0x110] sm:$0xff]  ;;  %v140_v13 = vld [vmem:[#allocation2 + $0x168] sm:$0xff]  ;;  %v138_v48 = vld [vmem:[#allocation2 + $0x158] sm:$0xff] }
  0x5e   :  { %12437 = vst [vmem:[#allocation39_spill] sm:$0xff] %v8872_v59  ;;  %v1409_v20 = vand.u32 4294901760, %v125_v44  ;;  %7307 = vmatprep.subr.bf16.mxu1 %v8872_v59  ;;  %v8880_v22 = vsub.f32 %v119_v33, %v207_v1  ;;  %v213_v27 = vand.u32 4294901760, %v128_v55  ;;  %v217_v9 = vand.u32 4294901760, %v132_v56  ;;  %v133_v52 = vld [vmem:[#allocation2 + $0x130] sm:$0xff] }
  0x5f   :  { %v1411_v29 = vand.u32 4294901760, %v130_v57  ;;  %v8882_v31 = vpack.c.bf16 %v211_v3, %v207_v1  ;;  %v8884_v37 = vsub.f32 %v123_v38, %v211_v3  ;;  %v8888_v32 = vsub.f32 %v121_v43, %v1405_v4  ;;  %v141_v16 = vld [vmem:[#allocation2 + $0x170] sm:$0xff] }
  0x60   :  { %v8886_v11 = vpack.c.bf16 %v1409_v20, %v1405_v4  ;;  %v8890_v59 = vsub.f32 %v125_v44, %v1409_v20  ;;  %v8892_v33 = vpack.c.bf16 %v217_v9, %v213_v27  ;;  %v8894_v5 = vsub.f32 %v128_v55, %v213_v27  ;;  %v142_v55 = vld [vmem:[#allocation2 + $0x178] sm:$0xff] }
  0x61   :  { %12438 = vst [vmem:[#allocation40_spill] sm:$0xff] %v8882_v31  ;;  %v8896_v7 = vsub.f32 %v132_v56, %v217_v9  ;;  %7117 = vmatpush1.bf16.msra.mxu0 %v8882_v31  ;;  %v1415_v38 = vand.u32 4294901760, %v134_v21  ;;  %v8900_v1 = vsub.f32 %v130_v57, %v1411_v29  ;;  %v215_v43 = vand.u32 4294901760, %v127_v30  ;;  %v135_v57 = vld [vmem:[#allocation2 + $0x140] sm:$0xff] }
  0x62   :  { %12439 = vst [vmem:[#allocation41_spill] sm:$0xff] %v8886_v11  ;;  %12440 = vst [vmem:[#allocation42_spill] sm:$0xff] %v8890_v59  ;;  %7309 = vmatpush1.bf16.msra.mxu1 %v8886_v11  ;;  %v219_v3 = vand.u32 4294901760, %v131_v0  ;;  %7119 = vmatprep.subr.bf16.mxu0 %v8892_v33  ;;  %v1413_v4 = vand.u32 4294901760, %v129_v10  ;;  %v1417_v44 = vand.u32 4294901760, %v133_v52  ;;  %v221_v20 = vand.u32 4294901760, %v136_v34 }
  0x63   :  { %12441 = vst [vmem:[#allocation43_spill] sm:$0xff] %v8892_v33  ;;  %12442 = vst [vmem:[#allocation44_spill] sm:$0xff] %v8894_v5  ;;  %v225_v61 = vand.u32 4294901760, %v140_v13  ;;  %v8903_v27 = vpack.c.bf16 %v1415_v38, %v1411_v29  ;;  %v8905_v56 = vsub.f32 %v134_v21, %v1415_v38  ;;  %v8909_v11 = vsub.f32 %v127_v30, %v215_v43  ;;  %v139_v31 = vld [vmem:[#allocation2 + $0x160] sm:$0xff]  ;;  %v144_v29 = vld [vmem:[#allocation2 + $0x188] sm:$0xff] }
  0x64   :  { %12443 = vst [vmem:[#allocation45_spill] sm:$0xff] %v8896_v7  ;;  %12444 = vst [vmem:[#allocation46_spill] sm:$0xff] %v8900_v1  ;;  %v8907_v9 = vpack.c.bf16 %v219_v3, %v215_v43  ;;  %v8911_v46 = vsub.f32 %v131_v0, %v219_v3  ;;  %v8913_v33 = vpack.c.bf16 %v1417_v44, %v1413_v4  ;;  %v148_v1 = vld [vmem:[#allocation2 + $0x1a8] sm:$0xff]  ;;  %v1419_v0 = vand.u32 4294901760, %v138_v48 }
  0x65   :  { %12445 = vst [vmem:[#allocation47_spill] sm:$0xff] %v8903_v27  ;;  %12446 = vst [vmem:[#allocation48_spill] sm:$0xff] %v8905_v56  ;;  %v8915_v25 = vsub.f32 %v129_v10, %v1413_v4  ;;  %v8917_v23 = vsub.f32 %v133_v52, %v1417_v44  ;;  %7311 = vmatprep.subr.bf16.mxu1 %v8903_v27  ;;  %v8921_v21 = vpack.c.bf16 %v225_v61, %v221_v20  ;;  %v156_v56 = vld [vmem:[#allocation2 + $0x1e8] sm:$0xff] }
  0x66   :  { %12447 = vst [vmem:[#allocation49_spill] sm:$0xff] %v8907_v9  ;;  %12448 = vst [vmem:[#allocation50_spill] sm:$0xff] %v8909_v11  ;;  %7121 = vmatpush1.bf16.msra.mxu0 %v8907_v9  ;;  %v8923_v30 = vsub.f32 %v136_v34, %v221_v20  ;;  %v8925_v38 = vsub.f32 %v140_v13, %v225_v61  ;;  %7313 = vmatpush1.bf16.msra.mxu1 %v8913_v33  ;;  %v1423_v10 = vand.u32 4294901760, %v142_v55  ;;  %v149_v11 = vld [vmem:[#allocation2 + $0x1b0] sm:$0xff] }
  0x67   :  { %12449 = vst [vmem:[#allocation51_spill] sm:$0xff] %v8911_v46  ;;  %12450 = vst [vmem:[#allocation52_spill] sm:$0xff] %v8913_v33  ;;  %v223_v43 = vand.u32 4294901760, %v135_v57  ;;  %v227_v52 = vand.u32 4294901760, %v139_v31  ;;  %v1421_v3 = vand.u32 4294901760, %v137_v39  ;;  %7123 = vmatprep.subr.bf16.mxu0 %v8921_v21  ;;  %v8929_v4 = vsub.f32 %v138_v48, %v1419_v0  ;;  %v143_v33 = vld [vmem:[#allocation2 + $0x180] sm:$0xff] }
  0x68   :  { %12451 = vst [vmem:[#allocation53_spill] sm:$0xff] %v8915_v25  ;;  %12452 = vst [vmem:[#allocation54_spill] sm:$0xff] %v8917_v23  ;;  %v1425_v44 = vand.u32 4294901760, %v141_v16  ;;  %v229_v27 = vand.u32 4294901760, %v144_v29  ;;  %v233_v9 = vand.u32 4294901760, %v148_v1  ;;  %v146_v23 = vld [vmem:[#allocation2 + $0x198] sm:$0xff]  ;;  %v8931_v34 = vpack.c.bf16 %v1423_v10, %v1419_v0 }
  0x69   :  { %12453 = vst [vmem:[#allocation55_spill] sm:$0xff] %v8921_v21  ;;  %12454 = vst [vmem:[#allocation56_spill] sm:$0xff] %v8923_v30  ;;  %v150_v25 = vld [vmem:[#allocation2 + $0x1b8] sm:$0xff]  ;;  %v8933_v61 = vsub.f32 %v142_v55, %v1423_v10  ;;  %v8935_v13 = vpack.c.bf16 %v227_v52, %v223_v43  ;;  %v8937_v20 = vsub.f32 %v135_v57, %v223_v43  ;;  %v145_v30 = vld [vmem:[#allocation2 + $0x190] sm:$0xff]  ;;  %v231_v43 = vand.u32 4294901760, %v143_v33 }
  0x6a   :  { %12455 = vst [vmem:[#allocation57_spill] sm:$0xff] %v8925_v38  ;;  %12456 = vst [vmem:[#allocation58_spill] sm:$0xff] %v8929_v4  ;;  %v147_v38 = vld [vmem:[#allocation2 + $0x1a0] sm:$0xff]  ;;  %v8939_v46 = vsub.f32 %v139_v31, %v227_v52  ;;  %v8941_v48 = vpack.c.bf16 %v1425_v44, %v1421_v3  ;;  %v8943_v21 = vsub.f32 %v137_v39, %v1421_v3  ;;  %v152_v0 = vld [vmem:[#allocation2 + $0x1c8] sm:$0xff]  ;;  %7315 = vmatprep.subr.bf16.mxu1 %v8931_v34 }
  0x6b   :  { %12457 = vst [vmem:[#allocation59_spill] sm:$0xff] %v8931_v34  ;;  %12458 = vst [vmem:[#allocation60_spill] sm:$0xff] %v8933_v61  ;;  %v8945_v4 = vsub.f32 %v141_v16, %v1425_v44  ;;  %7125 = vmatpush1.bf16.msra.mxu0 %v8935_v13  ;;  %v8949_v55 = vpack.c.bf16 %v233_v9, %v229_v27  ;;  %v8951_v57 = vsub.f32 %v144_v29, %v229_v27 }
  0x6c   :  { %12459 = vst [vmem:[#allocation61_spill] sm:$0xff] %v8935_v13  ;;  %12460 = vst [vmem:[#allocation62_spill] sm:$0xff] %v8937_v20  ;;  %v8953_v10 = vsub.f32 %v148_v1, %v233_v9  ;;  %v1427_v31 = vand.u32 4294901760, %v146_v23  ;;  %7317 = vmatpush1.bf16.msra.mxu1 %v8941_v48  ;;  %v1431_v39 = vand.u32 4294901760, %v150_v25  ;;  %v235_v16 = vand.u32 4294901760, %v147_v38  ;;  %v157_v20 = vld [vmem:[#allocation2 + $0x1f0] sm:$0xff] }
  0x6d   :  { %12461 = vst [vmem:[#allocation63_spill] sm:$0xff] %v8939_v46  ;;  %12462 = vst [vmem:[#allocation64_spill] sm:$0xff] %v8941_v48  ;;  %v1429_v52 = vand.u32 4294901760, %v145_v30  ;;  %7127 = vmatprep.subr.bf16.mxu0 %v8949_v55  ;;  %v1433_v44 = vand.u32 4294901760, %v149_v11  ;;  %v237_v34 = vand.u32 4294901760, %v152_v0  ;;  %v241_v13 = vand.u32 4294901760, %v156_v56 }
  0x6e   :  { %12463 = vst [vmem:[#allocation65_spill] sm:$0xff] %v8943_v21  ;;  %12464 = vst [vmem:[#allocation66_spill] sm:$0xff] %v8945_v4  ;;  %v8957_v3 = vsub.f32 %v146_v23, %v1427_v31  ;;  %v154_v4 = vld [vmem:[#allocation2 + $0x1d8] sm:$0xff]  ;;  %v8959_v27 = vpack.c.bf16 %v1431_v39, %v1427_v31  ;;  %v8961_v1 = vsub.f32 %v150_v25, %v1431_v39  ;;  %v151_v48 = vld [vmem:[#allocation2 + $0x1c0] sm:$0xff] }
  0x6f   :  { %12465 = vst [vmem:[#allocation67_spill] sm:$0xff] %v8949_v55  ;;  %12466 = vst [vmem:[#allocation68_spill] sm:$0xff] %v8951_v57  ;;  %v158_v21 = vld [vmem:[#allocation2 + $0x1f8] sm:$0xff]  ;;  %v8963_v9 = vpack.c.bf16 %v235_v16, %v231_v43  ;;  %v8965_v29 = vsub.f32 %v143_v33, %v231_v43  ;;  %v153_v57 = vld [vmem:[#allocation2 + $0x1d0] sm:$0xff]  ;;  %v8967_v46 = vsub.f32 %v147_v38, %v235_v16  ;;  %v1435_v39 = vand.u32 4294901760, %v154_v4 }
  0x70   :  { %12467 = vst [vmem:[#allocation69_spill] sm:$0xff] %v8953_v10  ;;  %12468 = vst [vmem:[#allocation70_spill] sm:$0xff] %v8957_v3  ;;  %v155_v10 = vld [vmem:[#allocation2 + $0x1e0] sm:$0xff]  ;;  %v8969_v23 = vpack.c.bf16 %v1433_v44, %v1429_v52  ;;  %v8971_v55 = vsub.f32 %v145_v30, %v1429_v52  ;;  %v8973_v3 = vsub.f32 %v149_v11, %v1433_v44  ;;  %7319 = vmatprep.subr.bf16.mxu1 %v8959_v27 }
  0x71   :  { %12469 = vst [vmem:[#allocation71_spill] sm:$0xff] %v8959_v27  ;;  %12470 = vst [vmem:[#allocation72_spill] sm:$0xff] %v8961_v1  ;;  %v87_v25 = vld [vmem:[%s11838_s0] sm:$0xff]  ;;  %7129 = vmatpush1.bf16.msra.mxu0 %v8963_v9  ;;  %v8980_v33 = vpack.c.bf16 %v241_v13, %v237_v34  ;;  %v8982_v31 = vsub.f32 %v152_v0, %v237_v34  ;;  %v8984_v38 = vsub.f32 %v156_v56, %v241_v13 }
  0x72   :  { %12471 = vst [vmem:[#allocation73_spill] sm:$0xff] %v8963_v9  ;;  %12472 = vst [vmem:[#allocation74_spill] sm:$0xff] %v8969_v23  ;;  %7321 = vmatpush1.bf16.msra.mxu1 %v8969_v23  ;;  %v1439_v11 = vand.u32 4294901760, %v158_v21  ;;  %v239_v30 = vand.u32 4294901760, %v151_v48  ;;  %v243_v43 = vand.u32 4294901760, %v155_v10  ;;  %v1437_v16 = vand.u32 4294901760, %v153_v57 }
  0x73   :  { %12473 = vst [vmem:[#allocation75_spill] sm:$0xff] %v8980_v33  ;;  %12474 = vst [vmem:[#allocation76_spill] sm:$0xff] %v8984_v38  ;;  %7131 = vmatprep.subr.bf16.mxu0 %v8980_v33  ;;  %v8988_v52 = vsub.f32 %v154_v4, %v1435_v39  ;;  %v1441_v44 = vand.u32 4294901760, %v157_v20  ;;  %v8990_v27 = vand.u32 4294901760, %v87_v25  ;;  %v11925_v9 = vand.u32 4294901760, %v8784_v17 }
  0x74   :  { %v8993_v34 = vpack.c.bf16 %v1439_v11, %v1435_v39  ;;  %v8995_v56 = vsub.f32 %v158_v21, %v1439_v11  ;;  %v8997_v13 = vpack.c.bf16 %v243_v43, %v239_v30  ;;  %v8999_v0 = vsub.f32 %v151_v48, %v239_v30 }
  0x75   :  { %12475 = vst [vmem:[#allocation77_spill] sm:$0xff] %v8990_v27  ;;  %v9001_v23 = vsub.f32 %v155_v10, %v243_v43  ;;  %v9003_v38 = vpack.c.bf16 %v1441_v44, %v1437_v16  ;;  %v9005_v33 = vsub.f32 %v153_v57, %v1437_v16  ;;  %v9007_v4 = vsub.f32 %v157_v20, %v1441_v44 }
  0x76   :  { %12476 = vst [vmem:[#allocation78_spill] sm:$0xff] %v8993_v34  ;;  %12477 = vst [vmem:[#allocation79_spill] sm:$0xff] %v8995_v56  ;;  %7323 = vmatprep.subr.bf16.mxu1 %v8993_v34  ;;  %7133 = vmatpush1.bf16.msra.mxu0 %v8997_v13  ;;  %v9012_v39 = vsub.f32 %v87_v25, %v8990_v27  ;;  %v369_v21 = vsub.f32 %v8784_v17, %v11925_v9  ;;  %v11928_v48 = vand.u32 4294901760, %v8786_v18 }
  0x77   :  { %12478 = vst [vmem:[#allocation80_spill] sm:$0xff] %v8997_v13  ;;  %12479 = vst [vmem:[#allocation81_spill] sm:$0xff] %v9003_v38  ;;  %v11929_v10 = vand.u32 4294901760, %v8788_v19  ;;  %7325 = vmatpush1.bf16.msra.mxu1 %v9003_v38  ;;  %v11932_v20 = vand.u32 4294901760, %v8792_v24  ;;  %v11937_v57 = vand.u32 4294901760, %v8796_v26  ;;  %v11944_v11 = vand.u32 4294901760, %v8799_v28 }
  0x78   :  { %12480 = vst [vmem:[#allocation82_spill] sm:$0xff] %v9012_v39  ;;  %v9025_v25 = vand.u32 4294901760, %v9012_v39  ;;  %v370_v43 = vand.u32 4294901760, %v369_v21  ;;  %v381_v16 = vsub.f32 %v8786_v18, %v11928_v48  ;;  %v12482_v38 = vand.u32 4294901760, %v8805_v40 }
  0x79   :  { %v1567_v44 = vsub.f32 %v8788_v19, %v11929_v10  ;;  %v1579_v9 = vsub.f32 %v8792_v24, %v11932_v20  ;;  %v375_v30 = vsub.f32 %v8796_v26, %v11937_v57  ;;  %v387_v21 = vsub.f32 %v8799_v28, %v11944_v11  ;;  %v88_v10 = vld [vmem:[%s11838_s0 + $0x8] sm:$0xff] }
  0x7a   :  { %12481 = vst [vmem:[#allocation83_spill] sm:$0xff] %v9025_v25  ;;  %v1573_v48 = vsub.f32 %v8805_v40, %v12482_v38  ;;  %v281_v13 = vsub.f32 %v9012_v39, %v9025_v25  ;;  %v382_v20 = vand.u32 4294901760, %v381_v16  ;;  %v11957_v27 = vand.u32 4294901760, %v8807_v41 }
  0x7b   :  { %v1568_v34 = vand.u32 4294901760, %v1567_v44  ;;  %v1580_v57 = vand.u32 4294901760, %v1579_v9  ;;  %v376_v26 = vand.u32 4294901760, %v375_v30  ;;  %v388_v24 = vand.u32 4294901760, %v387_v21  ;;  %v89_v21 = vld [vmem:[%s11838_s0 + $0x10] sm:$0xff] }
  0x7c   :  { %v1574_v19 = vand.u32 4294901760, %v1573_v48  ;;  %v282_v11 = vand.u32 4294901760, %v281_v13  ;;  %v7134_v28 = vpack.c.bf16 %v382_v20, %v370_v43  ;;  %v1585_v38 = vsub.f32 %v8807_v41, %v11957_v27 }
  0x7d   :  { %v9054_v40 = vand.u32 4294901760, %v88_v10  ;;  %v7326_v18 = vpack.c.bf16 %v1580_v57, %v1568_v34  ;;  %v7136_v17 = vpack.c.bf16 %v388_v24, %v376_v26  ;;  %v11960_v25 = vand.u32 4294901760, %v8809_v42 }
  0x7e   :  { %v11959_v16 = vand.u32 4294901760, %v8813_v47  ;;  %283 = vmatmul.mubr.f32.vlgmr.msra.gmra.mrb[0].mxu0 %v282_v11  ;;  %7135 = vmatprep.subr.bf16.mxu0 %v7134_v28  ;;  %v1586_v9 = vand.u32 4294901760, %v1585_v38  ;;  %v11956_v13 = vand.u32 4294901760, %v8817_v49  ;;  %v11955_v48 = vand.u32 4294901760, %v8820_v51 }
  0x7f   :  { %12483 = vst [vmem:[#allocation84_spill] sm:$0xff] %v9054_v40  ;;  %v9059_v30 = vsub.f32 %v88_v10, %v9054_v40  ;;  %1481 = vmatmul.mubr.f32.vlgmr.msra.gmra.mrb[0].mxu1 %v282_v11  ;;  %7327 = vmatprep.subr.bf16.mxu1 %v7326_v18  ;;  %v393_v24 = vsub.f32 %v8809_v42, %v11960_v25  ;;  %v11958_v28 = vand.u32 4294901760, %v8822_v53  ;;  %v11961_v34 = vand.u32 4294901760, %v8828_v62 }
  0x80   :  { %v405_v26 = vsub.f32 %v8813_v47, %v11959_v16  ;;  %7137 = vmatpush1.bf16.msra.mxu0 %v7136_v17  ;;  %v7328_v10 = vpack.c.bf16 %v1586_v9, %v1574_v19  ;;  %v12485_v20 = vmov 0.0   ;;  %v1591_v18 = vsub.f32 %v8817_v49, %v11956_v13 }
  0x81   :  { %12484 = vst [vmem:[#allocation85_spill] sm:$0xff] %v9059_v30  ;;  %288 = vmatprep.mubr.f32.mxu0 %v12485_v20  ;;  %v9073_v57 = vand.u32 4294901760, %v9059_v30  ;;  %v1603_v11 = vsub.f32 %v8820_v51, %v11955_v48  ;;  %1486 = vmatprep.mubr.f32.mxu1 %v12485_v20  ;;  %v394_v43 = vand.u32 4294901760, %v393_v24  ;;  %v399_v17 = vsub.f32 %v8822_v53, %v11958_v28 }
  0x82   :  { %v406_v44 = vand.u32 4294901760, %v405_v26  ;;  %v411_v19 = vsub.f32 %v8828_v62, %v11961_v34  ;;  %7329 = vmatpush1.bf16.msra.mxu1 %v7328_v10  ;;  %v1592_v9 = vand.u32 4294901760, %v1591_v18  ;;  %v11968_v24 = vand.u32 4294901760, %v8830_v63 }
  0x83   :  { %12486 = vst [vmem:[#allocation86_spill] sm:$0xff] %v9073_v57  ;;  %v292_v38 = vsub.f32 %v9059_v30, %v9073_v57  ;;  %v1604_v48 = vand.u32 4294901760, %v1603_v11  ;;  %v400_v13 = vand.u32 4294901760, %v399_v17  ;;  %v11967_v28 = vand.u32 4294901760, %v8834_v6 }
  0x84   :  { %v7138_v26 = vpack.c.bf16 %v406_v44, %v394_v43  ;;  %v412_v27 = vand.u32 4294901760, %v411_v19  ;;  %v1597_v34 = vsub.f32 %v8830_v63, %v11968_v24  ;;  %v9098_v39 = vand.u32 4294901760, %v89_v21 }
  0x85   :  { %v293_v16 = vand.u32 4294901760, %v292_v38  ;;  %v7330_v25 = vpack.c.bf16 %v1604_v48, %v1592_v9  ;;  %v1609_v18 = vsub.f32 %v8834_v6, %v11967_v28  ;;  %v11965_v11 = vand.u32 4294901760, %v8838_v8 }
  0x86   :  { %12487 = vst [vmem:[#allocation87_spill] sm:$0xff] %v9098_v39  ;;  %7139 = vmatprep.subr.bf16.mxu0 %v7138_v26  ;;  %v7140_v10 = vpack.c.bf16 %v412_v27, %v400_v13  ;;  %v11964_v43 = vand.u32 4294901760, %v8841_v12  ;;  %v1598_v44 = vand.u32 4294901760, %v1597_v34  ;;  %v9106_v48 = vsub.f32 %v89_v21, %v9098_v39 }
  0x87   :  { %294 = vmatmul.mubr.f32.gmra.mrb[2].mxu0 %v293_v16  ;;  %1492 = vmatmul.mubr.f32.gmra.mrb[2].mxu1 %v293_v16  ;;  %v11966_v17 = vand.u32 4294901760, %v8845_v14  ;;  %v11969_v19 = vand.u32 4294901760, %v8847_v15  ;;  %v1610_v27 = vand.u32 4294901760, %v1609_v18  ;;  %v417_v13 = vsub.f32 %v8838_v8, %v11965_v11  ;;  %v90_v11 = vld [vmem:[%s11838_s0 + $0x18] sm:$0xff] }
  0x88   :  { %12488 = vst [vmem:[#allocation88_spill] sm:$0xff] %v9106_v48  ;;  %7331 = vmatprep.subr.bf16.mxu1 %v7330_v25  ;;  %7141 = vmatpush1.bf16.msra.mxu0 %v7140_v10  ;;  %v429_v38 = vsub.f32 %v8841_v12, %v11964_v43  ;;  %v11970_v16 = vand.u32 4294901760, %v8854_v35  ;;  %v9120_v34 = vand.u32 4294901760, %v9106_v48  ;;  %v11983_v9 = vand.u32 4294901760, %v8856_v36 }
  0x89   :  { %299 = vmatprep.mubr.f32.mxu0 %v12485_v20  ;;  %1497 = vmatprep.mubr.f32.mxu1 %v12485_v20  ;;  %v1615_v25 = vsub.f32 %v8845_v14, %v11966_v17  ;;  %v1627_v21 = vsub.f32 %v8847_v15, %v11969_v19  ;;  %v7332_v26 = vpack.c.bf16 %v1610_v27, %v1598_v44  ;;  %v418_v10 = vand.u32 4294901760, %v417_v13 }
  0x8a   :  { %12489 = vst [vmem:[#allocation89_spill] sm:$0xff] %v9120_v34  ;;  %v430_v18 = vand.u32 4294901760, %v429_v38  ;;  %v423_v43 = vsub.f32 %v8854_v35, %v11970_v16  ;;  %v303_v17 = vsub.f32 %v9106_v48, %v9120_v34  ;;  %v435_v19 = vsub.f32 %v8856_v36, %v11983_v9 }
  0x8b   :  { %v1616_v28 = vand.u32 4294901760, %v1615_v25  ;;  %v1628_v24 = vand.u32 4294901760, %v1627_v21  ;;  %7333 = vmatpush1.bf16.msra.mxu1 %v7332_v26  ;;  %v11980_v13 = vand.u32 4294901760, %v8860_v45  ;;  %v11979_v38 = vand.u32 4294901760, %v8862_v50 }
  0x8c   :  { %v7142_v44 = vpack.c.bf16 %v430_v18, %v418_v10  ;;  %v424_v27 = vand.u32 4294901760, %v423_v43  ;;  %v304_v16 = vand.u32 4294901760, %v303_v17  ;;  %v436_v30 = vand.u32 4294901760, %v435_v19 }
  0x8d   :  { %v7334_v57 = vpack.c.bf16 %v1628_v24, %v1616_v28  ;;  %v9142_v39 = vand.u32 4294901760, %v90_v11  ;;  %v1621_v25 = vsub.f32 %v8860_v45, %v11980_v13  ;;  %v1633_v21 = vsub.f32 %v8862_v50, %v11979_v38 }
  0x8e   :  { %7143 = vmatprep.subr.bf16.mxu0 %v7142_v44  ;;  %v11977_v43 = vand.u32 4294901760, %v8866_v54  ;;  %v11978_v26 = vand.u32 4294901760, %v8870_v58  ;;  %305 = vmatmul.mubr.f32.gmra.mrb[4].mxu0 %v304_v16  ;;  %v7144_v17 = vpack.c.bf16 %v436_v30, %v424_v27  ;;  %v11981_v24 = vand.u32 4294901760, %v8874_v60 }
  0x8f   :  { %12490 = vst [vmem:[#allocation90_spill] sm:$0xff] %v9142_v39  ;;  %1503 = vmatmul.mubr.f32.gmra.mrb[4].mxu1 %v304_v16  ;;  %v9153_v28 = vsub.f32 %v90_v11, %v9142_v39  ;;  %v11982_v19 = vand.u32 4294901760, %v8877_v2  ;;  %7335 = vmatprep.subr.bf16.mxu1 %v7334_v57  ;;  %v1622_v10 = vand.u32 4294901760, %v1621_v25  ;;  %v1634_v18 = vand.u32 4294901760, %v1633_v21 }
  0x90   :  { %310 = vmatprep.mubr.f32.mxu0 %v12485_v20  ;;  %v441_v44 = vsub.f32 %v8866_v54, %v11977_v43  ;;  %v453_v30 = vsub.f32 %v8870_v58, %v11978_v26  ;;  %7145 = vmatpush1.bf16.msra.mxu0 %v7144_v17  ;;  %v1639_v57 = vsub.f32 %v8874_v60, %v11981_v24  ;;  %v11994_v27 = vand.u32 4294901760, %v8880_v22  ;;  %v91_v26 = vld [vmem:[%s11838_s0 + $0x20] sm:$0xff] }
  0x91   :  { %12491 = vst [vmem:[#allocation91_spill] sm:$0xff] %v9153_v28  ;;  %1508 = vmatprep.mubr.f32.mxu1 %v12485_v20  ;;  %v9166_v11 = vand.u32 4294901760, %v9153_v28  ;;  %v1651_v16 = vsub.f32 %v8877_v2, %v11982_v19  ;;  %v7336_v25 = vpack.c.bf16 %v1634_v18, %v1622_v10  ;;  %v11991_v17 = vand.u32 4294901760, %v8884_v37 }
  0x92   :  { %v442_v21 = vand.u32 4294901760, %v441_v44  ;;  %v454_v43 = vand.u32 4294901760, %v453_v30  ;;  %v1640_v13 = vand.u32 4294901760, %v1639_v57  ;;  %v447_v19 = vsub.f32 %v8880_v22, %v11994_v27  ;;  %v12499_v27 = vld [vmem:[#allocation51_spill] sm:$0xff] }
  0x93   :  { %12492 = vst [vmem:[#allocation92_spill] sm:$0xff] %v9166_v11  ;;  %v314_v38 = vsub.f32 %v9153_v28, %v9166_v11  ;;  %v1652_v24 = vand.u32 4294901760, %v1651_v16  ;;  %7337 = vmatpush1.bf16.msra.mxu1 %v7336_v25  ;;  %v459_v10 = vsub.f32 %v8884_v37, %v11991_v17  ;;  %v11990_v18 = vand.u32 4294901760, %v8888_v32 }
  0x94   :  { %v7146_v9 = vpack.c.bf16 %v454_v43, %v442_v21  ;;  %v11992_v44 = vand.u32 4294901760, %v8890_v59  ;;  %v448_v48 = vand.u32 4294901760, %v447_v19  ;;  %v9189_v11 = vand.u32 4294901760, %v91_v26  ;;  %v12496_v19 = vld [vmem:[#allocation48_spill] sm:$0xff] }
  0x95   :  { %v315_v30 = vand.u32 4294901760, %v314_v38  ;;  %v7338_v34 = vpack.c.bf16 %v1652_v24, %v1640_v13  ;;  %v460_v57 = vand.u32 4294901760, %v459_v10  ;;  %v1645_v16 = vsub.f32 %v8888_v32, %v11990_v18  ;;  %v12495_v24 = vld [vmem:[#allocation46_spill] sm:$0xff] }
  0x96   :  { %12493 = vst [vmem:[#allocation93_spill] sm:$0xff] %v9189_v11  ;;  %7147 = vmatprep.subr.bf16.mxu0 %v7146_v9  ;;  %v1657_v43 = vsub.f32 %v8890_v59, %v11992_v44  ;;  %v11993_v25 = vand.u32 4294901760, %v8894_v5  ;;  %v9199_v38 = vsub.f32 %v91_v26, %v9189_v11  ;;  %v11999_v13 = vand.u32 4294901760, %v8896_v7  ;;  %v92_v11 = vld [vmem:[%s11838_s0 + $0x28] sm:$0xff] }
  0x97   :  { %316 = vmatmul.mubr.f32.gmra.mrb[6].mxu0 %v315_v30  ;;  %1514 = vmatmul.mubr.f32.gmra.mrb[6].mxu1 %v315_v30  ;;  %v12002_v9 = vand.u32 4294901760, %v12495_v24  ;;  %v12004_v21 = vand.u32 4294901760, %v12496_v19  ;;  %v7148_v10 = vpack.c.bf16 %v460_v57, %v448_v48  ;;  %v1646_v18 = vand.u32 4294901760, %v1645_v16 }
  0x98   :  { %12494 = vst [vmem:[#allocation94_spill] sm:$0xff] %v9199_v38  ;;  %7339 = vmatprep.subr.bf16.mxu1 %v7338_v34  ;;  %v1658_v17 = vand.u32 4294901760, %v1657_v43  ;;  %321 = vmatprep.mubr.f32.mxu0 %v12485_v20  ;;  %v465_v44 = vsub.f32 %v8894_v5, %v11993_v25  ;;  %v9210_v26 = vand.u32 4294901760, %v9199_v38  ;;  %v477_v30 = vsub.f32 %v8896_v7, %v11999_v13  ;;  %v12498_v43 = vld [vmem:[#allocation50_spill] sm:$0xff] }
  0x99   :  { %1519 = vmatprep.mubr.f32.mxu1 %v12485_v20  ;;  %v1663_v48 = vsub.f32 %v12495_v24, %v12002_v9  ;;  %v1675_v34 = vsub.f32 %v12496_v19, %v12004_v21  ;;  %7149 = vmatpush1.bf16.msra.mxu0 %v7148_v10  ;;  %v12015_v25 = vand.u32 4294901760, %v12498_v43  ;;  %v12014_v28 = vand.u32 4294901760, %v12499_v27  ;;  %v12501_v21 = vld [vmem:[#allocation54_spill] sm:$0xff] }
  0x9a   :  { %12497 = vst [vmem:[#allocation95_spill] sm:$0xff] %v9210_v26  ;;  %v7340_v57 = vpack.c.bf16 %v1658_v17, %v1646_v18  ;;  %v466_v16 = vand.u32 4294901760, %v465_v44  ;;  %v325_v13 = vsub.f32 %v9199_v38, %v9210_v26  ;;  %v478_v39 = vand.u32 4294901760, %v477_v30  ;;  %v12500_v44 = vld [vmem:[#allocation53_spill] sm:$0xff] }
  0x9b   :  { %v1664_v9 = vand.u32 4294901760, %v1663_v48  ;;  %v1676_v24 = vand.u32 4294901760, %v1675_v34  ;;  %v471_v17 = vsub.f32 %v12498_v43, %v12015_v25  ;;  %v483_v18 = vsub.f32 %v12499_v27, %v12014_v28 }
  0x9c   :  { %7341 = vmatpush1.bf16.msra.mxu1 %v7340_v57  ;;  %v12016_v10 = vand.u32 4294901760, %v12500_v44  ;;  %v12019_v19 = vand.u32 4294901760, %v12501_v21  ;;  %v326_v7 = vand.u32 4294901760, %v325_v13  ;;  %v7150_v5 = vpack.c.bf16 %v478_v39, %v466_v16  ;;  %v12504_v13 = vld [vmem:[#allocation56_spill] sm:$0xff]  ;;  %v12506_v16 = vld [vmem:[#allocation58_spill] sm:$0xff] }
  0x9d   :  { %v7342_v59 = vpack.c.bf16 %v1676_v24, %v1664_v9  ;;  %v9236_v26 = vand.u32 4294901760, %v92_v11  ;;  %v472_v30 = vand.u32 4294901760, %v471_v17  ;;  %v484_v48 = vand.u32 4294901760, %v483_v18  ;;  %v12505_v24 = vld [vmem:[#allocation57_spill] sm:$0xff] }
  0x9e   :  { %v1669_v34 = vsub.f32 %v12500_v44, %v12016_v10  ;;  %v1681_v57 = vsub.f32 %v12501_v21, %v12019_v19  ;;  %327 = vmatmul.mubr.f32.gmra.mrb[8].mxu0 %v326_v7  ;;  %7151 = vmatprep.subr.bf16.mxu0 %v7150_v5  ;;  %v12022_v39 = vand.u32 4294901760, %v12504_v13  ;;  %v12023_v9 = vand.u32 4294901760, %v12505_v24  ;;  %v12509_v19 = vld [vmem:[#allocation63_spill] sm:$0xff]  ;;  %v12511_v44 = vld [vmem:[#allocation66_spill] sm:$0xff] }
  0x9f   :  { %12502 = vst [vmem:[#allocation50_spill] sm:$0xff] %v9236_v26  ;;  %v9245_v28 = vsub.f32 %v92_v11, %v9236_v26  ;;  %v12026_v17 = vand.u32 4294901760, %v12506_v16  ;;  %1525 = vmatmul.mubr.f32.gmra.mrb[8].mxu1 %v326_v7  ;;  %7343 = vmatprep.subr.bf16.mxu1 %v7342_v59  ;;  %v7152_v18 = vpack.c.bf16 %v484_v48, %v472_v30  ;;  %v12027_v38 = vand.u32 4294901760, %v8933_v61 }
  0xa0   :  { %v1670_v25 = vand.u32 4294901760, %v1669_v34  ;;  %v1682_v10 = vand.u32 4294901760, %v1681_v57  ;;  %332 = vmatprep.mubr.f32.mxu0 %v12485_v20  ;;  %1530 = vmatprep.mubr.f32.mxu1 %v12485_v20  ;;  %v489_v11 = vsub.f32 %v12504_v13, %v12022_v39  ;;  %v501_v7 = vsub.f32 %v12505_v24, %v12023_v9  ;;  %v12508_v34 = vld [vmem:[#allocation62_spill] sm:$0xff] }
  0xa1   :  { %12503 = vst [vmem:[#allocation96_spill] sm:$0xff] %v9245_v28  ;;  %v9254_v5 = vand.u32 4294901760, %v9245_v28  ;;  %v1687_v59 = vsub.f32 %v12506_v16, %v12026_v17  ;;  %7153 = vmatpush1.bf16.msra.mxu0 %v7152_v18  ;;  %v1699_v48 = vsub.f32 %v8933_v61, %v12027_v38  ;;  %v12037_v57 = vand.u32 4294901760, %v12508_v34  ;;  %v93_v39 = vld [vmem:[%s11838_s0 + $0x30] sm:$0xff]  ;;  %v12510_v38 = vld [vmem:[#allocation65_spill] sm:$0xff] }
  0xa2   :  { %v7344_v30 = vpack.c.bf16 %v1682_v10, %v1670_v25  ;;  %v12036_v26 = vand.u32 4294901760, %v12509_v19  ;;  %v490_v24 = vand.u32 4294901760, %v489_v11  ;;  %v502_v13 = vand.u32 4294901760, %v501_v7 }
  0xa3   :  { %12507 = vst [vmem:[#allocation97_spill] sm:$0xff] %v9254_v5  ;;  %v336_v9 = vsub.f32 %v9245_v28, %v9254_v5  ;;  %v1688_v17 = vand.u32 4294901760, %v1687_v59  ;;  %v1700_v25 = vand.u32 4294901760, %v1699_v48  ;;  %v495_v10 = vsub.f32 %v12508_v34, %v12037_v57 }
  0xa4   :  { %7345 = vmatpush1.bf16.msra.mxu1 %v7344_v30  ;;  %v507_v18 = vsub.f32 %v12509_v19, %v12036_v26  ;;  %v12038_v61 = vand.u32 4294901760, %v12510_v38  ;;  %v7154_v21 = vpack.c.bf16 %v502_v13, %v490_v24  ;;  %v12039_v27 = vand.u32 4294901760, %v12511_v44  ;;  %v12514_v13 = vld [vmem:[#allocation68_spill] sm:$0xff]  ;;  %v12515_v26 = vld [vmem:[#allocation69_spill] sm:$0xff] }
  0xa5   :  { %v337_v16 = vand.u32 4294901760, %v336_v9  ;;  %v9283_v5 = vand.u32 4294901760, %v93_v39  ;;  %v7346_v11 = vpack.c.bf16 %v1700_v25, %v1688_v17  ;;  %v496_v7 = vand.u32 4294901760, %v495_v10  ;;  %v12516_v10 = vld [vmem:[#allocation70_spill] sm:$0xff] }
  0xa6   :  { %v508_v59 = vand.u32 4294901760, %v507_v18  ;;  %v1693_v30 = vsub.f32 %v12510_v38, %v12038_v61  ;;  %7155 = vmatprep.subr.bf16.mxu0 %v7154_v21  ;;  %v1705_v48 = vsub.f32 %v12511_v44, %v12039_v27  ;;  %v12040_v24 = vand.u32 4294901760, %v12514_v13 }
  0xa7   :  { %12512 = vst [vmem:[#allocation62_spill] sm:$0xff] %v9283_v5  ;;  %338 = vmatmul.mubr.f32.gmra.mrb[10].mxu0 %v337_v16  ;;  %v9292_v9 = vsub.f32 %v93_v39, %v9283_v5  ;;  %v12045_v57 = vand.u32 4294901760, %v12515_v26  ;;  %1536 = vmatmul.mubr.f32.gmra.mrb[10].mxu1 %v337_v16  ;;  %v12046_v18 = vand.u32 4294901760, %v12516_v10  ;;  %v12047_v61 = vand.u32 4294901760, %v8961_v1 }
  0xa8   :  { %7347 = vmatprep.subr.bf16.mxu1 %v7346_v11  ;;  %v7156_v17 = vpack.c.bf16 %v508_v59, %v496_v7  ;;  %v1694_v25 = vand.u32 4294901760, %v1693_v30  ;;  %v1706_v21 = vand.u32 4294901760, %v1705_v48  ;;  %343 = vmatprep.mubr.f32.mxu0 %v12485_v20  ;;  %v513_v27 = vsub.f32 %v12514_v13, %v12040_v24 }
  0xa9   :  { %12513 = vst [vmem:[#allocation63_spill] sm:$0xff] %v9292_v9  ;;  %1541 = vmatprep.mubr.f32.mxu1 %v12485_v20  ;;  %v9301_v39 = vand.u32 4294901760, %v9292_v9  ;;  %v525_v16 = vsub.f32 %v12515_v26, %v12045_v57  ;;  %v1711_v11 = vsub.f32 %v12516_v10, %v12046_v18  ;;  %v1723_v7 = vsub.f32 %v8961_v1, %v12047_v61 }
  0xaa   :  { %7157 = vmatpush1.bf16.msra.mxu0 %v7156_v17  ;;  %v12060_v59 = vand.u32 4294901760, %v8965_v29  ;;  %v12058_v30 = vand.u32 4294901760, %v8967_v46  ;;  %v7348_v48 = vpack.c.bf16 %v1706_v21, %v1694_v25  ;;  %v514_v28 = vand.u32 4294901760, %v513_v27  ;;  %v94_v17 = vld [vmem:[%s11838_s0 + $0x38] sm:$0xff] }
  0xab   :  { %12517 = vst [vmem:[#allocation65_spill] sm:$0xff] %v9301_v39  ;;  %v347_v24 = vsub.f32 %v9292_v9, %v9301_v39  ;;  %v526_v5 = vand.u32 4294901760, %v525_v16  ;;  %v1712_v57 = vand.u32 4294901760, %v1711_v11  ;;  %v1724_v18 = vand.u32 4294901760, %v1723_v7 }
  0xac   :  { %v519_v61 = vsub.f32 %v8965_v29, %v12060_v59  ;;  %v531_v1 = vsub.f32 %v8967_v46, %v12058_v30  ;;  %7349 = vmatpush1.bf16.msra.mxu1 %v7348_v48  ;;  %v12055_v27 = vand.u32 4294901760, %v8971_v55  ;;  %v12056_v16 = vand.u32 4294901760, %v8973_v3 }
  0xad   :  { %v348_v25 = vand.u32 4294901760, %v347_v24  ;;  %v7158_v21 = vpack.c.bf16 %v526_v5, %v514_v28  ;;  %v7350_v39 = vpack.c.bf16 %v1724_v18, %v1712_v57  ;;  %v9330_v11 = vand.u32 4294901760, %v94_v17  ;;  %v12519_v5 = vld [vmem:[#allocation76_spill] sm:$0xff] }
  0xae   :  { %v520_v9 = vand.u32 4294901760, %v519_v61  ;;  %v532_v10 = vand.u32 4294901760, %v531_v1  ;;  %v1717_v7 = vsub.f32 %v8971_v55, %v12055_v27  ;;  %v1729_v24 = vsub.f32 %v8973_v3, %v12056_v16 }
  0xaf   :  { %12518 = vst [vmem:[#allocation66_spill] sm:$0xff] %v9330_v11  ;;  %349 = vmatmul.mubr.f32.gmra.mrb[12].mxu0 %v348_v25  ;;  %7159 = vmatprep.subr.bf16.mxu0 %v7158_v21  ;;  %v12057_v28 = vand.u32 4294901760, %v8982_v31  ;;  %v12059_v48 = vand.u32 4294901760, %v12519_v5  ;;  %v9341_v1 = vsub.f32 %v94_v17, %v9330_v11  ;;  %v12061_v57 = vand.u32 4294901760, %v8988_v52 }
  0xb0   :  { %1547 = vmatmul.mubr.f32.gmra.mrb[12].mxu1 %v348_v25  ;;  %7351 = vmatprep.subr.bf16.mxu1 %v7350_v39  ;;  %v7160_v61 = vpack.c.bf16 %v532_v10, %v520_v9  ;;  %v12064_v18 = vand.u32 4294901760, %v8995_v56  ;;  %v1718_v21 = vand.u32 4294901760, %v1717_v7  ;;  %v1730_v27 = vand.u32 4294901760, %v1729_v24 }
  0xb1   :  { %12520 = vst [vmem:[#allocation68_spill] sm:$0xff] %v9341_v1  ;;  %354 = vmatprep.mubr.f32.mxu0 %v12485_v20  ;;  %1552 = vmatprep.mubr.f32.mxu1 %v12485_v20  ;;  %v537_v16 = vsub.f32 %v8982_v31, %v12057_v28  ;;  %v549_v9 = vsub.f32 %v12519_v5, %v12059_v48  ;;  %v9354_v10 = vand.u32 4294901760, %v9341_v1  ;;  %v12072_v25 = vand.u32 4294901760, %v8999_v0 }
  0xb2   :  { %7161 = vmatpush1.bf16.msra.mxu0 %v7160_v61  ;;  %v1735_v39 = vsub.f32 %v8988_v52, %v12061_v57  ;;  %v1747_v17 = vsub.f32 %v8995_v56, %v12064_v18  ;;  %v7352_v7 = vpack.c.bf16 %v1730_v27, %v1718_v21  ;;  %v12071_v30 = vand.u32 4294901760, %v9001_v23 }
  0xb3   :  { %12521 = vst [vmem:[#allocation69_spill] sm:$0xff] %v9354_v10  ;;  %v538_v24 = vand.u32 4294901760, %v537_v16  ;;  %v550_v28 = vand.u32 4294901760, %v549_v9  ;;  %v358_v61 = vsub.f32 %v9341_v1, %v9354_v10  ;;  %v543_v57 = vsub.f32 %v8999_v0, %v12072_v25 }
  0xb4   :  { %v1736_v48 = vand.u32 4294901760, %v1735_v39  ;;  %v1748_v59 = vand.u32 4294901760, %v1747_v17  ;;  %7353 = vmatpush1.bf16.msra.mxu1 %v7352_v7  ;;  %v555_v18 = vsub.f32 %v9001_v23, %v12071_v30  ;;  %v12073_v27 = vand.u32 4294901760, %v9005_v33  ;;  %v12523_v39 = vld [vmem:[#allocation13_spill] sm:$0xff]  ;;  %v12524_v17 = vld [vmem:[#allocation14_spill] sm:$0xff] }
  0xb5   :  { %v7162_v11 = vpack.c.bf16 %v550_v28, %v538_v24  ;;  %v12074_v16 = vand.u32 4294901760, %v9007_v4  ;;  %v9374_v21 = vand.u32 4294901760, %v358_v61  ;;  %v544_v10 = vand.u32 4294901760, %v543_v57  ;;  %v12525_v24 = vld [vmem:[#allocation15_spill] sm:$0xff]  ;;  %v12526_v30 = vld [vmem:[#allocation17_spill] sm:$0xff] }
  0xb6   :  { %v7354_v9 = vpack.c.bf16 %v1748_v59, %v1736_v48  ;;  %v7166_v1 = vpack.c.bf16 %v12524_v17, %v12523_v39  ;;  %v556_v56 = vand.u32 4294901760, %v555_v18  ;;  %v1741_v28 = vsub.f32 %v9005_v33, %v12073_v27  ;;  %v12527_v59 = vld [vmem:[#allocation19_spill] sm:$0xff]  ;;  %v12528_v48 = vld [vmem:[#allocation20_spill] sm:$0xff] }
  0xb7   :  { %12522 = vst [vmem:[#allocation76_spill] sm:$0xff] %v9374_v21  ;;  %7163 = vmatprep.subr.bf16.mxu0 %v7162_v11  ;;  %v1753_v7 = vsub.f32 %v9007_v4, %v12074_v16  ;;  %v7358_v25 = vpack.c.bf16 %v12526_v30, %v12525_v24  ;;  %360 = vmatmul.mubr.f32.gmra.mrb[14].mxu0 %v9374_v21  ;;  %v12529_v11 = vld [vmem:[#allocation22_spill] sm:$0xff]  ;;  %v12542_v24 = vand.u32 4294901760, %v8847_v15 }
  0xb8   :  { %1558 = vmatmul.mubr.f32.gmra.mrb[14].mxu1 %v9374_v21  ;;  %v7168_v57 = vpack.c.bf16 %v12528_v48, %v12527_v59  ;;  %v7360_v18 = vpack.c.bf16 %v8807_v41, %v12529_v11  ;;  %v7170_v61 = vpack.c.bf16 %v8813_v47, %v8809_v42  ;;  %7355 = vmatprep.subr.bf16.mxu1 %v7354_v9  ;;  %v1742_v17 = vand.u32 4294901760, %v1741_v28  ;;  %v12531_v28 = vld [vmem:[#allocation42_spill] sm:$0xff] }
  0xb9   :  { %v7164_v27 = vpack.c.bf16 %v556_v56, %v544_v10  ;;  %v1754_v16 = vand.u32 4294901760, %v1753_v7  ;;  %590 = vmatprep.mubr.f32.mxu0 %v12485_v20  ;;  %v7362_v30 = vpack.c.bf16 %v8820_v51, %v8817_v49  ;;  %1788 = vmatprep.mubr.f32.mxu1 %v12485_v20  ;;  %v7172_v21 = vpack.c.bf16 %v8828_v62, %v8822_v53  ;;  %v12530_v56 = vld [vmem:[#allocation77_spill] sm:$0xff] }
  0xba   :  { %v7364_v41 = vpack.c.bf16 %v8834_v6, %v8830_v63  ;;  %v7174_v10 = vpack.c.bf16 %v8841_v12, %v8838_v8  ;;  %v7366_v9 = vpack.c.bf16 %v8847_v15, %v8845_v14  ;;  %v7372_v7 = vpack.c.bf16 %v12531_v28, %v8888_v32 }
  0xbb   :  { %7165 = vmatpush1.bf16.msra.mxu0 %v7164_v27  ;;  %v7356_v11 = vpack.c.bf16 %v1754_v16, %v1742_v17  ;;  %v7178_v27 = vpack.c.bf16 %v8870_v58, %v8866_v54  ;;  %v7370_v16 = vpack.c.bf16 %v8877_v2, %v8874_v60  ;;  %v7180_v17 = vpack.c.bf16 %v8884_v37, %v8880_v22 }
  0xbc   :  { %7167 = vmatprep.subr.bf16.mxu0 %v7166_v1  ;;  %v7176_v1 = vpack.c.bf16 %v8856_v36, %v8854_v35  ;;  %v12537_v51 = vand.u32 4294901760, %v8830_v63  ;;  %v12538_v49 = vand.u32 4294901760, %v8834_v6  ;;  %v12540_v42 = vand.u32 4294901760, %v8841_v12 }
  0xbd   :  { %7357 = vmatpush1.bf16.msra.mxu1 %v7356_v11  ;;  %v12533_v11 = vld [vmem:[#allocation45_spill] sm:$0xff]  ;;  %v12541_v59 = vand.u32 4294901760, %v8845_v14  ;;  %v12543_v63 = vand.u32 4294901760, %v8854_v35  ;;  %v12545_v6 = vand.u32 4294901760, %v8860_v45  ;;  %v12547_v12 = vand.u32 4294901760, %v8866_v54 }
  0xbe   :  { %592 = vmatmul.mubr.f32.vlgmr.msra.gmra.mrb[0].mxu0 %v12530_v56  ;;  %7359 = vmatprep.subr.bf16.mxu1 %v7358_v25  ;;  %v7368_v25 = vpack.c.bf16 %v8862_v50, %v8860_v45  ;;  %v9435_v47 = vpack.c.bf16 %v12538_v49, %v12537_v51  ;;  %v12544_v49 = vand.u32 4294901760, %v8856_v36  ;;  %v12548_v14 = vand.u32 4294901760, %v8870_v58 }
  0xbf   :  { %7169 = vmatpush1.bf16.msra.mxu0 %v7168_v57  ;;  %597 = vmatprep.mubr.f32.mxu0 %v12485_v20  ;;  %v12532_v57 = vld [vmem:[#allocation44_spill] sm:$0xff]  ;;  %v9447_v39 = vpack.c.bf16 %v12542_v24, %v12541_v59  ;;  %v12550_v35 = vand.u32 4294901760, %v8874_v60  ;;  %v12551_v36 = vand.u32 4294901760, %v8877_v2  ;;  %v12552_v45 = vand.u32 4294901760, %v8880_v22 }
  0xc0   :  { %1790 = vmatmul.mubr.f32.vlgmr.msra.gmra.mrb[0].mxu1 %v12530_v56  ;;  %7171 = vmatprep.subr.bf16.mxu0 %v7170_v61  ;;  %v12534_v61 = vld [vmem:[#allocation46_spill] sm:$0xff]  ;;  %v12535_v56 = vld [vmem:[#allocation48_spill] sm:$0xff]  ;;  %v9454_v51 = vpack.c.bf16 %v12544_v49, %v12543_v63  ;;  %v9466_v15 = vpack.c.bf16 %v12548_v14, %v12547_v12  ;;  %v12554_v54 = vand.u32 4294901760, %v8888_v32  ;;  %v12555_v58 = vand.u32 4294901760, %v12531_v28 }
  0xc1   :  { %7361 = vmatpush1.bf16.msra.mxu1 %v7360_v18  ;;  %1795 = vmatprep.mubr.f32.mxu1 %v12485_v20  ;;  %v7182_v18 = vpack.c.bf16 %v12533_v11, %v12532_v57  ;;  %v7374_v62 = vpack.c.bf16 %v12535_v56, %v12534_v61  ;;  %v9473_v24 = vpack.c.bf16 %v12551_v36, %v12550_v35  ;;  %v12556_v60 = vand.u32 4294901760, %v12532_v57 }
  0xc2   :  { %599 = vmatmul.mubr.f32.gmra.mrb[2].mxu0 %v9054_v40  ;;  %7363 = vmatprep.subr.bf16.mxu1 %v7362_v30  ;;  %v12536_v30 = vld [vmem:[#allocation51_spill] sm:$0xff]  ;;  %v12557_v2 = vand.u32 4294901760, %v12533_v11  ;;  %v12558_v22 = vand.u32 4294901760, %v12534_v61  ;;  %v12560_v32 = vand.u32 4294901760, %v12498_v43  ;;  %v12564_v11 = vld [vmem:[#allocation54_spill] sm:$0xff]  ;;  %v12566_v61 = vld [vmem:[#allocation56_spill] sm:$0xff] }
  0xc3   :  { %7173 = vmatpush1.bf16.msra.mxu0 %v7172_v21  ;;  %604 = vmatprep.mubr.f32.mxu0 %v12485_v20  ;;  %v7184_v53 = vpack.c.bf16 %v12536_v30, %v12498_v43  ;;  %v12539_v21 = vand.u32 4294901760, %v8838_v8  ;;  %v12561_v28 = vand.u32 4294901760, %v12536_v30  ;;  %v12565_v49 = vand.u32 4294901760, %v12564_v11  ;;  %v12570_v43 = vld [vmem:[#allocation58_spill] sm:$0xff]  ;;  %v12572_v30 = vld [vmem:[#allocation60_spill] sm:$0xff] }
  0xc4   :  { %1797 = vmatmul.mubr.f32.gmra.mrb[2].mxu1 %v9054_v40  ;;  %7175 = vmatprep.subr.bf16.mxu0 %v7174_v10  ;;  %v9485_v10 = vpack.c.bf16 %v12555_v58, %v12554_v54  ;;  %v12571_v35 = vand.u32 4294901760, %v12570_v43  ;;  %v12573_v36 = vand.u32 4294901760, %v12572_v30  ;;  %v12576_v58 = vand.u32 4294901760, %v12510_v38 }
  0xc5   :  { %v9441_v48 = vpack.c.bf16 %v12540_v42, %v12539_v21  ;;  %7365 = vmatpush1.bf16.msra.mxu1 %v7364_v41  ;;  %1802 = vmatprep.mubr.f32.mxu1 %v12485_v20  ;;  %v12546_v42 = vand.u32 4294901760, %v8862_v50  ;;  %v12549_v41 = vld [vmem:[#allocation87_spill] sm:$0xff]  ;;  %v12553_v50 = vand.u32 4294901760, %v8884_v37  ;;  %v12559_v37 = vand.u32 4294901760, %v12535_v56  ;;  %v12568_v56 = vld [vmem:[#allocation57_spill] sm:$0xff] }
  0xc6   :  { %606 = vmatmul.mubr.f32.gmra.mrb[4].mxu0 %v12549_v41  ;;  %7367 = vmatprep.subr.bf16.mxu1 %v7366_v9  ;;  %v9492_v9 = vpack.c.bf16 %v12557_v2, %v12556_v60  ;;  %v9504_v63 = vpack.c.bf16 %v12561_v28, %v12560_v32  ;;  %v12569_v12 = vand.u32 4294901760, %v12568_v56  ;;  %v12577_v60 = vand.u32 4294901760, %v12511_v44  ;;  %v12581_v28 = vld [vmem:[#allocation70_spill] sm:$0xff] }
  0xc7   :  { %v9460_v8 = vpack.c.bf16 %v12546_v42, %v12545_v6  ;;  %v9479_v59 = vpack.c.bf16 %v12553_v50, %v12552_v45  ;;  %7177 = vmatpush1.bf16.msra.mxu0 %v7176_v1  ;;  %611 = vmatprep.mubr.f32.mxu0 %v12485_v20  ;;  %v9498_v21 = vpack.c.bf16 %v12559_v37, %v12558_v22  ;;  %v12562_v1 = vld [vmem:[#allocation53_spill] sm:$0xff]  ;;  %v12567_v42 = vand.u32 4294901760, %v12566_v61 }
  0xc8   :  { %1804 = vmatmul.mubr.f32.gmra.mrb[4].mxu1 %v12549_v41  ;;  %7179 = vmatprep.subr.bf16.mxu0 %v7178_v27  ;;  %v12563_v57 = vand.u32 4294901760, %v12562_v1  ;;  %v9523_v45 = vpack.c.bf16 %v12573_v36, %v12571_v35  ;;  %v12574_v27 = vand.u32 4294901760, %v12508_v34  ;;  %v12575_v50 = vand.u32 4294901760, %v12509_v19 }
  0xc9   :  { %v9517_v14 = vpack.c.bf16 %v12569_v12, %v12567_v42  ;;  %7369 = vmatpush1.bf16.msra.mxu1 %v7368_v25  ;;  %1809 = vmatprep.mubr.f32.mxu1 %v12485_v20  ;;  %v9536_v2 = vpack.c.bf16 %v12577_v60, %v12576_v58  ;;  %v12578_v22 = vand.u32 4294901760, %v12514_v13  ;;  %v12579_v37 = vand.u32 4294901760, %v12515_v26  ;;  %v12580_v25 = vld [vmem:[#allocation90_spill] sm:$0xff] }
  0xca   :  { %v9511_v6 = vpack.c.bf16 %v12565_v49, %v12563_v57  ;;  %v9530_v54 = vpack.c.bf16 %v12575_v50, %v12574_v27  ;;  %613 = vmatmul.mubr.f32.gmra.mrb[6].mxu0 %v12580_v25  ;;  %7371 = vmatprep.subr.bf16.mxu1 %v7370_v16  ;;  %v12582_v57 = vand.u32 4294901760, %v12581_v28  ;;  %v12583_v49 = vld [vmem:[#allocation72_spill] sm:$0xff]  ;;  %v12585_v35 = vand.u32 4294901760, %v8965_v29 }
  0xcb   :  { %v9542_v32 = vpack.c.bf16 %v12579_v37, %v12578_v22  ;;  %v12584_v42 = vand.u32 4294901760, %v12583_v49  ;;  %v12586_v36 = vand.u32 4294901760, %v8967_v46  ;;  %v12587_v50 = vand.u32 4294901760, %v8971_v55  ;;  %7181 = vmatpush1.bf16.msra.mxu0 %v7180_v17  ;;  %618 = vmatprep.mubr.f32.mxu0 %v12485_v20 }
  0xcc   :  { %v12588_v58 = vand.u32 4294901760, %v8973_v3  ;;  %v12589_v16 = vand.u32 4294901760, %v8982_v31  ;;  %v12590_v22 = vand.u32 4294901760, %v12519_v5  ;;  %v12594_v41 = vand.u32 4294901760, %v8999_v0  ;;  %1811 = vmatmul.mubr.f32.gmra.mrb[6].mxu1 %v12580_v25  ;;  %7183 = vmatprep.subr.bf16.mxu0 %v7182_v18 }
  0xcd   :  { %v9549_v12 = vpack.c.bf16 %v12584_v42, %v12582_v57  ;;  %v9555_v27 = vpack.c.bf16 %v12586_v36, %v12585_v35  ;;  %v12591_v57 = vand.u32 4294901760, %v8988_v52  ;;  %v12592_v42 = vld [vmem:[#allocation79_spill] sm:$0xff]  ;;  %v7186_v17 = vpack.c.bf16 %v12568_v56, %v12566_v61  ;;  %7373 = vmatpush1.bf16.msra.mxu1 %v7372_v7  ;;  %1816 = vmatprep.mubr.f32.mxu1 %v12485_v20  ;;  %v12612_v56 = vld [vmem:[#allocation33_spill] sm:$0xff] }
  0xce   :  { %v9561_v60 = vpack.c.bf16 %v12588_v58, %v12587_v50  ;;  %v9568_v37 = vpack.c.bf16 %v12590_v22, %v12589_v16  ;;  %v12593_v35 = vand.u32 4294901760, %v12592_v42  ;;  %v12595_v50 = vand.u32 4294901760, %v9001_v23  ;;  %7375 = vmatprep.subr.bf16.mxu1 %v7374_v62 }
  0xcf   :  { %v12596_v16 = vand.u32 4294901760, %v9005_v33  ;;  %v12597_v22 = vand.u32 4294901760, %v9007_v4  ;;  %v7378_v18 = vpack.c.bf16 %v12572_v30, %v12570_v43  ;;  %7185 = vmatpush1.bf16.msra.mxu0 %v7184_v53  ;;  %v7188_v61 = vpack.c.bf16 %v12509_v19, %v12508_v34  ;;  %v12613_v43 = vld [vmem:[#allocation88_spill] sm:$0xff]  ;;  %v12614_v30 = vld [vmem:[#allocation35_spill] sm:$0xff] }
  0xd0   :  { %v9574_v36 = vpack.c.bf16 %v12593_v35, %v12591_v57  ;;  %v9580_v58 = vpack.c.bf16 %v12595_v50, %v12594_v41  ;;  %v7376_v57 = vpack.c.bf16 %v12564_v11, %v12562_v1  ;;  %v12598_v41 = vld [vmem:[#allocation93_spill] sm:$0xff]  ;;  %7187 = vmatprep.subr.bf16.mxu0 %v7186_v17  ;;  %v7190_v7 = vpack.c.bf16 %v12515_v26, %v12514_v13  ;;  %v12599_v1 = vld [vmem:[#allocation50_spill] sm:$0xff]  ;;  %v12609_v13 = vld [vmem:[#allocation27_spill] sm:$0xff] }
  0xd1   :  { %v9589_v40 = vpack.c.bf16 %v12597_v22, %v12596_v16  ;;  %620 = vmatmul.mubr.f32.gmra.mrb[8].mxu0 %v12598_v41  ;;  %1818 = vmatmul.mubr.f32.gmra.mrb[8].mxu1 %v12598_v41  ;;  %v7380_v62 = vpack.c.bf16 %v12511_v44, %v12510_v38  ;;  %v7382_v53 = vpack.c.bf16 %v12583_v49, %v12581_v28  ;;  %v12600_v44 = vld [vmem:[#allocation62_spill] sm:$0xff]  ;;  %v12615_v28 = vld [vmem:[#allocation36_spill] sm:$0xff]  ;;  %v12618_v35 = vld [vmem:[#allocation91_spill] sm:$0xff] }
  0xd2   :  { %625 = vmatprep.mubr.f32.mxu0 %v12485_v20  ;;  %7377 = vmatpush1.bf16.msra.mxu1 %v7376_v57  ;;  %v7192_v19 = vpack.c.bf16 %v8967_v46, %v8965_v29  ;;  %v7194_v26 = vpack.c.bf16 %v12519_v5, %v8982_v31  ;;  %v7384_v38 = vpack.c.bf16 %v8973_v3, %v8971_v55  ;;  %v12601_v3 = vld [vmem:[#allocation66_spill] sm:$0xff]  ;;  %v12602_v29 = vld [vmem:[#allocation12_spill] sm:$0xff]  ;;  %v12610_v5 = vld [vmem:[#allocation31_spill] sm:$0xff] }
  0xd3   :  { %1823 = vmatprep.mubr.f32.mxu1 %v12485_v20  ;;  %7379 = vmatprep.subr.bf16.mxu1 %v7378_v18  ;;  %v7386_v34 = vpack.c.bf16 %v12592_v42, %v8988_v52  ;;  %v7196_v46 = vpack.c.bf16 %v9001_v23, %v8999_v0  ;;  %v7388_v55 = vpack.c.bf16 %v9007_v4, %v9005_v33  ;;  %v12603_v23 = vld [vmem:[#allocation82_spill] sm:$0xff]  ;;  %v12604_v31 = vld [vmem:[#allocation16_spill] sm:$0xff]  ;;  %v12606_v33 = vld [vmem:[#allocation25_spill] sm:$0xff] }
  0xd4   :  { %7189 = vmatpush1.bf16.msra.mxu0 %v7188_v61  ;;  %v12605_v52 = vld [vmem:[#allocation18_spill] sm:$0xff]  ;;  %v12607_v0 = vld [vmem:[#allocation21_spill] sm:$0xff]  ;;  %v12619_v50 = vld [vmem:[#allocation39_spill] sm:$0xff] }
  0xd5   :  { %627 = vmatmul.mubr.f32.gmra.mrb[10].mxu0 %v12599_v1  ;;  %1825 = vmatmul.mubr.f32.gmra.mrb[10].mxu1 %v12599_v1  ;;  %v12608_v4 = vld [vmem:[#allocation85_spill] sm:$0xff]  ;;  %v12611_v11 = vld [vmem:[#allocation34_spill] sm:$0xff]  ;;  %v12620_v17 = vld [vmem:[#allocation40_spill] sm:$0xff] }
  0xd6   :  { %632 = vmatprep.mubr.f32.mxu0 %v12485_v20  ;;  %7191 = vmatprep.subr.bf16.mxu0 %v7190_v7  ;;  %v12616_v49 = vld [vmem:[#allocation38_spill] sm:$0xff]  ;;  %v12617_v42 = vld [vmem:[#allocation37_spill] sm:$0xff]  ;;  %v12621_v16 = vld [vmem:[#allocation43_spill] sm:$0xff] }
  0xd7   :  { %7381 = vmatpush1.bf16.msra.mxu1 %v7380_v62  ;;  %1830 = vmatprep.mubr.f32.mxu1 %v12485_v20  ;;  %v12622_v22 = vld [vmem:[#allocation41_spill] sm:$0xff]  ;;  %v12623_v57 = vld [vmem:[#allocation94_spill] sm:$0xff]  ;;  %v12624_v18 = vld [vmem:[#allocation47_spill] sm:$0xff] }
  0xd8   :  { %7383 = vmatprep.subr.bf16.mxu1 %v7382_v53  ;;  %7193 = vmatpush1.bf16.msra.mxu0 %v7192_v19  ;;  %v12625_v61 = vld [vmem:[#allocation49_spill] sm:$0xff]  ;;  %v12626_v7 = vld [vmem:[#allocation55_spill] sm:$0xff]  ;;  %v12627_v62 = vld [vmem:[#allocation52_spill] sm:$0xff] }
  0xd9   :  { %634 = vmatmul.mubr.f32.gmra.mrb[12].mxu0 %v12600_v44  ;;  %1832 = vmatmul.mubr.f32.gmra.mrb[12].mxu1 %v12600_v44  ;;  %v12628_v53 = vld [vmem:[#allocation96_spill] sm:$0xff]  ;;  %v12629_v19 = vld [vmem:[#allocation59_spill] sm:$0xff]  ;;  %v12641_v44 = vld [vmem:[#allocation74_spill] sm:$0xff] }
  0xda   :  { %639 = vmatprep.mubr.f32.mxu0 %v12485_v20  ;;  %7195 = vmatprep.subr.bf16.mxu0 %v7194_v26  ;;  %v12630_v26 = vld [vmem:[#allocation61_spill] sm:$0xff]  ;;  %v12648_v1 = vld [vmem:[#allocation80_spill] sm:$0xff] }
  0xdb   :  { %7385 = vmatpush1.bf16.msra.mxu1 %v7384_v38  ;;  %1837 = vmatprep.mubr.f32.mxu1 %v12485_v20  ;;  %v12631_v38 = vld [vmem:[#allocation67_spill] sm:$0xff] }
  0xdc   :  { %7387 = vmatprep.subr.bf16.mxu1 %v7386_v34  ;;  %7197 = vmatpush1.bf16.msra.mxu0 %v7196_v46  ;;  %v12632_v34 = vld [vmem:[#allocation64_spill] sm:$0xff]  ;;  %v12633_v46 = vld [vmem:[#allocation63_spill] sm:$0xff] }
  0xdd   :  { %641 = vmatmul.mubr.f32.gmra.mrb[14].mxu0 %v12601_v3  ;;  %1839 = vmatmul.mubr.f32.gmra.mrb[14].mxu1 %v12601_v3 }
  0xde   :  { %775 = vmatprep.mubr.f32.mxu0 %v12485_v20  ;;  %7199 = vmatprep.subr.bf16.mxu0 %v12602_v29 }
  0xdf   :  { %7389 = vmatpush1.bf16.msra.mxu1 %v7388_v55  ;;  %1973 = vmatprep.mubr.f32.mxu1 %v12485_v20  ;;  %v12634_v55 = vld [vmem:[#allocation71_spill] sm:$0xff] }
  0xe0   :  { %7391 = vmatprep.subr.bf16.mxu1 %v12604_v31 }
  0xe1   :  { %778 = vmatmul.mubr.f32.vlgmr.msra.gmra.mrb[0].mxu0 %v12603_v23 }
  0xe2   :  { %7201 = vmatpush1.bf16.msra.mxu0 %v12605_v52  ;;  %783 = vmatprep.mubr.f32.mxu0 %v12485_v20 }
  0xe3   :  { %1976 = vmatmul.mubr.f32.vlgmr.msra.gmra.mrb[0].mxu1 %v12603_v23  ;;  %7203 = vmatprep.subr.bf16.mxu0 %v12606_v33  ;;  %v12635_v23 = vld [vmem:[#allocation73_spill] sm:$0xff] }
  0xe4   :  { %7393 = vmatpush1.bf16.msra.mxu1 %v12607_v0  ;;  %1981 = vmatprep.mubr.f32.mxu1 %v12485_v20 }
  0xe5   :  { %786 = vmatmul.mubr.f32.gmra.mrb[2].mxu0 %v12608_v4  ;;  %7395 = vmatprep.subr.bf16.mxu1 %v12609_v13 }
  0xe6   :  { %7205 = vmatpush1.bf16.msra.mxu0 %v12610_v5  ;;  %791 = vmatprep.mubr.f32.mxu0 %v12485_v20 }
  0xe7   :  { %1984 = vmatmul.mubr.f32.gmra.mrb[2].mxu1 %v12608_v4  ;;  %7207 = vmatprep.subr.bf16.mxu0 %v12611_v11  ;;  %v12636_v4 = vld [vmem:[#allocation75_spill] sm:$0xff] }
  0xe8   :  { %7397 = vmatpush1.bf16.msra.mxu1 %v12612_v56  ;;  %1989 = vmatprep.mubr.f32.mxu1 %v12485_v20 }
  0xe9   :  { %794 = vmatmul.mubr.f32.gmra.mrb[4].mxu0 %v12613_v43  ;;  %7399 = vmatprep.subr.bf16.mxu1 %v12614_v30 }
  0xea   :  { %7209 = vmatpush1.bf16.msra.mxu0 %v12615_v28  ;;  %799 = vmatprep.mubr.f32.mxu0 %v12485_v20 }
  0xeb   :  { %1992 = vmatmul.mubr.f32.gmra.mrb[4].mxu1 %v12613_v43  ;;  %7211 = vmatprep.subr.bf16.mxu0 %v12616_v49  ;;  %v12637_v43 = vld [vmem:[#allocation13_spill] sm:$0xff] }
  0xec   :  { %7401 = vmatpush1.bf16.msra.mxu1 %v12617_v42  ;;  %1997 = vmatprep.mubr.f32.mxu1 %v12485_v20 }
  0xed   :  { %802 = vmatmul.mubr.f32.gmra.mrb[6].mxu0 %v12618_v35  ;;  %7403 = vmatprep.subr.bf16.mxu1 %v12619_v50 }
  0xee   :  { %7213 = vmatpush1.bf16.msra.mxu0 %v12620_v17  ;;  %807 = vmatprep.mubr.f32.mxu0 %v12485_v20 }
  0xef   :  { %2000 = vmatmul.mubr.f32.gmra.mrb[6].mxu1 %v12618_v35  ;;  %7215 = vmatprep.subr.bf16.mxu0 %v12621_v16  ;;  %v12638_v35 = vand.u32 4294901760, %v12637_v43  ;;  %v12649_v43 = vld [vmem:[#allocation19_spill] sm:$0xff] }
  0xf0   :  { %7405 = vmatpush1.bf16.msra.mxu1 %v12622_v22  ;;  %2005 = vmatprep.mubr.f32.mxu1 %v12485_v20 }
  0xf1   :  { %810 = vmatmul.mubr.f32.gmra.mrb[8].mxu0 %v12623_v57  ;;  %7407 = vmatprep.subr.bf16.mxu1 %v12624_v18  ;;  %v12662_v18 = vld [vmem:[#allocation83_spill] sm:$0xff] }
  0xf2   :  { %7217 = vmatpush1.bf16.msra.mxu0 %v12625_v61  ;;  %815 = vmatprep.mubr.f32.mxu0 %v12485_v20  ;;  %v12657_v61 = vld [vmem:[#allocation81_spill] sm:$0xff] }
  0xf3   :  { %2008 = vmatmul.mubr.f32.gmra.mrb[8].mxu1 %v12623_v57  ;;  %7219 = vmatprep.subr.bf16.mxu0 %v12626_v7  ;;  %v12639_v57 = vld [vmem:[#allocation14_spill] sm:$0xff] }
  0xf4   :  { %7409 = vmatpush1.bf16.msra.mxu1 %v12627_v62  ;;  %2013 = vmatprep.mubr.f32.mxu1 %v12485_v20 }
  0xf5   :  { %818 = vmatmul.mubr.f32.gmra.mrb[10].mxu0 %v12628_v53  ;;  %7411 = vmatprep.subr.bf16.mxu1 %v12629_v19 }
  0xf6   :  { %7221 = vmatpush1.bf16.msra.mxu0 %v12630_v26  ;;  %823 = vmatprep.mubr.f32.mxu0 %v12485_v20  ;;  %v12646_v26 = vld [vmem:[#allocation17_spill] sm:$0xff] }
  0xf7   :  { %2016 = vmatmul.mubr.f32.gmra.mrb[10].mxu1 %v12628_v53  ;;  %7223 = vmatprep.subr.bf16.mxu0 %v12631_v38  ;;  %v12640_v53 = vand.u32 4294901760, %v12639_v57  ;;  %v12647_v19 = vand.u32 4294901760, %v12646_v26  ;;  %v12650_v57 = vand.u32 4294901760, %v12649_v43 }
  0xf8   :  { %7413 = vmatpush1.bf16.msra.mxu1 %v12632_v34  ;;  %2021 = vmatprep.mubr.f32.mxu1 %v12485_v20  ;;  %v12642_v34 = vld [vmem:[#allocation68_spill] sm:$0xff] }
  0xf9   :  { %826 = vmatmul.mubr.f32.gmra.mrb[12].mxu0 %v12633_v46  ;;  %7415 = vmatprep.subr.bf16.mxu1 %v12634_v55  ;;  %v7230_v3 = vpack.c.bf16 %v12640_v53, %v12638_v35  ;;  %v12643_v55 = vld [vmem:[#allocation78_spill] sm:$0xff]  ;;  %v12651_v35 = vld [vmem:[#allocation20_spill] sm:$0xff] }
  0xfa   :  { %7225 = vmatpush1.bf16.msra.mxu0 %v12635_v23  ;;  %831 = vmatprep.mubr.f32.mxu0 %v12485_v20  ;;  %v12644_v23 = vld [vmem:[#allocation15_spill] sm:$0xff]  ;;  %v12652_v53 = vand.u32 4294901760, %v12651_v35 }
  0xfb   :  { %2024 = vmatmul.mubr.f32.gmra.mrb[12].mxu1 %v12633_v46  ;;  %7227 = vmatprep.subr.bf16.mxu0 %v12636_v4  ;;  %v12645_v38 = vand.u32 4294901760, %v12644_v23  ;;  %v12653_v4 = vld [vmem:[#allocation24_spill] sm:$0xff] }
  0xfc   :  { %7417 = vmatpush1.bf16.msra.mxu1 %v12641_v44  ;;  %2029 = vmatprep.mubr.f32.mxu1 %v12485_v20  ;;  %v7232_v44 = vpack.c.bf16 %v12652_v53, %v12650_v57  ;;  %v12654_v62 = vand.u32 4294901760, %v12653_v4  ;;  %v12663_v57 = vld [vmem:[#allocation28_spill] sm:$0xff] }
  0xfd   :  { %834 = vmatmul.mubr.f32.gmra.mrb[14].mxu0 %v12642_v34  ;;  %7419 = vmatprep.subr.bf16.mxu1 %v12643_v55  ;;  %v7422_v46 = vpack.c.bf16 %v12647_v19, %v12645_v38  ;;  %v12655_v55 = vld [vmem:[#allocation26_spill] sm:$0xff]  ;;  %v12660_v38 = vld [vmem:[#allocation23_spill] sm:$0xff]  ;;  %v12664_v35 = vand.u32 4294901760, %v12663_v57 }
  0xfe   :  { %7229 = vmatpush1.bf16.msra.mxu0 %v12648_v1  ;;  %936 = vmatprep.mubr.f32.mxu0 %v12485_v20  ;;  %v12656_v7 = vand.u32 4294901760, %v12655_v55  ;;  %v12658_v19 = vld [vmem:[#allocation22_spill] sm:$0xff]  ;;  %v12661_v1 = vand.u32 4294901760, %v12660_v38  ;;  %v12669_v55 = vld [vmem:[#allocation32_spill] sm:$0xff] }
  0xff   :  { %2032 = vmatmul.mubr.f32.gmra.mrb[14].mxu1 %v12642_v34  ;;  %7231 = vmatprep.subr.bf16.mxu0 %v7230_v3  ;;  %v12659_v26 = vand.u32 4294901760, %v12658_v19  ;;  %v12665_v3 = vld [vmem:[#allocation29_spill] sm:$0xff]  ;;  %v12670_v34 = vand.u32 4294901760, %v12669_v55 }
 0x100   :  { %v7234_v23 = vpack.c.bf16 %v12656_v7, %v12654_v62  ;;  %7421 = vmatpush1.bf16.msra.mxu1 %v12657_v61  ;;  %2134 = vmatprep.mubr.f32.mxu1 %v12485_v20  ;;  %v12666_v53 = vand.u32 4294901760, %v12665_v3  ;;  %v12667_v7 = vld [vmem:[#allocation30_spill] sm:$0xff] }
 0x101   :  { %v7424_v43 = vpack.c.bf16 %v12661_v1, %v12659_v26  ;;  %940 = vmatmul.mubr.f32.vlgmr.msra.gmra.mrb[0].mxu0 %v12662_v18  ;;  %7423 = vmatprep.subr.bf16.mxu1 %v7422_v46  ;;  %v12668_v62 = vand.u32 4294901760, %v12667_v7  ;;  %v12671_v1 = vld [vmem:[#allocation86_spill] sm:$0xff] }
 0x102   :  { %v7426_v4 = vpack.c.bf16 %v12666_v53, %v12664_v35  ;;  %7233 = vmatpush1.bf16.msra.mxu0 %v7232_v44  ;;  %945 = vmatprep.mubr.f32.mxu0 %v12485_v20  ;;  %v12672_v44 = vld [vmem:[#allocation89_spill] sm:$0xff] }
 0x103   :  { %v7236_v61 = vpack.c.bf16 %v12670_v34, %v12668_v62  ;;  %2138 = vmatmul.mubr.f32.vlgmr.msra.gmra.mrb[0].mxu1 %v12662_v18  ;;  %7235 = vmatprep.subr.bf16.mxu0 %v7234_v23 }
 0x104   :  { %7425 = vmatpush1.bf16.msra.mxu1 %v7424_v43  ;;  %2143 = vmatprep.mubr.f32.mxu1 %v12485_v20 }
 0x105   :  { %949 = vmatmul.mubr.f32.gmra.mrb[2].mxu0 %v12671_v1  ;;  %7427 = vmatprep.subr.bf16.mxu1 %v7426_v4 }
 0x106   :  { %7237 = vmatpush1.bf16.msra.mxu0 %v7236_v61  ;;  %954 = vmatprep.mubr.f32.mxu0 %v12485_v20 }
 0x107   :  { %2147 = vmatmul.mubr.f32.gmra.mrb[2].mxu1 %v12671_v1  ;;  %7239 = vmatprep.subr.bf16.mxu0 %v9441_v48  ;;  %v12673_v48 = vld [vmem:[#allocation92_spill] sm:$0xff] }
 0x108   :  { %7429 = vmatpush1.bf16.msra.mxu1 %v9435_v47  ;;  %2152 = vmatprep.mubr.f32.mxu1 %v12485_v20  ;;  %v12674_v47 = vld [vmem:[#allocation95_spill] sm:$0xff] }
 0x109   :  { %958 = vmatmul.mubr.f32.gmra.mrb[4].mxu0 %v12672_v44  ;;  %7431 = vmatprep.subr.bf16.mxu1 %v9447_v39  ;;  %v12675_v39 = vld [vmem:[#allocation97_spill] sm:$0xff] }
 0x10a   :  { %7241 = vmatpush1.bf16.msra.mxu0 %v9454_v51  ;;  %963 = vmatprep.mubr.f32.mxu0 %v12485_v20  ;;  %v12676_v51 = vld [vmem:[#allocation65_spill] sm:$0xff] }
 0x10b   :  { %2156 = vmatmul.mubr.f32.gmra.mrb[4].mxu1 %v12672_v44  ;;  %7243 = vmatprep.subr.bf16.mxu0 %v9466_v15  ;;  %v12678_v15 = vld [vmem:[#allocation77_spill] sm:$0xff] }
 0x10c   :  { %7433 = vmatpush1.bf16.msra.mxu1 %v9460_v8  ;;  %2161 = vmatprep.mubr.f32.mxu1 %v12485_v20  ;;  %v12677_v8 = vld [vmem:[#allocation69_spill] sm:$0xff] }
 0x10d   :  { %967 = vmatmul.mubr.f32.gmra.mrb[6].mxu0 %v12673_v48  ;;  %7435 = vmatprep.subr.bf16.mxu1 %v9473_v24  ;;  %v12679_v24 = vld [vmem:[#allocation84_spill] sm:$0xff] }
 0x10e   :  { %7245 = vmatpush1.bf16.msra.mxu0 %v9479_v59  ;;  %972 = vmatprep.mubr.f32.mxu0 %v12485_v20  ;;  %v12681_v59 = vld [vmem:[#allocation47_spill] sm:$0xff] }
 0x10f   :  { %2165 = vmatmul.mubr.f32.gmra.mrb[6].mxu1 %v12673_v48  ;;  %7247 = vmatprep.subr.bf16.mxu0 %v9492_v9  ;;  %v12683_v9 = vld [vmem:[#allocation55_spill] sm:$0xff] }
 0x110   :  { %7437 = vmatpush1.bf16.msra.mxu1 %v9485_v10  ;;  %2170 = vmatprep.mubr.f32.mxu1 %v12485_v20  ;;  %v12682_v10 = vld [vmem:[#allocation49_spill] sm:$0xff] }
 0x111   :  { %976 = vmatmul.mubr.f32.gmra.mrb[8].mxu0 %v12674_v47  ;;  %7439 = vmatprep.subr.bf16.mxu1 %v9498_v21  ;;  %v12684_v21 = vld [vmem:[#allocation52_spill] sm:$0xff] }
 0x112   :  { %7249 = vmatpush1.bf16.msra.mxu0 %v9504_v63  ;;  %981 = vmatprep.mubr.f32.mxu0 %v12485_v20  ;;  %v12685_v63 = vld [vmem:[#allocation50_spill] sm:$0xff] }
 0x113   :  { %2174 = vmatmul.mubr.f32.gmra.mrb[8].mxu1 %v12674_v47  ;;  %7251 = vmatprep.subr.bf16.mxu0 %v9517_v14  ;;  %v12687_v14 = vld [vmem:[#allocation61_spill] sm:$0xff] }
 0x114   :  { %7441 = vmatpush1.bf16.msra.mxu1 %v9511_v6  ;;  %2179 = vmatprep.mubr.f32.mxu1 %v12485_v20  ;;  %v12686_v6 = vld [vmem:[#allocation59_spill] sm:$0xff] }
 0x115   :  { %985 = vmatmul.mubr.f32.gmra.mrb[10].mxu0 %v12675_v39  ;;  %7443 = vmatprep.subr.bf16.mxu1 %v9523_v45  ;;  %v12688_v45 = vld [vmem:[#allocation67_spill] sm:$0xff] }
 0x116   :  { %7253 = vmatpush1.bf16.msra.mxu0 %v9530_v54  ;;  %990 = vmatprep.mubr.f32.mxu0 %v12485_v20  ;;  %v12689_v54 = vld [vmem:[#allocation64_spill] sm:$0xff] }
 0x117   :  { %2183 = vmatmul.mubr.f32.gmra.mrb[10].mxu1 %v12675_v39  ;;  %7255 = vmatprep.subr.bf16.mxu0 %v9542_v32  ;;  %v12691_v32 = vld [vmem:[#allocation71_spill] sm:$0xff] }
 0x118   :  { %7445 = vmatpush1.bf16.msra.mxu1 %v9536_v2  ;;  %2188 = vmatprep.mubr.f32.mxu1 %v12485_v20  ;;  %v12690_v2 = vld [vmem:[#allocation62_spill] sm:$0xff] }
 0x119   :  { %994 = vmatmul.mubr.f32.gmra.mrb[12].mxu0 %v12676_v51  ;;  %7447 = vmatprep.subr.bf16.mxu1 %v9549_v12  ;;  %v12692_v12 = vld [vmem:[#allocation73_spill] sm:$0xff] }
 0x11a   :  { %7257 = vmatpush1.bf16.msra.mxu0 %v9555_v27  ;;  %999 = vmatprep.mubr.f32.mxu0 %v12485_v20  ;;  %v12693_v27 = vld [vmem:[#allocation75_spill] sm:$0xff] }
 0x11b   :  { %2192 = vmatmul.mubr.f32.gmra.mrb[12].mxu1 %v12676_v51  ;;  %7259 = vmatprep.subr.bf16.mxu0 %v9568_v37  ;;  %v12695_v37 = vld [vmem:[#allocation66_spill] sm:$0xff] }
 0x11c   :  { %7449 = vmatpush1.bf16.msra.mxu1 %v9561_v60  ;;  %2197 = vmatprep.mubr.f32.mxu1 %v12485_v20  ;;  %v12694_v60 = vld [vmem:[#allocation74_spill] sm:$0xff] }
 0x11d   :  { %1003 = vmatmul.mubr.f32.gmra.mrb[14].mxu0 %v12677_v8  ;;  %7451 = vmatprep.subr.bf16.mxu1 %v9574_v36  ;;  %v12696_v36 = vld [vmem:[#allocation78_spill] sm:$0xff] }
 0x11e   :  { %7261 = vmatpush1.bf16.msra.mxu0 %v9580_v58  ;;  %1169 = vmatprep.mubr.f32.mxu0 %v12485_v20  ;;  %v12697_v58 = vld [vmem:[#allocation80_spill] sm:$0xff] }
 0x11f   :  { %2201 = vmatmul.mubr.f32.gmra.mrb[14].mxu1 %v12677_v8  ;;  %7263 = vmatprep.subr.bf16.mxu0 %v12602_v29  ;;  %v12698_v29 = vld [vmem:[#allocation81_spill] sm:$0xff]  ;;  %v3327_v8 = vld [vmem:[#allocation4 + $0x38] sm:$0xff] }
 0x120   :  { %7453 = vmatpush1.bf16.msra.mxu1 %v9589_v40  ;;  %2367 = vmatprep.mubr.f32.mxu1 %v12485_v20  ;;  %v12680_v40 = vld [vmem:[#allocation87_spill] sm:$0xff] }
 0x121   :  { %1171 = vmatmul.mubr.f32.vlgmr.msra.gmra.mrb[0].mxu0 %v12678_v15  ;;  %7455 = vmatprep.subr.bf16.mxu1 %v12604_v31  ;;  %v161_v31 = vlaneseq }
 0x122   :  { %7265 = vmatpush1.bf16.msra.mxu0 %v12605_v52  ;;  %1176 = vmatprep.mubr.f32.mxu0 %v12485_v20 }
 0x123   :  { %2369 = vmatmul.mubr.f32.vlgmr.msra.gmra.mrb[0].mxu1 %v12678_v15  ;;  %7267 = vmatprep.subr.bf16.mxu0 %v12606_v33  ;;  %v162_v52 = vshrl.u32 %v161_v31, 7 }
 0x124   :  { %7457 = vmatpush1.bf16.msra.mxu1 %v12607_v0  ;;  %2374 = vmatprep.mubr.f32.mxu1 %v12485_v20 }
 0x125   :  { %1178 = vmatmul.mubr.f32.gmra.mrb[2].mxu0 %v12679_v24  ;;  %7459 = vmatprep.subr.bf16.mxu1 %v12609_v13  ;;  %v9879_v33 = vsub.s32 0, %v162_v52  ;;  %v167_v0 = vsub.s32 1, %v162_v52  ;;  %v2577_v13 = vld [vmem:[%s11840_s2] sm:$0xff] }
 0x126   :  { %7269 = vmatpush1.bf16.msra.mxu0 %v12610_v5  ;;  %1183 = vmatprep.mubr.f32.mxu0 %v12485_v20  ;;  %v9887_v5 = vld [vmem:[%s11840_s2 + $0x10] sm:$0xff] }
 0x127   :  { %2376 = vmatmul.mubr.f32.gmra.mrb[2].mxu1 %v12679_v24  ;;  %7271 = vmatprep.subr.bf16.mxu0 %v12611_v11  ;;  %12699 = vst [vmem:[#allocation42_spill] sm:$0xff] %v9879_v33  ;;  %v9889_v11 = vsub.s32 2, %v162_v52  ;;  %v9931_v23 = vrot.slane %v9887_v5, %v167_v0 }
 0x128   :  { %7461 = vmatpush1.bf16.msra.mxu1 %v12612_v56  ;;  %2381 = vmatprep.mubr.f32.mxu1 %v12485_v20  ;;  %v2578_v56 = vld [vmem:[%s11840_s2 + $0x8] sm:$0xff] }
 0x129   :  { %1185 = vmatmul.mubr.f32.gmra.mrb[4].mxu0 %v12680_v40  ;;  %7463 = vmatprep.subr.bf16.mxu1 %v12614_v30  ;;  %12700 = vst [vmem:[#allocation44_spill] sm:$0xff] %v9889_v11  ;;  %v159_v30 = vld [vmem:[%s11841_s3] sm:$0xf]  ;;  %v9919_v18 = vrot.slane %v2578_v56, %v9879_v33  ;;  %12708 = vst [vmem:[#allocation57_spill] sm:$0xff] %v9931_v23  ;;  %v9936_v38 = vrot.slane %v2578_v56, %v167_v0  ;;  %v2671_v47 = vmul.f32 0.0, %v9931_v23 }
 0x12a   :  { %7273 = vmatpush1.bf16.msra.mxu0 %v12615_v28  ;;  %1190 = vmatprep.mubr.f32.mxu0 %v12485_v20  ;;  %v9898_v28 = vrot.slane %v2577_v13, %v9879_v33  ;;  %v9922_v61 = vrot.slane %v159_v30, %v9879_v33  ;;  %v9928_v46 = vrot.slane %v159_v30, %v9889_v11 }
 0x12b   :  { %2383 = vmatmul.mubr.f32.gmra.mrb[4].mxu1 %v12680_v40  ;;  %7275 = vmatprep.subr.bf16.mxu0 %v12616_v49  ;;  %v9900_v49 = vsub.s32 3, %v162_v52  ;;  %12706 = vst [vmem:[#allocation54_spill] sm:$0xff] %v9919_v18  ;;  %v9934_v26 = vrot.slane %v159_v30, %v167_v0  ;;  %12709 = vst [vmem:[#allocation58_spill] sm:$0xff] %v9936_v38  ;;  %v9952_v62 = vrot.slane %v2578_v56, %v9889_v11 }
 0x12c   :  { %7465 = vmatpush1.bf16.msra.mxu1 %v12617_v42  ;;  %2388 = vmatprep.mubr.f32.mxu1 %v12485_v20  ;;  %12701 = vst [vmem:[#allocation45_spill] sm:$0xff] %v9898_v28  ;;  %v9902_v42 = vrot.slane %v2577_v13, %v167_v0  ;;  %v2661_v19 = vmul.f32 0.0, %v9898_v28  ;;  %v2662_v55 = vmul.f32 0.0, %v9919_v18  ;;  %v9961_v48 = vrot.slane %v9887_v5, %v9889_v11 }
 0x12d   :  { %1192 = vmatmul.mubr.f32.gmra.mrb[6].mxu0 %v12580_v25  ;;  %7467 = vmatprep.subr.bf16.mxu1 %v12619_v50  ;;  %12702 = vst [vmem:[#allocation46_spill] sm:$0xff] %v9900_v49  ;;  %v9904_v50 = vsub.s32 4, %v162_v52  ;;  %v9925_v34 = vrot.slane %v2577_v13, %v9900_v49  ;;  %12713 = vst [vmem:[#allocation72_spill] sm:$0xff] %v9952_v62  ;;  %v9956_v1 = vrot.slane %v159_v30, %v9900_v49 }
 0x12e   :  { %7277 = vmatpush1.bf16.msra.mxu0 %v12620_v17  ;;  %1197 = vmatprep.mubr.f32.mxu0 %v12485_v20  ;;  %12703 = vst [vmem:[#allocation48_spill] sm:$0xff] %v9902_v42  ;;  %v9908_v17 = vrot.slane %v9887_v5, %v9879_v33  ;;  %v2669_v35 = vmul.f32 0.0, %v9902_v42  ;;  %12714 = vst [vmem:[#allocation79_spill] sm:$0xff] %v9961_v48  ;;  %v9965_v51 = vrot.slane %v2578_v56, %v9900_v49 }
 0x12f   :  { %2390 = vmatmul.mubr.f32.gmra.mrb[6].mxu1 %v12580_v25  ;;  %7279 = vmatprep.subr.bf16.mxu0 %v12621_v16  ;;  %v9913_v16 = vld [vmem:[%s11840_s2 + $0x18] sm:$0xff]  ;;  %12707 = vst [vmem:[#allocation56_spill] sm:$0xff] %v9925_v34  ;;  %v9943_v57 = vrot.slane %v2577_v13, %v9904_v50 }
 0x130   :  { %7469 = vmatpush1.bf16.msra.mxu1 %v12622_v22  ;;  %2395 = vmatprep.mubr.f32.mxu1 %v12485_v20  ;;  %12704 = vst [vmem:[#allocation51_spill] sm:$0xff] %v9908_v17  ;;  %v9916_v22 = vrot.slane %v2577_v13, %v9889_v11  ;;  %v9940_v43 = vrot.slane %v9913_v16, %v9879_v33  ;;  %v2663_v3 = vmul.f32 0.0, %v9908_v17  ;;  %12715 = vst [vmem:[#allocation93_spill] sm:$0xff] %v9965_v51 }
 0x131   :  { %1199 = vmatmul.mubr.f32.gmra.mrb[8].mxu0 %v12598_v41  ;;  %7471 = vmatprep.subr.bf16.mxu1 %v12681_v59  ;;  %12711 = vst [vmem:[#allocation90_spill] sm:$0xff] %v9943_v57  ;;  %v9948_v53 = vrot.slane %v9913_v16, %v167_v0  ;;  %v2670_v59 = vmul.f32 0.0, %v9936_v38 }
 0x132   :  { %7281 = vmatpush1.bf16.msra.mxu0 %v12682_v10  ;;  %1204 = vmatprep.mubr.f32.mxu0 %v12485_v20  ;;  %12705 = vst [vmem:[#allocation53_spill] sm:$0xff] %v9916_v22  ;;  %12710 = vst [vmem:[#allocation60_spill] sm:$0xff] %v9940_v43  ;;  %v2677_v7 = vmul.f32 0.0, %v9916_v22  ;;  %v2664_v10 = vmul.f32 0.0, %v9940_v43 }
 0x133   :  { %2397 = vmatmul.mubr.f32.gmra.mrb[8].mxu1 %v12598_v41  ;;  %7283 = vmatprep.subr.bf16.mxu0 %v12683_v9  ;;  %12712 = vst [vmem:[#allocation70_spill] sm:$0xff] %v9948_v53 }
 0x134   :  { %7473 = vmatpush1.bf16.msra.mxu1 %v12684_v21  ;;  %2402 = vmatprep.mubr.f32.mxu1 %v12485_v20 }
 0x135   :  { %1206 = vmatmul.mubr.f32.gmra.mrb[10].mxu0 %v12685_v63  ;;  %7475 = vmatprep.subr.bf16.mxu1 %v12686_v6  ;;  %v9974_v6 = vrot.slane %v9913_v16, %v9889_v11 }
 0x136   :  { %7285 = vmatpush1.bf16.msra.mxu0 %v12687_v14  ;;  %1211 = vmatprep.mubr.f32.mxu0 %v12485_v20  ;;  %v2672_v14 = vmul.f32 0.0, %v9948_v53 }
 0x137   :  { %2404 = vmatmul.mubr.f32.gmra.mrb[10].mxu1 %v12685_v63  ;;  %7287 = vmatprep.subr.bf16.mxu0 %v12688_v45  ;;  %12716 = vst [vmem:[#allocation12_spill] sm:$0xff] %v9974_v6  ;;  %v9978_v45 = vrot.slane %v2578_v56, %v9904_v50 }
 0x138   :  { %7477 = vmatpush1.bf16.msra.mxu1 %v12689_v54  ;;  %2409 = vmatprep.mubr.f32.mxu1 %v12485_v20 }
 0x139   :  { %1213 = vmatmul.mubr.f32.gmra.mrb[12].mxu0 %v12690_v2  ;;  %7479 = vmatprep.subr.bf16.mxu1 %v12691_v32  ;;  %12717 = vst [vmem:[#allocation82_spill] sm:$0xff] %v9978_v45 }
 0x13a   :  { %7289 = vmatpush1.bf16.msra.mxu0 %v12692_v12  ;;  %1218 = vmatprep.mubr.f32.mxu0 %v12485_v20 }
 0x13b   :  { %2411 = vmatmul.mubr.f32.gmra.mrb[12].mxu1 %v12690_v2  ;;  %7291 = vmatprep.subr.bf16.mxu0 %v12693_v27 }
 0x13c   :  { %7481 = vmatpush1.bf16.msra.mxu1 %v12694_v60  ;;  %2416 = vmatprep.mubr.f32.mxu1 %v12485_v20  ;;  %v2693_v60 = vmul.f32 0.0, %v9943_v57 }
 0x13d   :  { %1220 = vmatmul.mubr.f32.gmra.mrb[14].mxu0 %v12695_v37  ;;  %7483 = vmatprep.subr.bf16.mxu1 %v12696_v36  ;;  %v2686_v36 = vmul.f32 0.0, %v9965_v51 }
 0x13e   :  { %7293 = vmatpush1.bf16.msra.mxu0 %v12697_v58  ;;  %1322 = vmatprep.mubr.f32.mxu0 %v12485_v20 }
 0x13f   :  { %2418 = vmatmul.mubr.f32.gmra.mrb[14].mxu1 %v12695_v37 }
 0x140   :  { %7485 = vmatpush1.bf16.msra.mxu1 %v12698_v29  ;;  %2520 = vmatprep.mubr.f32.mxu1 %v12485_v20 }
 0x141   :  { %1324 = vmatmul.mubr.f32.vlgmr.msra.gmra.mrb[0].mxu0 %v12678_v15 }
 0x142   :  { %1329 = vmatprep.mubr.f32.mxu0 %v12485_v20 }
 0x143   :  { %2522 = vmatmul.mubr.f32.vlgmr.msra.gmra.mrb[0].mxu1 %v12678_v15  ;;  %v2685_v15 = vmul.f32 0.0, %v9925_v34 }
 0x144   :  { %2527 = vmatprep.mubr.f32.mxu1 %v12485_v20 }
 0x145   :  { %1331 = vmatmul.mubr.f32.gmra.mrb[2].mxu0 %v12679_v24 }
 0x146   :  { %1336 = vmatprep.mubr.f32.mxu0 %v12485_v20 }
 0x147   :  { %2529 = vmatmul.mubr.f32.gmra.mrb[2].mxu1 %v12679_v24 }
 0x148   :  { %2534 = vmatprep.mubr.f32.mxu1 %v12485_v20 }
 0x149   :  { %1338 = vmatmul.mubr.f32.gmra.mrb[4].mxu0 %v12680_v40 }
 0x14a   :  { %1343 = vmatprep.mubr.f32.mxu0 %v12485_v20 }
 0x14b   :  { %2536 = vmatmul.mubr.f32.gmra.mrb[4].mxu1 %v12680_v40 }
 0x14c   :  { %2541 = vmatprep.mubr.f32.mxu1 %v12485_v20 }
 0x14d   :  { %1345 = vmatmul.mubr.f32.gmra.mrb[6].mxu0 %v12580_v25 }
 0x14e   :  { %1350 = vmatprep.mubr.f32.mxu0 %v12485_v20 }
 0x14f   :  { %2543 = vmatmul.mubr.f32.gmra.mrb[6].mxu1 %v12580_v25  ;;  %v12092_v25 = vmov 2  }
 0x150   :  { %2548 = vmatprep.mubr.f32.mxu1 %v12485_v20  ;;  %8391 = vset.pattern.permute.xlu1 %v12092_v25 }
 0x151   :  { %1352 = vmatmul.mubr.f32.gmra.mrb[8].mxu0 %v12598_v41 }
 0x152   :  { %1357 = vmatprep.mubr.f32.mxu0 %v12485_v20 }
 0x153   :  { %2550 = vmatmul.mubr.f32.gmra.mrb[8].mxu1 %v12598_v41  ;;  %v12094_v41 = vmov 0  }
 0x154   :  { %2555 = vmatprep.mubr.f32.mxu1 %v12485_v20  ;;  %8389 = vset.pattern.permute.xlu0 %v12094_v41 }
 0x155   :  { %1359 = vmatmul.mubr.f32.gmra.mrb[10].mxu0 %v12685_v63 }
 0x156   :  { %1364 = vmatprep.mubr.f32.mxu0 %v12485_v20 }
 0x157   :  { %2557 = vmatmul.mubr.f32.gmra.mrb[10].mxu1 %v12685_v63 }
 0x158   :  { %2562 = vmatprep.mubr.f32.mxu1 %v12485_v20 }
 0x159   :  { %1366 = vmatmul.mubr.f32.gmra.mrb[12].mxu0 %v12690_v2 }
 0x15a   :  { %1371 = vmatprep.mubr.f32.mxu0 %v12485_v20 }
 0x15b   :  { %2564 = vmatmul.mubr.f32.gmra.mrb[12].mxu1 %v12690_v2  ;;  %v2678_v2 = vmul.f32 0.0, %v9952_v62 }
 0x15c   :  { %2569 = vmatprep.mubr.f32.mxu1 %v12485_v20 }
 0x15d   :  { %1373 = vmatmul.mubr.f32.gmra.mrb[14].mxu0 %v12695_v37 }
 0x15e   :  { %3497 = vmatprep.mubr.f32.mxu0 %v12485_v20 }
 0x15f   :  { %2571 = vmatmul.mubr.f32.gmra.mrb[14].mxu1 %v12695_v37 }
 0x160   :  { %4346 = vmatprep.mubr.f32.mxu1 %v12485_v20 }
 0x214   :  { %v1325_v4 = vpop.f32.mrb[0].mxu0 }
 0x215   :  { %v8158_v44 = vadd.f32 %v1325_v4, %v9922_v61  ;;  %v1327_v39 = vpop.f32.mrb[1].mxu0 }
 0x216   :  { %v2523_v24 = vpop.f32.mrb[0].mxu1  ;;  %v8159_v40 = vadd.f32 %v1327_v39, %v9934_v26 }
 0x217   :  { %v2665_v9 = vadd.f32 %v8158_v44, %v2661_v19  ;;  %v8174_v21 = vadd.f32 %v2523_v24, %v9928_v46  ;;  %v2525_v63 = vpop.f32.mrb[1].mxu1  ;;  %v9992_v19 = vrot.slane %v9913_v16, %v9900_v49 }
 0x218   :  { %v2666_v54 = vadd.f32 %v8159_v40, %v2662_v55  ;;  %v8175_v32 = vadd.f32 %v2525_v63, %v9956_v1  ;;  %v1332_v12 = vpop.f32.mrb[2].mxu0 }
 0x219   :  { %v2673_v27 = vadd.f32 %v2669_v35, %v2665_v9  ;;  %v9985_v58 = vadd.f32 %v1332_v12, %v9922_v61  ;;  %v1334_v29 = vpop.f32.mrb[3].mxu0  ;;  %v2667_v31 = vadd.f32 %v8174_v21, %v2663_v3  ;;  %12718 = vst [vmem:[#allocation16_spill] sm:$0xff] %v9992_v19  ;;  %v2680_v35 = vmul.f32 0.0, %v9974_v6 }
 0x21a   :  { %v2674_v52 = vadd.f32 %v2670_v59, %v2666_v54  ;;  %v2668_v0 = vadd.f32 %v8175_v32, %v2664_v10  ;;  %v2530_v13 = vpop.f32.mrb[2].mxu1  ;;  %v9988_v56 = vadd.f32 %v1334_v29, %v9934_v26  ;;  %v2694_v3 = vmul.f32 0.0, %v9978_v45 }
 0x21b   :  { %v2681_v30 = vadd.f32 %v2677_v7, %v2673_v27  ;;  %v9996_v4 = vadd.f32 %v2530_v13, %v9928_v46  ;;  %v2532_v55 = vpop.f32.mrb[3].mxu1  ;;  %v10004_v7 = vrot.slane %v9887_v5, %v9900_v49  ;;  %v2679_v10 = vmul.f32 0.0, %v9961_v48 }
 0x21c   :  { %v2682_v44 = vadd.f32 %v2678_v2, %v2674_v52  ;;  %v2676_v39 = vadd.f32 %v2672_v14, %v2668_v0  ;;  %v10000_v24 = vadd.f32 %v2532_v55, %v9956_v1  ;;  %v1339_v40 = vpop.f32.mrb[4].mxu0  ;;  %v2675_v63 = vadd.f32 %v2671_v47, %v2667_v31 }
 0x21d   :  { %v2689_v59 = vadd.f32 %v2685_v15, %v2681_v30  ;;  %12719 = vst [vmem:[#allocation18_spill] sm:$0xff] %v10004_v7  ;;  %v10008_v9 = vadd.f32 %v1339_v40, %v9922_v61  ;;  %v1341_v21 = vpop.f32.mrb[5].mxu0  ;;  %v10012_v14 = vrot.slane %v9913_v16, %v9904_v50  ;;  %v2688_v27 = vmul.f32 0.0, %v9992_v19 }
 0x21e   :  { %v2690_v54 = vadd.f32 %v2686_v36, %v2682_v44  ;;  %v2537_v2 = vpop.f32.mrb[4].mxu1  ;;  %v10015_v32 = vadd.f32 %v1341_v21, %v9934_v26  ;;  %v2684_v12 = vadd.f32 %v2680_v35, %v2676_v39  ;;  %v10026_v16 = vrot.slane %v9887_v5, %v9904_v50 }
 0x21f   :  { %12720 = vst [vmem:[#allocation25_spill] sm:$0xff] %v10012_v14  ;;  %v2697_v15 = vadd.f32 %v2693_v60, %v2689_v59  ;;  %v10019_v29 = vadd.f32 %v2537_v2, %v9928_v46  ;;  %v2539_v52 = vpop.f32.mrb[5].mxu1  ;;  %v2683_v30 = vadd.f32 %v2679_v10, %v2675_v63  ;;  %v2687_v35 = vmul.f32 0.0, %v10004_v7 }
 0x220   :  { %v2698_v0 = vadd.f32 %v2694_v3, %v2690_v54  ;;  %v10022_v47 = vadd.f32 %v2539_v52, %v9956_v1  ;;  %v1346_v36 = vpop.f32.mrb[6].mxu0  ;;  %12721 = vst [vmem:[#allocation21_spill] sm:$0xff] %v10026_v16  ;;  %v2692_v39 = vadd.f32 %v2688_v27, %v2684_v12  ;;  %v2696_v40 = vmul.f32 0.0, %v10012_v14 }
 0x221   :  { %v6451_v31 = vmul.f32 -1.442695, %v2697_v15  ;;  %v10029_v13 = vadd.f32 %v1346_v36, %v9922_v61  ;;  %v1348_v60 = vpop.f32.mrb[7].mxu0  ;;  %v2691_v54 = vadd.f32 %v2687_v35, %v2683_v30  ;;  %v2695_v2 = vmul.f32 0.0, %v10026_v16 }
 0x222   :  { %v6452_v55 = vmul.f32 -1.442695, %v2698_v0  ;;  %v2544_v44 = vpop.f32.mrb[6].mxu1  ;;  %v10033_v3 = vadd.f32 %v1348_v60, %v9934_v26  ;;  %v2700_v27 = vadd.f32 %v2696_v40, %v2692_v39 }
 0x223   :  { %12722 = vst [vmem:[#allocation85_spill] sm:$0xff] %v10029_v13  ;;  %8425 = vpow2.f32 %v6451_v31  ;;  %v10037_v59 = vadd.f32 %v2544_v44, %v9928_v46  ;;  %v2546_v5 = vpop.f32.mrb[7].mxu1  ;;  %v2699_v30 = vadd.f32 %v2695_v2, %v2691_v54 }
 0x224   :  { %12723 = vst [vmem:[#allocation27_spill] sm:$0xff] %v10033_v3  ;;  %v10040_v50 = vadd.f32 %v2546_v5, %v9956_v1  ;;  %v1353_v21 = vpop.f32.mrb[8].mxu0  ;;  %8427 = vpow2.f32 %v6452_v55  ;;  %v6453_v5 = vmul.f32 -1.442695, %v2700_v27 }
 0x225   :  { %12724 = vst [vmem:[#allocation31_spill] sm:$0xff] %v10037_v59  ;;  %v10043_v10 = vadd.f32 %v1353_v21, %v9922_v61  ;;  %v1355_v63 = vpop.f32.mrb[9].mxu0  ;;  %8429 = vtanh.f32 %v2699_v30 }
 0x226   :  { %12725 = vst [vmem:[#allocation34_spill] sm:$0xff] %v10040_v50  ;;  %v2551_v15 = vpop.f32.mrb[8].mxu1  ;;  %v10047_v12 = vadd.f32 %v1355_v63, %v9934_v26  ;;  %8431 = vpow2.f32 %v6453_v5  ;;  %v3364_v50 = vld [vmem:[#allocation4 + $0x160] sm:$0xff] }
 0x227   :  { %12726 = vst [vmem:[#allocation33_spill] sm:$0xff] %v10043_v10  ;;  %v10050_v52 = vadd.f32 %v2551_v15, %v9928_v46  ;;  %v2553_v0 = vpop.f32.mrb[9].mxu1  ;;  %v3349_v10 = vld [vmem:[#allocation4 + $0xe8] sm:$0xff] }
 0x228   :  { %12727 = vst [vmem:[#allocation88_spill] sm:$0xff] %v10047_v12  ;;  %v10053_v36 = vadd.f32 %v2553_v0, %v9956_v1  ;;  %v1360_v31 = vpop.f32.mrb[10].mxu0  ;;  %v3345_v12 = vld [vmem:[#allocation4 + $0xc8] sm:$0xff] }
 0x229   :  { %12728 = vst [vmem:[#allocation35_spill] sm:$0xff] %v10050_v52  ;;  %v10056_v60 = vadd.f32 %v1360_v31, %v9922_v61  ;;  %v1362_v55 = vpop.f32.mrb[11].mxu0 }
 0x22a   :  { %12729 = vst [vmem:[#allocation36_spill] sm:$0xff] %v10053_v36  ;;  %v2558_v35 = vpop.f32.mrb[10].mxu1  ;;  %v10059_v44 = vadd.f32 %v1362_v55, %v9934_v26 }
 0x22b   :  { %12730 = vst [vmem:[#allocation38_spill] sm:$0xff] %v10056_v60  ;;  %v10062_v39 = vadd.f32 %v2558_v35, %v9928_v46  ;;  %v2560_v40 = vpop.f32.mrb[11].mxu1 }
 0x22c   :  { %12731 = vst [vmem:[#allocation37_spill] sm:$0xff] %v10059_v44  ;;  %v10065_v21 = vadd.f32 %v2560_v40, %v9956_v1  ;;  %v1367_v63 = vpop.f32.mrb[12].mxu0 }
 0x22d   :  { %12732 = vst [vmem:[#allocation91_spill] sm:$0xff] %v10062_v39  ;;  %v8426_v15 = vpop.eup %8425  ;;  %v10068_v0 = vadd.f32 %v1367_v63, %v9922_v61  ;;  %v1369_v31 = vpop.f32.mrb[13].mxu0 }
 0x22e   :  { %12733 = vst [vmem:[#allocation39_spill] sm:$0xff] %v10065_v21  ;;  %v2704_v25 = vadd.f32 1.0, %v8426_v15  ;;  %v2565_v54 = vpop.f32.mrb[12].mxu1  ;;  %v10071_v2 = vadd.f32 %v1369_v31, %v9934_v26  ;;  %v8428_v27 = vpop.eup %8427 }
 0x22f   :  { %12734 = vst [vmem:[#allocation40_spill] sm:$0xff] %v10068_v0  ;;  %v10074_v55 = vadd.f32 %v2565_v54, %v9928_v46  ;;  %v2567_v35 = vpop.f32.mrb[13].mxu1  ;;  %v2710_v40 = vadd.f32 1.0, %v8428_v27  ;;  %v8430_v27 = vpop.eup %8429 }
 0x230   :  { %12735 = vst [vmem:[#allocation43_spill] sm:$0xff] %v10071_v2  ;;  %8433 = vrcp.f32 %v2704_v25  ;;  %v10077_v41 = vadd.f32 %v2567_v35, %v9956_v1  ;;  %v1374_v63 = vpop.f32.mrb[14].mxu0  ;;  %v8432_v35 = vpop.eup %8431 }
 0x231   :  { %12736 = vst [vmem:[#allocation41_spill] sm:$0xff] %v10074_v55  ;;  %v10080_v0 = vadd.f32 %v1374_v63, %v9922_v61  ;;  %v1376_v30 = vpop.f32.mrb[15].mxu0  ;;  %8435 = vrcp.f32 %v2710_v40  ;;  %v2717_v61 = vadd.f32 1.0, %v8432_v35 }
 0x232   :  { %12737 = vst [vmem:[#allocation94_spill] sm:$0xff] %v10077_v41  ;;  %v2572_v15 = vpop.f32.mrb[14].mxu1  ;;  %v10083_v31 = vadd.f32 %v1376_v30, %v9934_v26  ;;  %v12100_v30 = vmov 3  }
 0x233   :  { %12738 = vst [vmem:[#allocation96_spill] sm:$0xff] %v10080_v0  ;;  %v10086_v5 = vadd.f32 %v2572_v15, %v9928_v46  ;;  %v2574_v54 = vpop.f32.mrb[15].mxu1  ;;  %8437 = vrcp.f32 %v2717_v61 }
 0x234   :  { %12739 = vst [vmem:[#allocation63_spill] sm:$0xff] %v10083_v31  ;;  %v10089_v25 = vadd.f32 %v2574_v54, %v9956_v1  ;;  %v12098_v1 = vmov 1  }
 0x235   :  { %12740 = vst [vmem:[#allocation13_spill] sm:$0xff] %v10086_v5 }
 0x236   :  { %12741 = vst [vmem:[#allocation14_spill] sm:$0xff] %v10089_v25 }
 0x23a   :  { %v8434_v55 = vpop.eup %8433 }
 0x23b   :  { %v2721_v41 = vmul.f32 %v8434_v55, %v8430_v27  ;;  %v8436_v2 = vpop.eup %8435  ;;  %v12096_v55 = vmov 4  }
 0x23c   :  { %v2720_v63 = vmul.f32 0.0, %v8436_v2 }
 0x23d   :  { %v8438_v26 = vpop.eup %8437 }
 0x23e   :  { %v10091_v0 = vadd.f32 %v2721_v41, %v2720_v63  ;;  %v12742_v41 = vmov 0  }
 0x240   :  { %8439 = vtanh.f32 %v10091_v0 }
 0x24a   :  { %v8440_v40 = vpop.eup %8439 }
 0x24b   :  { %v2724_v46 = vmul.f32 %v8440_v40, %v8438_v26 }
 0x24d   :  { %2751 = vperm.xlu1 %8391, %v2724_v46   ;;  %2727 = vperm.xlu0 %8389, %v2724_v46  }
 0x251   :  { %8392 = vset.pattern.permute.xlu1 %v12100_v30  ;;  %8390 = vset.pattern.permute.xlu0 %v12098_v1 }
 0x252   :  { %2763 = vperm.xlu1 %8392, %v2724_v46   ;;  %2739 = vperm.xlu0 %8390, %v2724_v46  }
 0x256   :  { %8393 = vset.pattern.permute.xlu1 %v12096_v55  ;;  %8394 = vset.pattern.permute.xlu0 %v12742_v41 }
 0x257   :  { %2775 = vperm.xlu1 %8393, %v2724_v46  }
 0x25b   :  { %8395 = vset.pattern.permute.xlu1 %v12098_v1 }
 0x2cc   :  { %v2752_v2 = vpop.permute.xlu1 %2751  ;;  %v2728_v15 = vpop.permute.xlu0 %2727 }
 0x2cd   :  { %v2730_v54 = vmul.f32 %v2728_v15, %v9898_v28  ;;  %v2731_v27 = vmul.f32 %v2728_v15, %v9919_v18  ;;  %v2733_v35 = vmul.f32 %v2728_v15, %v9940_v43  ;;  %v2754_v30 = vmul.f32 %v2752_v2, %v9916_v22 }
 0x2ce   :  { %v2755_v25 = vmul.f32 %v2752_v2, %v9952_v62  ;;  %v2732_v31 = vmul.f32 %v2728_v15, %v9908_v17  ;;  %v2757_v11 = vmul.f32 %v2752_v2, %v9974_v6 }
 0x2cf   :  { %v2734_v26 = vadd.f32 %v9985_v58, %v2730_v54  ;;  %v2735_v40 = vadd.f32 %v9988_v56, %v2731_v27  ;;  %v2737_v5 = vadd.f32 %v10000_v24, %v2733_v35 }
 0x2d0   :  { %v2736_v15 = vadd.f32 %v9996_v4, %v2732_v31 }
 0x2d1   :  { %v2764_v61 = vpop.permute.xlu1 %2763  ;;  %v2740_v63 = vpop.permute.xlu0 %2739 }
 0x2d2   :  { %v2742_v55 = vmul.f32 %v2740_v63, %v9902_v42  ;;  %v2743_v46 = vmul.f32 %v2740_v63, %v9936_v38  ;;  %v2745_v1 = vmul.f32 %v2740_v63, %v9948_v53  ;;  %v2766_v58 = vmul.f32 %v2764_v61, %v9925_v34 }
 0x2d3   :  { %v2767_v27 = vmul.f32 %v2764_v61, %v9965_v51  ;;  %v2744_v44 = vmul.f32 %v2740_v63, %v9931_v23  ;;  %v2769_v33 = vmul.f32 %v2764_v61, %v9992_v19  ;;  %v2756_v63 = vmul.f32 %v2752_v2, %v9961_v48 }
 0x2d4   :  { %v2746_v39 = vadd.f32 %v2742_v55, %v2734_v26  ;;  %v2747_v21 = vadd.f32 %v2743_v46, %v2735_v40  ;;  %v2749_v54 = vadd.f32 %v2745_v1, %v2737_v5  ;;  %v2768_v4 = vmul.f32 %v2764_v61, %v10004_v7 }
 0x2d5   :  { %v2748_v46 = vadd.f32 %v2744_v44, %v2736_v15 }
 0x2d6   :  { %v2776_v56 = vpop.permute.xlu1 %2775  ;;  %v2758_v60 = vadd.f32 %v2754_v30, %v2746_v39  ;;  %v2759_v49 = vadd.f32 %v2755_v25, %v2747_v21  ;;  %v2761_v40 = vadd.f32 %v2757_v11, %v2749_v54 }
 0x2d7   :  { %v2778_v24 = vmul.f32 %v2776_v56, %v9943_v57  ;;  %v2779_v35 = vmul.f32 %v2776_v56, %v9978_v45  ;;  %v2781_v30 = vmul.f32 %v2776_v56, %v10012_v14  ;;  %v2760_v52 = vadd.f32 %v2756_v63, %v2748_v46 }
 0x2d8   :  { %v2770_v55 = vadd.f32 %v2766_v58, %v2758_v60  ;;  %v2771_v26 = vadd.f32 %v2767_v27, %v2759_v49  ;;  %v2773_v25 = vadd.f32 %v2769_v33, %v2761_v40  ;;  %v2780_v11 = vmul.f32 %v2776_v56, %v10026_v16 }
 0x2d9   :  { %v2772_v49 = vadd.f32 %v2768_v4, %v2760_v52  ;;  %v12745_v63 = vmov 4  }
 0x2da   :  { %v2782_v5 = vadd.f32 %v2778_v24, %v2770_v55  ;;  %v2783_v1 = vadd.f32 %v2779_v35, %v2771_v26  ;;  %v2785_v60 = vadd.f32 %v2781_v30, %v2773_v25 }
 0x2db   :  { %v2784_v31 = vadd.f32 %v2780_v11, %v2772_v49 }
 0x2dc   :  { %v6454_v39 = vmul.f32 -1.442695, %v2782_v5  ;;  %v6455_v21 = vmul.f32 -1.442695, %v2783_v1  ;;  %v6456_v44 = vmul.f32 -1.442695, %v2785_v60 }
 0x2dd   :  { %v12743_v5 = vmov 2   ;;  %v12744_v1 = vmov 3  }
 0x2de   :  { %8441 = vpow2.f32 %v6454_v39  ;;  %v12746_v39 = vmov 1  }
 0x2df   :  { %8443 = vpow2.f32 %v6455_v21 }
 0x2e0   :  { %8445 = vpow2.f32 %v6456_v44 }
 0x2e1   :  { %8447 = vtanh.f32 %v2784_v31 }
 0x2e8   :  { %v8442_v58 = vpop.eup %8441 }
 0x2e9   :  { %v8444_v54 = vpop.eup %8443  ;;  %v2789_v27 = vadd.f32 1.0, %v8442_v58 }
 0x2ea   :  { %v2795_v2 = vadd.f32 1.0, %v8444_v54  ;;  %v8446_v33 = vpop.eup %8445 }
 0x2eb   :  { %8449 = vrcp.f32 %v2789_v27  ;;  %v8448_v24 = vpop.eup %8447  ;;  %v2802_v55 = vadd.f32 1.0, %v8446_v33 }
 0x2ec   :  { %8451 = vrcp.f32 %v2795_v2 }
 0x2ed   :  { %8453 = vrcp.f32 %v2802_v55 }
 0x2f5   :  { %v8450_v35 = vpop.eup %8449 }
 0x2f6   :  { %v8452_v15 = vpop.eup %8451  ;;  %v2806_v61 = vmul.f32 %v8450_v35, %v8448_v24 }
 0x2f7   :  { %v2805_v52 = vmul.f32 %v8452_v15, %v10091_v0  ;;  %v8454_v56 = vpop.eup %8453 }
 0x2f9   :  { %v10124_v26 = vadd.f32 %v2806_v61, %v2805_v52 }
 0x2fb   :  { %8455 = vtanh.f32 %v10124_v26 }
 0x305   :  { %v8456_v40 = vpop.eup %8455 }
 0x306   :  { %v2809_v46 = vmul.f32 %v8456_v40, %v8454_v56 }
 0x308   :  { %2824 = vperm.xlu1 %8395, %v2809_v46   ;;  %2812 = vperm.xlu0 %8394, %v2809_v46  }
 0x30c   :  { %8396 = vset.pattern.permute.xlu1 %v12743_v5  ;;  %8397 = vset.pattern.permute.xlu0 %v12744_v1 }
 0x30d   :  { %2836 = vperm.xlu1 %8396, %v2809_v46   ;;  %2848 = vperm.xlu0 %8397, %v2809_v46  }
 0x311   :  { %8398 = vset.pattern.permute.xlu1 %v12745_v63  ;;  %8400 = vset.pattern.permute.xlu0 %v12746_v39  ;;  %v3425_v39 = vand.u32 4294901760, %v3345_v12 }
 0x312   :  { %2860 = vperm.xlu1 %8398, %v2809_v46  }
 0x316   :  { %8399 = vset.pattern.permute.xlu1 %v12742_v41 }
 0x387   :  { %v2825_v0 = vpop.permute.xlu1 %2824  ;;  %v2813_v21 = vpop.permute.xlu0 %2812 }
 0x388   :  { %v2815_v25 = vmul.f32 %v2813_v21, %v9898_v28  ;;  %v2816_v30 = vmul.f32 %v2813_v21, %v9919_v18  ;;  %v2818_v4 = vmul.f32 %v2813_v21, %v9940_v43  ;;  %v2827_v60 = vmul.f32 %v2825_v0, %v9902_v42  ;;  %v3347_v42 = vld [vmem:[#allocation4 + $0xd8] sm:$0xff]  ;;  %v3350_v18 = vld [vmem:[#allocation4 + $0xf0] sm:$0xff] }
 0x389   :  { %v2828_v49 = vmul.f32 %v2825_v0, %v9936_v38  ;;  %v2830_v54 = vmul.f32 %v2825_v0, %v9948_v53  ;;  %v2817_v27 = vmul.f32 %v2813_v21, %v9908_v17  ;;  %v3360_v53 = vld [vmem:[#allocation4 + $0x140] sm:$0xff]  ;;  %v3373_v38 = vld [vmem:[#allocation4 + $0x1a8] sm:$0xff]  ;;  %v3346_v17 = vld [vmem:[#allocation4 + $0xd0] sm:$0xff] }
 0x38a   :  { %v2819_v11 = vadd.f32 %v10008_v9, %v2815_v25  ;;  %v2820_v44 = vadd.f32 %v10015_v32, %v2816_v30  ;;  %v2822_v31 = vadd.f32 %v10022_v47, %v2818_v4  ;;  %v2829_v25 = vmul.f32 %v2825_v0, %v9931_v23 }
 0x38b   :  { %v2821_v56 = vadd.f32 %v10019_v29, %v2817_v27 }
 0x38c   :  { %v2837_v58 = vpop.permute.xlu1 %2836  ;;  %v2831_v2 = vadd.f32 %v2827_v60, %v2819_v11  ;;  %v2832_v33 = vadd.f32 %v2828_v49, %v2820_v44  ;;  %v2849_v24 = vpop.permute.xlu0 %2848  ;;  %v2834_v55 = vadd.f32 %v2830_v54, %v2822_v31 }
 0x38d   :  { %v2839_v35 = vmul.f32 %v2837_v58, %v9916_v22  ;;  %v2840_v15 = vmul.f32 %v2837_v58, %v9952_v62  ;;  %v2842_v61 = vmul.f32 %v2837_v58, %v9974_v6  ;;  %v2851_v32 = vmul.f32 %v2849_v24, %v9925_v34  ;;  %v3326_v6 = vld [vmem:[#allocation4 + $0x30] sm:$0xff] }
 0x38e   :  { %v2852_v47 = vmul.f32 %v2849_v24, %v9965_v51  ;;  %v2833_v49 = vadd.f32 %v2829_v25, %v2821_v56  ;;  %v2841_v11 = vmul.f32 %v2837_v58, %v9961_v48  ;;  %v2854_v54 = vmul.f32 %v2849_v24, %v9992_v19 }
 0x38f   :  { %v2843_v9 = vadd.f32 %v2839_v35, %v2831_v2  ;;  %v2844_v52 = vadd.f32 %v2840_v15, %v2832_v33  ;;  %v2846_v60 = vadd.f32 %v2842_v61, %v2834_v55  ;;  %v2853_v0 = vmul.f32 %v2849_v24, %v10004_v7 }
 0x390   :  { %v2845_v35 = vadd.f32 %v2841_v11, %v2833_v49 }
 0x391   :  { %v2861_v40 = vpop.permute.xlu1 %2860  ;;  %v2855_v46 = vadd.f32 %v2851_v32, %v2843_v9  ;;  %v2856_v21 = vadd.f32 %v2852_v47, %v2844_v52  ;;  %v2858_v29 = vadd.f32 %v2854_v54, %v2846_v60 }
 0x392   :  { %v2863_v30 = vmul.f32 %v2861_v40, %v9943_v57  ;;  %v2864_v4 = vmul.f32 %v2861_v40, %v9978_v45  ;;  %v2866_v27 = vmul.f32 %v2861_v40, %v10012_v14  ;;  %v2857_v9 = vadd.f32 %v2853_v0, %v2845_v35  ;;  %v3353_v14 = vld [vmem:[#allocation4 + $0x108] sm:$0xff]  ;;  %v3343_v57 = vld [vmem:[#allocation4 + $0xb8] sm:$0xff] }
 0x393   :  { %v2865_v55 = vmul.f32 %v2861_v40, %v10026_v16 }
 0x394   :  { %v2867_v44 = vadd.f32 %v2863_v30, %v2855_v46  ;;  %v2868_v31 = vadd.f32 %v2864_v4, %v2856_v21  ;;  %v2870_v15 = vadd.f32 %v2866_v27, %v2858_v29  ;;  %v3324_v29 = vld [vmem:[#allocation4 + $0x20] sm:$0xff] }
 0x395   :  { %v2869_v58 = vadd.f32 %v2865_v55, %v2857_v9  ;;  %v3407_v35 = vand.u32 4294901760, %v3324_v29  ;;  %v3329_v9 = vld [vmem:[#allocation4 + $0x48] sm:$0xff] }
 0x396   :  { %v6457_v2 = vmul.f32 -1.442695, %v2867_v44  ;;  %v6458_v33 = vmul.f32 -1.442695, %v2868_v31  ;;  %v6459_v61 = vmul.f32 -1.442695, %v2870_v15 }
 0x397   :  { %v3325_v31 = vld [vmem:[#allocation4 + $0x28] sm:$0xff]  ;;  %v10189_v48 = vsub.f32 %v3324_v29, %v3407_v35 }
 0x398   :  { %8457 = vpow2.f32 %v6457_v2  ;;  %v3405_v2 = vand.u32 4294901760, %v3325_v31  ;;  %v3333_v55 = vld [vmem:[#allocation4 + $0x68] sm:$0xff] }
 0x399   :  { %8459 = vpow2.f32 %v6458_v33  ;;  %v3320_v33 = vld [vmem:[#allocation4] sm:$0xff]  ;;  %12757 = vst [vmem:[#allocation29_spill] sm:$0xff] %v10189_v48 }
 0x39a   :  { %8461 = vpow2.f32 %v6459_v61  ;;  %v3403_v27 = vand.u32 4294901760, %v3320_v33  ;;  %v3409_v61 = vand.u32 4294901760, %v3329_v9  ;;  %v10185_v7 = vsub.f32 %v3325_v31, %v3405_v2 }
 0x39b   :  { %8463 = vtanh.f32 %v2869_v58  ;;  %v3413_v58 = vand.u32 4294901760, %v3333_v55 }
 0x39c   :  { %v10167_v15 = vpack.c.bf16 %v3407_v35, %v3403_v27  ;;  %12755 = vst [vmem:[#allocation83_spill] sm:$0xff] %v10185_v7  ;;  %v10187_v19 = vsub.f32 %v3320_v33, %v3403_v27  ;;  %v3335_v33 = vld [vmem:[#allocation4 + $0x78] sm:$0xff] }
 0x39d   :  { %v10193_v51 = vsub.f32 %v3333_v55, %v3413_v58  ;;  %v3352_v55 = vld [vmem:[#allocation4 + $0x100] sm:$0xff] }
 0x39e   :  { %12749 = vst [vmem:[#allocation19_spill] sm:$0xff] %v10167_v15  ;;  %12756 = vst [vmem:[#allocation28_spill] sm:$0xff] %v10187_v19 }
 0x39f   :  { %12759 = vst [vmem:[#allocation32_spill] sm:$0xff] %v10193_v51 }
 0x3a2   :  { %v8458_v52 = vpop.eup %8457 }
 0x3a3   :  { %v8460_v32 = vpop.eup %8459  ;;  %v2874_v47 = vadd.f32 1.0, %v8458_v52  ;;  %v3328_v52 = vld [vmem:[#allocation4 + $0x40] sm:$0xff] }
 0x3a4   :  { %v2880_v56 = vadd.f32 1.0, %v8460_v32  ;;  %v8462_v46 = vpop.eup %8461  ;;  %v3332_v32 = vld [vmem:[#allocation4 + $0x60] sm:$0xff] }
 0x3a5   :  { %8465 = vrcp.f32 %v2874_v47  ;;  %v8464_v21 = vpop.eup %8463  ;;  %v2887_v4 = vadd.f32 1.0, %v8462_v46  ;;  %v3411_v47 = vand.u32 4294901760, %v3328_v52  ;;  %v10171_v46 = vpack.c.bf16 %v3413_v58, %v3409_v61 }
 0x3a6   :  { %8467 = vrcp.f32 %v2880_v56  ;;  %v3415_v56 = vand.u32 4294901760, %v3332_v32 }
 0x3a7   :  { %8469 = vrcp.f32 %v2887_v4  ;;  %12750 = vst [vmem:[#allocation20_spill] sm:$0xff] %v10171_v46  ;;  %v10195_v34 = vsub.f32 %v3328_v52, %v3411_v47  ;;  %v4256_v52 = vand.u32 4294901760, %v3326_v6 }
 0x3a8   :  { %v10197_v62 = vsub.f32 %v3332_v32, %v3415_v56  ;;  %v3433_v32 = vand.u32 4294901760, %v3353_v14 }
 0x3a9   :  { %12760 = vst [vmem:[#allocation86_spill] sm:$0xff] %v10195_v34 }
 0x3aa   :  { %12761 = vst [vmem:[#allocation89_spill] sm:$0xff] %v10197_v62  ;;  %v10241_v59 = vsub.f32 %v3353_v14, %v3433_v32  ;;  %v3351_v14 = vld [vmem:[#allocation4 + $0xf8] sm:$0xff] }
 0x3af   :  { %v8466_v25 = vpop.eup %8465 }
 0x3b0   :  { %v8468_v30 = vpop.eup %8467  ;;  %v2891_v24 = vmul.f32 %v8466_v25, %v8464_v21  ;;  %v10173_v21 = vpack.c.bf16 %v3415_v56, %v3411_v47  ;;  %v3337_v25 = vld [vmem:[#allocation4 + $0x88] sm:$0xff] }
 0x3b1   :  { %v2890_v60 = vmul.f32 %v8468_v30, %v10124_v26  ;;  %v8470_v40 = vpop.eup %8469  ;;  %v3321_v26 = vld [vmem:[#allocation4 + $0x8] sm:$0xff]  ;;  %v3417_v4 = vand.u32 4294901760, %v3337_v25 }
 0x3b2   :  { %v3401_v54 = vand.u32 4294901760, %v3321_v26  ;;  %12751 = vst [vmem:[#allocation24_spill] sm:$0xff] %v10173_v21  ;;  %v3341_v30 = vld [vmem:[#allocation4 + $0xa8] sm:$0xff] }
 0x3b3   :  { %v10157_v49 = vadd.f32 %v2891_v24, %v2890_v60  ;;  %v3421_v24 = vand.u32 4294901760, %v3341_v30  ;;  %v3336_v60 = vld [vmem:[#allocation4 + $0x80] sm:$0xff]  ;;  %v10199_v22 = vsub.f32 %v3337_v25, %v3417_v4 }
 0x3b4   :  { %v10165_v0 = vpack.c.bf16 %v3405_v2, %v3401_v54  ;;  %v10183_v16 = vsub.f32 %v3321_v26, %v3401_v54  ;;  %v3357_v54 = vld [vmem:[#allocation4 + $0x128] sm:$0xff]  ;;  %v3331_v2 = vld [vmem:[#allocation4 + $0x58] sm:$0xff] }
 0x3b5   :  { %12747 = vst [vmem:[#allocation15_spill] sm:$0xff] %v10157_v49  ;;  %8471 = vtanh.f32 %v10157_v49  ;;  %v3429_v49 = vand.u32 4294901760, %v3349_v10  ;;  %v10205_v29 = vsub.f32 %v3341_v30, %v3421_v24  ;;  %v3437_v56 = vand.u32 4294901760, %v3357_v54 }
 0x3b6   :  { %12748 = vst [vmem:[#allocation17_spill] sm:$0xff] %v10165_v0  ;;  %7487 = vmatprep.subr.bf16.mxu0 %v10165_v0  ;;  %12754 = vst [vmem:[#allocation23_spill] sm:$0xff] %v10183_v16  ;;  %v4258_v25 = vand.u32 4294901760, %v3331_v2  ;;  %v4262_v30 = vand.u32 4294901760, %v3335_v33 }
 0x3b7   :  { %7489 = vmatpush1.bf16.msra.mxu0 %v10167_v15  ;;  %v10201_v26 = vpack.c.bf16 %v3429_v49, %v3425_v39  ;;  %12764 = vst [vmem:[#allocation97_spill] sm:$0xff] %v10205_v29  ;;  %v10217_v47 = vsub.f32 %v3349_v10, %v3429_v49  ;;  %v10243_v23 = vsub.f32 %v3357_v54, %v3437_v56 }
 0x3b8   :  { %7491 = vmatprep.subr.bf16.mxu0 %v10171_v46  ;;  %v10232_v45 = vpack.c.bf16 %v4262_v30, %v4258_v25  ;;  %v10247_v3 = vsub.f32 %v3331_v2, %v4258_v25  ;;  %v3443_v2 = vand.u32 4294901760, %v3360_v53 }
 0x3b9   :  { %12762 = vst [vmem:[#allocation92_spill] sm:$0xff] %v10201_v26 }
 0x3ba   :  { %12768 = vst [vmem:[#allocation87_spill] sm:$0xff] %v10232_v45  ;;  %12771 = vst [vmem:[#allocation55_spill] sm:$0xff] %v10247_v3 }
 0x3bb   :  { %7493 = vmatpush1.bf16.msra.mxu0 %v10173_v21  ;;  %v4254_v21 = vand.u32 4294901760, %v3327_v8 }
 0x3bf   :  { %v8472_v11 = vpop.eup %8471 }
 0x3c0   :  { %v2894_v44 = vmul.f32 %v8472_v11, %v8470_v40  ;;  %v3340_v40 = vld [vmem:[#allocation4 + $0xa0] sm:$0xff]  ;;  %v3419_v11 = vand.u32 4294901760, %v3336_v60 }
 0x3c2   :  { %2909 = vperm.xlu0 %8400, %v2894_v44   ;;  %2897 = vperm.xlu1 %8399, %v2894_v44   ;;  %v10207_v27 = vsub.f32 %v3336_v60, %v3419_v11  ;;  %v3334_v60 = vld [vmem:[#allocation4 + $0x70] sm:$0xff] }
 0x3c6   :  { %8403 = vset.pattern.permute.xlu0 %v12745_v63  ;;  %8401 = vset.pattern.permute.xlu1 %v12743_v5  ;;  %v3323_v63 = vld [vmem:[#allocation4 + $0x18] sm:$0xff] }
 0x3c7   :  { %2945 = vperm.xlu0 %8403, %v2894_v44   ;;  %2921 = vperm.xlu1 %8401, %v2894_v44   ;;  %v4250_v46 = vand.u32 4294901760, %v3323_v63 }
 0x3c9   :  { %v10203_v31 = vpack.c.bf16 %v4254_v21, %v4250_v46 }
 0x3cb   :  { %8402 = vset.pattern.permute.xlu1 %v12744_v1  ;;  %8406 = vset.pattern.permute.xlu0 %v12743_v5  ;;  %v10177_v5 = vpack.c.bf16 %v3421_v24, %v3417_v4  ;;  %v3344_v1 = vld [vmem:[#allocation4 + $0xc0] sm:$0xff]  ;;  %12763 = vst [vmem:[#allocation95_spill] sm:$0xff] %v10203_v31  ;;  %v3330_v24 = vld [vmem:[#allocation4 + $0x50] sm:$0xff] }
 0x3cc   :  { %2933 = vperm.xlu1 %8402, %v2894_v44   ;;  %v3423_v44 = vand.u32 4294901760, %v3340_v40  ;;  %v3427_v15 = vand.u32 4294901760, %v3344_v1  ;;  %7679 = vmatprep.subr.bf16.mxu1 %v10203_v31  ;;  %v3356_v4 = vld [vmem:[#allocation4 + $0x120] sm:$0xff]  ;;  %v3365_v31 = vld [vmem:[#allocation4 + $0x168] sm:$0xff] }
 0x3cd   :  { %12752 = vst [vmem:[#allocation26_spill] sm:$0xff] %v10177_v5  ;;  %7495 = vmatprep.subr.bf16.mxu0 %v10177_v5  ;;  %v10191_v5 = vsub.f32 %v3329_v9, %v3409_v61  ;;  %v10214_v61 = vsub.f32 %v3345_v12, %v3425_v39  ;;  %v3435_v39 = vand.u32 4294901760, %v3352_v55 }
 0x3ce   :  { %v10179_v36 = vpack.c.bf16 %v3423_v44, %v3419_v11  ;;  %v10209_v35 = vsub.f32 %v3340_v40, %v3423_v44  ;;  %v10220_v40 = vsub.f32 %v3323_v63, %v4250_v46  ;;  %v10222_v11 = vsub.f32 %v3327_v8, %v4254_v21  ;;  %v3361_v44 = vld [vmem:[#allocation4 + $0x148] sm:$0xff] }
 0x3cf   :  { %12758 = vst [vmem:[#allocation30_spill] sm:$0xff] %v10191_v5  ;;  %v10226_v10 = vsub.f32 %v3344_v1, %v3427_v15  ;;  %v10237_v8 = vsub.f32 %v3326_v6, %v4256_v52  ;;  %v3439_v46 = vand.u32 4294901760, %v3356_v4  ;;  %v4260_v21 = vand.u32 4294901760, %v3330_v24 }
 0x3d0   :  { %8404 = vset.pattern.permute.xlu1 %v12742_v41  ;;  %12753 = vst [vmem:[#allocation22_spill] sm:$0xff] %v10179_v36  ;;  %v3348_v41 = vld [vmem:[#allocation4 + $0xe0] sm:$0xff]  ;;  %7497 = vmatpush1.bf16.msra.mxu0 %v10179_v36  ;;  %v3322_v36 = vld [vmem:[#allocation4 + $0x10] sm:$0xff]  ;;  %v4264_v1 = vand.u32 4294901760, %v3334_v60  ;;  %v4270_v6 = vand.u32 4294901760, %v3343_v57  ;;  %v10256_v54 = vsub.f32 %v3352_v55, %v3435_v39  ;;  %v4274_v55 = vand.u32 4294901760, %v3347_v42 }
 0x3d1   :  { %v3431_v0 = vand.u32 4294901760, %v3348_v41  ;;  %7499 = vmatprep.subr.bf16.mxu0 %v10201_v26  ;;  %v4252_v58 = vand.u32 4294901760, %v3322_v36  ;;  %v3339_v26 = vld [vmem:[#allocation4 + $0x98] sm:$0xff]  ;;  %12769 = vst [vmem:[#allocation47_spill] sm:$0xff] %v10237_v8 }
 0x3d2   :  { %12775 = vst [vmem:[#allocation61_spill] sm:$0xff] %v10256_v54  ;;  %v3377_v54 = vld [vmem:[#allocation4 + $0x1c8] sm:$0xff] }
 0x3d3   :  { %v10211_v9 = vpack.c.bf16 %v3431_v0, %v3427_v15  ;;  %v10224_v12 = vpack.c.bf16 %v4256_v52, %v4252_v58  ;;  %v10228_v49 = vsub.f32 %v3348_v41, %v3431_v0  ;;  %v10235_v63 = vsub.f32 %v3322_v36, %v4252_v58  ;;  %v3338_v58 = vld [vmem:[#allocation4 + $0x90] sm:$0xff] }
 0x3d4   :  { %v3441_v41 = vand.u32 4294901760, %v3361_v44  ;;  %v3445_v0 = vand.u32 4294901760, %v3365_v31  ;;  %v4266_v15 = vand.u32 4294901760, %v3339_v26  ;;  %v10245_v36 = vpack.c.bf16 %v3439_v46, %v3435_v39  ;;  %v3342_v52 = vld [vmem:[#allocation4 + $0xb0] sm:$0xff] }
 0x3d5   :  { %12765 = vst [vmem:[#allocation65_spill] sm:$0xff] %v10211_v9  ;;  %7501 = vmatpush1.bf16.msra.mxu0 %v10211_v9  ;;  %12766 = vst [vmem:[#allocation77_spill] sm:$0xff] %v10224_v12  ;;  %v10230_v9 = vpack.c.bf16 %v3437_v56, %v3433_v32  ;;  %7681 = vmatpush1.bf16.msra.mxu1 %v10224_v12  ;;  %v3369_v12 = vld [vmem:[#allocation4 + $0x188] sm:$0xff]  ;;  %v10258_v32 = vsub.f32 %v3356_v4, %v3439_v46  ;;  %v4268_v25 = vand.u32 4294901760, %v3338_v58  ;;  %v3368_v4 = vld [vmem:[#allocation4 + $0x180] sm:$0xff] }
 0x3d6   :  { %7683 = vmatprep.subr.bf16.mxu1 %v10232_v45  ;;  %12770 = vst [vmem:[#allocation49_spill] sm:$0xff] %v10245_v36  ;;  %v10251_v45 = vpack.c.bf16 %v4264_v1, %v4260_v21  ;;  %v10253_v13 = vpack.c.bf16 %v3445_v0, %v3441_v41  ;;  %v10260_v56 = vsub.f32 %v3330_v24, %v4260_v21  ;;  %v3449_v43 = vand.u32 4294901760, %v3369_v12 }
 0x3d7   :  { %12767 = vst [vmem:[#allocation84_spill] sm:$0xff] %v10230_v9  ;;  %7503 = vmatprep.subr.bf16.mxu0 %v10230_v9  ;;  %v10249_v9 = vsub.f32 %v3335_v33, %v4262_v30  ;;  %12776 = vst [vmem:[#allocation67_spill] sm:$0xff] %v10258_v32  ;;  %v10262_v37 = vpack.c.bf16 %v4270_v6, %v4266_v15  ;;  %v3447_v33 = vand.u32 4294901760, %v3364_v50  ;;  %v4272_v30 = vand.u32 4294901760, %v3342_v52 }
 0x3d8   :  { %12773 = vst [vmem:[#allocation50_spill] sm:$0xff] %v10251_v45  ;;  %12774 = vst [vmem:[#allocation59_spill] sm:$0xff] %v10253_v13  ;;  %v4278_v39 = vand.u32 4294901760, %v3351_v14  ;;  %v10267_v46 = vsub.f32 %v3334_v60, %v4264_v1  ;;  %v10269_v24 = vsub.f32 %v3361_v44, %v3441_v41  ;;  %v10275_v28 = vsub.f32 %v3365_v31, %v3445_v0  ;;  %v3381_v60 = vld [vmem:[#allocation4 + $0x1e8] sm:$0xff]  ;;  %v3355_v0 = vld [vmem:[#allocation4 + $0x118] sm:$0xff] }
 0x3d9   :  { %12772 = vst [vmem:[#allocation52_spill] sm:$0xff] %v10249_v9  ;;  %7505 = vmatpush1.bf16.msra.mxu0 %v10245_v36  ;;  %12777 = vst [vmem:[#allocation64_spill] sm:$0xff] %v10260_v56  ;;  %7685 = vmatpush1.bf16.msra.mxu1 %v10251_v45  ;;  %v3453_v36 = vand.u32 4294901760, %v3373_v38  ;;  %v10271_v21 = vpack.c.bf16 %v3447_v33, %v3443_v2  ;;  %v10273_v45 = vpack.c.bf16 %v4272_v30, %v4268_v25 }
 0x3da   :  { %12778 = vst [vmem:[#allocation62_spill] sm:$0xff] %v10262_v37  ;;  %7507 = vmatprep.subr.bf16.mxu0 %v10253_v13  ;;  %7687 = vmatprep.subr.bf16.mxu1 %v10262_v37  ;;  %12779 = vst [vmem:[#allocation71_spill] sm:$0xff] %v10267_v46  ;;  %v3372_v13 = vld [vmem:[#allocation4 + $0x1a0] sm:$0xff]  ;;  %v10277_v56 = vsub.f32 %v3339_v26, %v4266_v15  ;;  %v10279_v37 = vsub.f32 %v3343_v57, %v4270_v6  ;;  %v3451_v31 = vand.u32 4294901760, %v3368_v4 }
 0x3db   :  { %12780 = vst [vmem:[#allocation73_spill] sm:$0xff] %v10271_v21  ;;  %12781 = vst [vmem:[#allocation75_spill] sm:$0xff] %v10273_v45  ;;  %v10281_v32 = vpack.c.bf16 %v3453_v36, %v3449_v43  ;;  %v10284_v44 = vsub.f32 %v3360_v53, %v3443_v2  ;;  %v10286_v1 = vsub.f32 %v3364_v50, %v3447_v33  ;;  %v3455_v57 = vand.u32 4294901760, %v3372_v13  ;;  %v3359_v2 = vld [vmem:[#allocation4 + $0x138] sm:$0xff]  ;;  %v3376_v33 = vld [vmem:[#allocation4 + $0x1c0] sm:$0xff] }
 0x3dc   :  { %12782 = vst [vmem:[#allocation74_spill] sm:$0xff] %v10277_v56  ;;  %12783 = vst [vmem:[#allocation78_spill] sm:$0xff] %v10279_v37  ;;  %v10289_v41 = vpack.c.bf16 %v4278_v39, %v4274_v55  ;;  %v10291_v26 = vsub.f32 %v3338_v58, %v4268_v25  ;;  %v4276_v15 = vand.u32 4294901760, %v3346_v17  ;;  %v4280_v6 = vand.u32 4294901760, %v3350_v18 }
 0x3dd   :  { %12784 = vst [vmem:[#allocation80_spill] sm:$0xff] %v10281_v32  ;;  %7509 = vmatpush1.bf16.msra.mxu0 %v10271_v21  ;;  %12785 = vst [vmem:[#allocation81_spill] sm:$0xff] %v10284_v44  ;;  %7689 = vmatpush1.bf16.msra.mxu1 %v10273_v45  ;;  %v10294_v37 = vsub.f32 %v3342_v52, %v4272_v30  ;;  %v10296_v21 = vsub.f32 %v3369_v12, %v3449_v43  ;;  %v3457_v53 = vand.u32 4294901760, %v3377_v54  ;;  %v3380_v45 = vld [vmem:[#allocation4 + $0x1e0] sm:$0xff]  ;;  %v10305_v44 = vld [vmem:[#allocation4 + $0x130] sm:$0xff] }
 0x3de   :  { %12786 = vst [vmem:[#allocation98_spill] sm:$0xff] %v10286_v1  ;;  %12787 = vst [vmem:[#allocation99_spill] sm:$0xff] %v10289_v41  ;;  %7511 = vmatprep.subr.bf16.mxu0 %v10281_v32  ;;  %7691 = vmatprep.subr.bf16.mxu1 %v10289_v41  ;;  %v3461_v50 = vand.u32 4294901760, %v3381_v60  ;;  %v10299_v1 = vsub.f32 %v3373_v38, %v3453_v36  ;;  %v10301_v58 = vpack.c.bf16 %v3455_v57, %v3451_v31 }
 0x3df   :  { %12788 = vst [vmem:[#allocation100_spill] sm:$0xff] %v10291_v26  ;;  %12789 = vst [vmem:[#allocation101_spill] sm:$0xff] %v10294_v37  ;;  %v10303_v25 = vpack.c.bf16 %v4280_v6, %v4276_v15  ;;  %v4282_v32 = vand.u32 4294901760, %v3355_v0  ;;  %v3354_v26 = vld [vmem:[#allocation4 + $0x110] sm:$0xff]  ;;  %v10307_v52 = vsub.f32 %v3347_v42, %v4274_v55  ;;  %v10309_v43 = vsub.f32 %v3351_v14, %v4278_v39  ;;  %v3363_v39 = vld [vmem:[#allocation4 + $0x158] sm:$0xff] }
 0x3e0   :  { %12790 = vst [vmem:[#allocation102_spill] sm:$0xff] %v10296_v21  ;;  %12791 = vst [vmem:[#allocation103_spill] sm:$0xff] %v10299_v1  ;;  %v10311_v12 = vsub.f32 %v3368_v4, %v3451_v31  ;;  %v10313_v30 = vpack.c.bf16 %v3461_v50, %v3457_v53  ;;  %v10316_v38 = vsub.f32 %v3372_v13, %v3455_v57  ;;  %v4286_v36 = vand.u32 4294901760, %v3359_v2  ;;  %v3367_v4 = vld [vmem:[#allocation4 + $0x178] sm:$0xff] }
 0x3e1   :  { %12792 = vst [vmem:[#allocation104_spill] sm:$0xff] %v10301_v58  ;;  %12793 = vst [vmem:[#allocation105_spill] sm:$0xff] %v10303_v25  ;;  %7513 = vmatpush1.bf16.msra.mxu0 %v10301_v58  ;;  %7693 = vmatpush1.bf16.msra.mxu1 %v10303_v25  ;;  %v3459_v41 = vand.u32 4294901760, %v3376_v33  ;;  %v3463_v1 = vand.u32 4294901760, %v3380_v45  ;;  %v4284_v21 = vand.u32 4294901760, %v3354_v26  ;;  %v4288_v42 = vand.u32 4294901760, %v10305_v44 }
 0x3e2   :  { %12794 = vst [vmem:[#allocation106_spill] sm:$0xff] %v10307_v52  ;;  %12795 = vst [vmem:[#allocation107_spill] sm:$0xff] %v10309_v43  ;;  %7515 = vmatprep.subr.bf16.mxu0 %v10313_v30  ;;  %v10323_v31 = vsub.f32 %v3346_v17, %v4276_v15  ;;  %v10325_v13 = vsub.f32 %v3350_v18, %v4280_v6  ;;  %v10327_v57 = vpack.c.bf16 %v4286_v36, %v4282_v32  ;;  %v10331_v58 = vld [vmem:[#allocation4 + $0x150] sm:$0xff] }
 0x3e3   :  { %12796 = vst [vmem:[#allocation108_spill] sm:$0xff] %v10311_v12  ;;  %12797 = vst [vmem:[#allocation109_spill] sm:$0xff] %v10313_v30  ;;  %v10329_v25 = vpack.c.bf16 %v3463_v1, %v3459_v41  ;;  %v10333_v30 = vld [vmem:[#allocation4 + $0x170] sm:$0xff]  ;;  %v10337_v12 = vsub.f32 %v3381_v60, %v3461_v50  ;;  %v10339_v14 = vsub.f32 %v3355_v0, %v4282_v32  ;;  %v12807_v17 = vand.u32 4294901760, %v10183_v16 }
 0x3e4   :  { %12798 = vst [vmem:[#allocation110_spill] sm:$0xff] %v10316_v38  ;;  %12799 = vst [vmem:[#allocation111_spill] sm:$0xff] %v10323_v31  ;;  %v10335_v38 = vsub.f32 %v3377_v54, %v3457_v53  ;;  %v10341_v55 = vpack.c.bf16 %v4288_v42, %v4284_v21  ;;  %7695 = vmatprep.subr.bf16.mxu1 %v10327_v57  ;;  %v12808_v15 = vand.u32 4294901760, %v10185_v7  ;;  %v4290_v54 = vand.u32 4294901760, %v3363_v39 }
 0x3e5   :  { %12800 = vst [vmem:[#allocation112_spill] sm:$0xff] %v10325_v13  ;;  %12801 = vst [vmem:[#allocation113_spill] sm:$0xff] %v10327_v57  ;;  %7517 = vmatpush1.bf16.msra.mxu0 %v10329_v25  ;;  %v3511_v18 = vsub.f32 %v10183_v16, %v12807_v17  ;;  %v4294_v53 = vand.u32 4294901760, %v3367_v4  ;;  %v12222_v32 = vand.u32 4294901760, %v10187_v19  ;;  %v12225_v60 = vand.u32 4294901760, %v10189_v48 }
 0x3e6   :  { %12802 = vst [vmem:[#allocation114_spill] sm:$0xff] %v10329_v25  ;;  %12803 = vst [vmem:[#allocation115_spill] sm:$0xff] %v10335_v38  ;;  %v3523_v6 = vsub.f32 %v10185_v7, %v12808_v15  ;;  %7697 = vmatpush1.bf16.msra.mxu1 %v10341_v55  ;;  %v4292_v0 = vand.u32 4294901760, %v10331_v58  ;;  %v4296_v50 = vand.u32 4294901760, %v10333_v30  ;;  %v10356_v57 = vsub.f32 %v3359_v2, %v4286_v36  ;;  %v12812_v7 = vld [vmem:[#allocation76_spill] sm:$0xff]  ;;  %v3375_v2 = vld [vmem:[#allocation4 + $0x1b8] sm:$0xff] }
 0x3e7   :  { %12804 = vst [vmem:[#allocation116_spill] sm:$0xff] %v10337_v12  ;;  %12805 = vst [vmem:[#allocation117_spill] sm:$0xff] %v10339_v14  ;;  %v3512_v25 = vand.u32 4294901760, %v3511_v18  ;;  %v10358_v16 = vpack.c.bf16 %v4294_v53, %v4290_v54  ;;  %v3371_v14 = vld [vmem:[#allocation4 + $0x198] sm:$0xff]  ;;  %v10360_v15 = vsub.f32 %v3376_v33, %v3459_v41  ;;  %v3529_v12 = vsub.f32 %v10189_v48, %v12225_v60  ;;  %v10377_v33 = vld [vmem:[#allocation4 + $0x190] sm:$0xff] }
 0x3e8   :  { %12806 = vst [vmem:[#allocation118_spill] sm:$0xff] %v10341_v55  ;;  %12809 = vst [vmem:[#allocation119_spill] sm:$0xff] %v10356_v57  ;;  %v3524_v17 = vand.u32 4294901760, %v3523_v6  ;;  %3503 = vmatmul.mubr.f32.vlgmr.msra.gmra.mrb[16].mxu0 %v12812_v7  ;;  %v3517_v55 = vsub.f32 %v10187_v19, %v12222_v32  ;;  %v10369_v38 = vpack.c.bf16 %v4296_v50, %v4292_v0  ;;  %v12230_v41 = vand.u32 4294901760, %v10191_v5 }
 0x3e9   :  { %12810 = vst [vmem:[#allocation120_spill] sm:$0xff] %v10358_v16  ;;  %12811 = vst [vmem:[#allocation121_spill] sm:$0xff] %v10360_v15  ;;  %v10371_v36 = vsub.f32 %v3380_v45, %v3463_v1  ;;  %v10373_v18 = vsub.f32 %v3354_v26, %v4284_v21  ;;  %7699 = vmatprep.subr.bf16.mxu1 %v10358_v16  ;;  %3732 = vmatprep.mubr.f32.mxu0 %v12485_v20  ;;  %v3530_v19 = vand.u32 4294901760, %v3529_v12 }
 0x3ea   :  { %12813 = vst [vmem:[#allocation76_spill] sm:$0xff] %v10369_v38  ;;  %v7518_v6 = vpack.c.bf16 %v3524_v17, %v3512_v25  ;;  %v3518_v32 = vand.u32 4294901760, %v3517_v55  ;;  %7701 = vmatpush1.bf16.msra.mxu1 %v10369_v38  ;;  %v12235_v60 = vand.u32 4294901760, %v10193_v51  ;;  %v4298_v48 = vand.u32 4294901760, %v3371_v14  ;;  %v10387_v25 = vld [vmem:[#allocation4 + $0x1b0] sm:$0xff]  ;;  %v10396_v38 = vld [vmem:[#allocation4 + $0x1d8] sm:$0xff] }
 0x3eb   :  { %12814 = vst [vmem:[#allocation122_spill] sm:$0xff] %v10371_v36  ;;  %12815 = vst [vmem:[#allocation123_spill] sm:$0xff] %v10373_v18  ;;  %v3535_v45 = vsub.f32 %v10191_v5, %v12230_v41  ;;  %v4302_v21 = vand.u32 4294901760, %v3375_v2  ;;  %v10390_v55 = vsub.f32 %v10305_v44, %v4288_v42  ;;  %v10398_v41 = vsub.f32 %v3363_v39, %v4290_v54 }
 0x3ec   :  { %7519 = vmatprep.subr.bf16.mxu0 %v7518_v6  ;;  %v7520_v12 = vpack.c.bf16 %v3530_v19, %v3518_v32  ;;  %v3547_v17 = vsub.f32 %v10193_v51, %v12235_v60  ;;  %v4300_v6 = vand.u32 4294901760, %v10377_v33  ;;  %v12819_v26 = vand.u32 4294901760, %v10195_v34  ;;  %v10411_v51 = vld [vmem:[#allocation4 + $0x1f8] sm:$0xff] }
 0x3ed   :  { %12816 = vst [vmem:[#allocation124_spill] sm:$0xff] %v10390_v55  ;;  %12817 = vst [vmem:[#allocation125_spill] sm:$0xff] %v10398_v41  ;;  %v3536_v16 = vand.u32 4294901760, %v3535_v45  ;;  %v10400_v1 = vpack.c.bf16 %v4302_v21, %v4298_v48  ;;  %v10405_v44 = vsub.f32 %v3367_v4, %v4294_v53  ;;  %v12821_v42 = vand.u32 4294901760, %v10197_v62  ;;  %v10417_v53 = vld [vmem:[#allocation4 + $0x1d0] sm:$0xff] }
 0x3ee   :  { %v3541_v5 = vsub.f32 %v10195_v34, %v12819_v26  ;;  %7521 = vmatpush1.bf16.msra.mxu0 %v7520_v12  ;;  %v3548_v19 = vand.u32 4294901760, %v3547_v17  ;;  %v12241_v60 = vand.u32 4294901760, %v10387_v25  ;;  %v12240_v54 = vand.u32 4294901760, %v10199_v22 }
 0x3ef   :  { %12818 = vst [vmem:[#allocation126_spill] sm:$0xff] %v10400_v1  ;;  %12820 = vst [vmem:[#allocation127_spill] sm:$0xff] %v10405_v44  ;;  %v3553_v32 = vsub.f32 %v10197_v62, %v12821_v42  ;;  %7703 = vmatprep.subr.bf16.mxu1 %v10400_v1  ;;  %v12242_v45 = vand.u32 4294901760, %v10205_v29  ;;  %v10420_v26 = vsub.f32 %v10331_v58, %v4292_v0  ;;  %v12253_v58 = vand.u32 4294901760, %v10411_v51  ;;  %v10436_v0 = vld [vmem:[#allocation4 + $0x1f0] sm:$0xff] }
 0x3f0   :  { %v3542_v39 = vand.u32 4294901760, %v3541_v5  ;;  %v7522_v12 = vpack.c.bf16 %v3548_v19, %v3536_v16  ;;  %v10424_v42 = vpack.c.bf16 %v12241_v60, %v4300_v6  ;;  %v10427_v1 = vsub.f32 %v10333_v30, %v4296_v50 }
 0x3f1   :  { %12822 = vst [vmem:[#allocation128_spill] sm:$0xff] %v10420_v26  ;;  %v3554_v17 = vand.u32 4294901760, %v3553_v32  ;;  %v3559_v5 = vsub.f32 %v10199_v22, %v12240_v54  ;;  %v3571_v4 = vsub.f32 %v10205_v29, %v12242_v45  ;;  %v12246_v19 = vand.u32 4294901760, %v10207_v27 }
 0x3f2   :  { %12823 = vst [vmem:[#allocation129_spill] sm:$0xff] %v10424_v42  ;;  %12824 = vst [vmem:[#allocation130_spill] sm:$0xff] %v10427_v1  ;;  %7523 = vmatprep.subr.bf16.mxu0 %v7522_v12  ;;  %7705 = vmatpush1.bf16.msra.mxu1 %v10424_v42  ;;  %v12245_v30 = vand.u32 4294901760, %v10209_v35  ;;  %v12249_v50 = vand.u32 4294901760, %v10417_v53  ;;  %v10442_v32 = vsub.f32 %v3371_v14, %v4298_v48  ;;  %v12826_v45 = vand.u32 4294901760, %v10396_v38 }
 0x3f3   :  { %v7524_v16 = vpack.c.bf16 %v3554_v17, %v3542_v39  ;;  %v3560_v54 = vand.u32 4294901760, %v3559_v5  ;;  %v3572_v60 = vand.u32 4294901760, %v3571_v4  ;;  %v10450_v12 = vsub.f32 %v3375_v2, %v4302_v21 }
 0x3f4   :  { %12825 = vst [vmem:[#allocation131_spill] sm:$0xff] %v10442_v32  ;;  %v10448_v29 = vpack.c.bf16 %v12253_v58, %v12826_v45  ;;  %v3565_v39 = vsub.f32 %v10207_v27, %v12246_v19  ;;  %v3577_v48 = vsub.f32 %v10209_v35, %v12245_v30  ;;  %v12248_v14 = vand.u32 4294901760, %v10436_v0 }
 0x3f5   :  { %12828 = vst [vmem:[#allocation133_spill] sm:$0xff] %v10450_v12  ;;  %7525 = vmatpush1.bf16.msra.mxu0 %v7524_v16  ;;  %v7526_v4 = vpack.c.bf16 %v3572_v60, %v3560_v54  ;;  %v12247_v17 = vand.u32 4294901760, %v10214_v61  ;;  %v12250_v45 = vand.u32 4294901760, %v10217_v47  ;;  %v12251_v2 = vand.u32 4294901760, %v10220_v40 }
 0x3f6   :  { %12827 = vst [vmem:[#allocation132_spill] sm:$0xff] %v10448_v29  ;;  %7707 = vmatprep.subr.bf16.mxu1 %v10448_v29  ;;  %v10464_v21 = vsub.f32 %v10377_v33, %v4300_v6  ;;  %v3566_v5 = vand.u32 4294901760, %v3565_v39  ;;  %v3578_v16 = vand.u32 4294901760, %v3577_v48  ;;  %v10470_v30 = vpack.c.bf16 %v12248_v14, %v12249_v50 }
 0x3f7   :  { %7527 = vmatprep.subr.bf16.mxu0 %v7526_v4  ;;  %v3583_v60 = vsub.f32 %v10214_v61, %v12247_v17  ;;  %v3595_v54 = vsub.f32 %v10217_v47, %v12250_v45  ;;  %v4361_v33 = vsub.f32 %v10220_v40, %v12251_v2  ;;  %v12252_v6 = vand.u32 4294901760, %v10222_v11 }
 0x3f8   :  { %12829 = vst [vmem:[#allocation134_spill] sm:$0xff] %v10470_v30  ;;  %v7528_v39 = vpack.c.bf16 %v3578_v16, %v3566_v5  ;;  %7709 = vmatpush1.bf16.msra.mxu1 %v10470_v30  ;;  %v12254_v48 = vand.u32 4294901760, %v10226_v10  ;;  %v12257_v4 = vand.u32 4294901760, %v10228_v49  ;;  %v12258_v19 = vand.u32 4294901760, %v10235_v63 }
 0x3f9   :  { %v3584_v17 = vand.u32 4294901760, %v3583_v60  ;;  %v3596_v14 = vand.u32 4294901760, %v3595_v54  ;;  %v4362_v50 = vand.u32 4294901760, %v4361_v33  ;;  %v4373_v45 = vsub.f32 %v10222_v11, %v12252_v6 }
 0x3fa   :  { %7529 = vmatpush1.bf16.msra.mxu0 %v7528_v39  ;;  %v3589_v5 = vsub.f32 %v10226_v10, %v12254_v48  ;;  %v3601_v16 = vsub.f32 %v10228_v49, %v12257_v4  ;;  %v4367_v2 = vsub.f32 %v10235_v63, %v12258_v19  ;;  %v12259_v60 = vand.u32 4294901760, %v10237_v8 }
 0x3fb   :  { %v7530_v54 = vpack.c.bf16 %v3596_v14, %v3584_v17  ;;  %v4374_v33 = vand.u32 4294901760, %v4373_v45  ;;  %4352 = vmatmul.mubr.f32.vlgmr.msra.gmra.mrb[16].mxu1 %v12812_v7  ;;  %v12262_v39 = vand.u32 4294901760, %v10241_v59  ;;  %v12266_v6 = vand.u32 4294901760, %v10243_v23 }
 0x3fc   :  { %v3590_v58 = vand.u32 4294901760, %v3589_v5  ;;  %v3602_v48 = vand.u32 4294901760, %v3601_v16  ;;  %v4368_v30 = vand.u32 4294901760, %v4367_v2  ;;  %v4379_v4 = vsub.f32 %v10237_v8, %v12259_v60  ;;  %4582 = vmatprep.mubr.f32.mxu1 %v12485_v20  ;;  %v12830_v16 = vld [vmem:[#allocation61_spill] sm:$0xff] }
 0x3fd   :  { %7531 = vmatprep.subr.bf16.mxu0 %v7530_v54  ;;  %v7710_v19 = vpack.c.bf16 %v4374_v33, %v4362_v50  ;;  %v3607_v14 = vsub.f32 %v10241_v59, %v12262_v39  ;;  %v3619_v7 = vsub.f32 %v10243_v23, %v12266_v6  ;;  %v12265_v17 = vand.u32 4294901760, %v10247_v3  ;;  %v12831_v33 = vld [vmem:[#allocation67_spill] sm:$0xff] }
 0x3fe   :  { %v7532_v45 = vpack.c.bf16 %v3602_v48, %v3590_v58  ;;  %v4380_v2 = vand.u32 4294901760, %v4379_v4  ;;  %v12267_v5 = vand.u32 4294901760, %v10249_v9  ;;  %v12268_v60 = vand.u32 4294901760, %v12830_v16  ;;  %v12832_v4 = vld [vmem:[#allocation64_spill] sm:$0xff] }
 0x3ff   :  { %7711 = vmatprep.subr.bf16.mxu1 %v7710_v19  ;;  %v3608_v29 = vand.u32 4294901760, %v3607_v14  ;;  %v3620_v54 = vand.u32 4294901760, %v3619_v7  ;;  %v4385_v50 = vsub.f32 %v10247_v3, %v12265_v17  ;;  %v12269_v39 = vand.u32 4294901760, %v12831_v33  ;;  %v12836_v3 = vld [vmem:[#allocation100_spill] sm:$0xff] }
 0x400   :  { %7533 = vmatpush1.bf16.msra.mxu0 %v7532_v45  ;;  %v7712_v42 = vpack.c.bf16 %v4380_v2, %v4368_v30  ;;  %v4397_v58 = vsub.f32 %v10249_v9, %v12267_v5  ;;  %v3613_v48 = vsub.f32 %v12830_v16, %v12268_v60  ;;  %v12270_v19 = vand.u32 4294901760, %v12832_v4 }
 0x401   :  { %v7534_v14 = vpack.c.bf16 %v3620_v54, %v3608_v29  ;;  %v4386_v7 = vand.u32 4294901760, %v4385_v50  ;;  %v3625_v17 = vsub.f32 %v12831_v33, %v12269_v39  ;;  %v12274_v6 = vand.u32 4294901760, %v10267_v46 }
 0x402   :  { %7713 = vmatpush1.bf16.msra.mxu1 %v7712_v42  ;;  %v4398_v30 = vand.u32 4294901760, %v4397_v58  ;;  %v3614_v45 = vand.u32 4294901760, %v3613_v48  ;;  %v4391_v2 = vsub.f32 %v12832_v4, %v12270_v19  ;;  %v12275_v5 = vand.u32 4294901760, %v10269_v24  ;;  %v12833_v48 = vld [vmem:[#allocation78_spill] sm:$0xff] }
 0x403   :  { %7535 = vmatprep.subr.bf16.mxu0 %v7534_v14  ;;  %v3626_v60 = vand.u32 4294901760, %v3625_v17  ;;  %v4403_v29 = vsub.f32 %v10267_v46, %v12274_v6  ;;  %v12280_v54 = vand.u32 4294901760, %v10275_v28  ;;  %v12284_v50 = vand.u32 4294901760, %v10277_v56 }
 0x404   :  { %v7714_v39 = vpack.c.bf16 %v4398_v30, %v4386_v7  ;;  %v4392_v42 = vand.u32 4294901760, %v4391_v2  ;;  %v3631_v58 = vsub.f32 %v10269_v24, %v12275_v5  ;;  %v12283_v19 = vand.u32 4294901760, %v12833_v48  ;;  %v12834_v30 = vld [vmem:[#allocation81_spill] sm:$0xff]  ;;  %v12835_v5 = vld [vmem:[#allocation98_spill] sm:$0xff] }
 0x405   :  { %v7536_v4 = vpack.c.bf16 %v3626_v60, %v3614_v45  ;;  %v4404_v9 = vand.u32 4294901760, %v4403_v29  ;;  %v3643_v17 = vsub.f32 %v10275_v28, %v12280_v54  ;;  %v4409_v14 = vsub.f32 %v10277_v56, %v12284_v50 }
 0x406   :  { %7715 = vmatprep.subr.bf16.mxu1 %v7714_v39  ;;  %v3632_v6 = vand.u32 4294901760, %v3631_v58  ;;  %v4421_v7 = vsub.f32 %v12833_v48, %v12283_v19  ;;  %v12288_v2 = vand.u32 4294901760, %v12834_v30  ;;  %v12289_v46 = vand.u32 4294901760, %v12835_v5 }
 0x407   :  { %7537 = vmatpush1.bf16.msra.mxu0 %v7536_v4  ;;  %v7716_v60 = vpack.c.bf16 %v4404_v9, %v4392_v42  ;;  %v3644_v45 = vand.u32 4294901760, %v3643_v17  ;;  %v4410_v29 = vand.u32 4294901760, %v4409_v14  ;;  %v12290_v54 = vand.u32 4294901760, %v12836_v3  ;;  %v12837_v4 = vld [vmem:[#allocation102_spill] sm:$0xff]  ;;  %v12838_v17 = vld [vmem:[#allocation103_spill] sm:$0xff] }
 0x408   :  { %v4422_v8 = vand.u32 4294901760, %v4421_v7  ;;  %v3637_v39 = vsub.f32 %v12834_v30, %v12288_v2  ;;  %v3649_v58 = vsub.f32 %v12835_v5, %v12289_v46  ;;  %v12291_v19 = vand.u32 4294901760, %v10294_v37 }
 0x409   :  { %7717 = vmatpush1.bf16.msra.mxu1 %v7716_v60  ;;  %v7538_v50 = vpack.c.bf16 %v3644_v45, %v3632_v6  ;;  %v4415_v9 = vsub.f32 %v12836_v3, %v12290_v54  ;;  %v12292_v42 = vand.u32 4294901760, %v12837_v4  ;;  %v12298_v14 = vand.u32 4294901760, %v12838_v17 }
 0x40a   :  { %v7718_v7 = vpack.c.bf16 %v4422_v8, %v4410_v29  ;;  %v3638_v48 = vand.u32 4294901760, %v3637_v39  ;;  %v3650_v56 = vand.u32 4294901760, %v3649_v58  ;;  %v4427_v2 = vsub.f32 %v10294_v37, %v12291_v19  ;;  %v12839_v58 = vld [vmem:[#allocation108_spill] sm:$0xff] }
 0x40b   :  { %7539 = vmatprep.subr.bf16.mxu0 %v7538_v50  ;;  %v4416_v46 = vand.u32 4294901760, %v4415_v9  ;;  %v3655_v6 = vsub.f32 %v12837_v4, %v12292_v42  ;;  %v3667_v60 = vsub.f32 %v12838_v17, %v12298_v14  ;;  %v12296_v45 = vand.u32 4294901760, %v10307_v52  ;;  %v12840_v42 = vld [vmem:[#allocation110_spill] sm:$0xff] }
 0x40c   :  { %7719 = vmatprep.subr.bf16.mxu1 %v7718_v7  ;;  %v7540_v8 = vpack.c.bf16 %v3650_v56, %v3638_v48  ;;  %v4428_v29 = vand.u32 4294901760, %v4427_v2  ;;  %v12297_v39 = vand.u32 4294901760, %v10309_v43  ;;  %v12299_v54 = vand.u32 4294901760, %v12839_v58 }
 0x40d   :  { %v3656_v19 = vand.u32 4294901760, %v3655_v6  ;;  %v3668_v50 = vand.u32 4294901760, %v3667_v60  ;;  %v4433_v9 = vsub.f32 %v10307_v52, %v12296_v45  ;;  %v12300_v37 = vand.u32 4294901760, %v12840_v42 }
 0x40e   :  { %7541 = vmatpush1.bf16.msra.mxu0 %v7540_v8  ;;  %v7720_v3 = vpack.c.bf16 %v4428_v29, %v4416_v46  ;;  %v4445_v7 = vsub.f32 %v10309_v43, %v12297_v39  ;;  %v3661_v56 = vsub.f32 %v12839_v58, %v12299_v54  ;;  %v12305_v48 = vand.u32 4294901760, %v10323_v31  ;;  %v12841_v39 = vld [vmem:[#allocation115_spill] sm:$0xff] }
 0x40f   :  { %v7542_v2 = vpack.c.bf16 %v3668_v50, %v3656_v19  ;;  %v4434_v6 = vand.u32 4294901760, %v4433_v9  ;;  %v3673_v60 = vsub.f32 %v12840_v42, %v12300_v37  ;;  %v12308_v45 = vand.u32 4294901760, %v10325_v13  ;;  %v12842_v50 = vld [vmem:[#allocation116_spill] sm:$0xff]  ;;  %v12843_v37 = vld [vmem:[#allocation117_spill] sm:$0xff] }
 0x410   :  { %7721 = vmatpush1.bf16.msra.mxu1 %v7720_v3  ;;  %v4446_v46 = vand.u32 4294901760, %v4445_v7  ;;  %v3662_v8 = vand.u32 4294901760, %v3661_v56  ;;  %v4439_v29 = vsub.f32 %v10323_v31, %v12305_v48  ;;  %v12310_v14 = vand.u32 4294901760, %v12841_v39 }
 0x411   :  { %7543 = vmatprep.subr.bf16.mxu0 %v7542_v2  ;;  %v3674_v54 = vand.u32 4294901760, %v3673_v60  ;;  %v4451_v19 = vsub.f32 %v10325_v13, %v12308_v45  ;;  %v12309_v9 = vand.u32 4294901760, %v12842_v50  ;;  %v12312_v43 = vand.u32 4294901760, %v12843_v37  ;;  %v12865_v13 = vld [vmem:[#allocation85_spill] sm:$0xff] }
 0x412   :  { %v7722_v52 = vpack.c.bf16 %v4446_v46, %v4434_v6  ;;  %v4440_v3 = vand.u32 4294901760, %v4439_v29  ;;  %v3679_v7 = vsub.f32 %v12841_v39, %v12310_v14  ;;  %v12311_v56 = vand.u32 4294901760, %v10356_v57 }
 0x413   :  { %v7544_v48 = vpack.c.bf16 %v3674_v54, %v3662_v8  ;;  %v4452_v31 = vand.u32 4294901760, %v4451_v19  ;;  %v3691_v2 = vsub.f32 %v12842_v50, %v12309_v9  ;;  %v4457_v60 = vsub.f32 %v12843_v37, %v12312_v43  ;;  %v12846_v37 = vld [vmem:[#allocation23_spill] sm:$0xff] }
 0x414   :  { %7723 = vmatprep.subr.bf16.mxu1 %v7722_v52  ;;  %v3680_v45 = vand.u32 4294901760, %v3679_v7  ;;  %v4469_v6 = vsub.f32 %v10356_v57, %v12311_v56  ;;  %v12313_v46 = vand.u32 4294901760, %v10360_v15  ;;  %v12314_v29 = vand.u32 4294901760, %v10371_v36 }
 0x415   :  { %7545 = vmatpush1.bf16.msra.mxu0 %v7544_v48  ;;  %v7724_v54 = vpack.c.bf16 %v4452_v31, %v4440_v3  ;;  %v3692_v8 = vand.u32 4294901760, %v3691_v2  ;;  %v4458_v19 = vand.u32 4294901760, %v4457_v60  ;;  %v12320_v9 = vand.u32 4294901760, %v10373_v18 }
 0x416   :  { %v4470_v14 = vand.u32 4294901760, %v4469_v6  ;;  %v3685_v52 = vsub.f32 %v10360_v15, %v12313_v46  ;;  %v3697_v7 = vsub.f32 %v10371_v36, %v12314_v29  ;;  %v12318_v56 = vand.u32 4294901760, %v10390_v55  ;;  %v12866_v36 = vld [vmem:[#allocation27_spill] sm:$0xff] }
 0x417   :  { %v12844_v43 = vand.u32 4294901760, %v10387_v25  ;;  %7725 = vmatpush1.bf16.msra.mxu1 %v7724_v54  ;;  %v7546_v31 = vpack.c.bf16 %v3692_v8, %v3680_v45  ;;  %v4463_v3 = vsub.f32 %v10373_v18, %v12320_v9  ;;  %v12319_v2 = vand.u32 4294901760, %v10398_v41  ;;  %v12850_v9 = vld [vmem:[#allocation28_spill] sm:$0xff]  ;;  %v12861_v18 = vld [vmem:[#allocation66_spill] sm:$0xff] }
 0x418   :  { %v7726_v60 = vpack.c.bf16 %v4470_v14, %v4458_v19  ;;  %v3686_v6 = vand.u32 4294901760, %v3685_v52  ;;  %v3698_v46 = vand.u32 4294901760, %v3697_v7  ;;  %v4475_v29 = vsub.f32 %v10390_v55, %v12318_v56  ;;  %v12851_v52 = vld [vmem:[#allocation29_spill] sm:$0xff]  ;;  %v12860_v55 = vld [vmem:[#allocation60_spill] sm:$0xff] }
 0x419   :  { %v10629_v48 = vsub.f32 %v10387_v25, %v12844_v43  ;;  %7547 = vmatprep.subr.bf16.mxu0 %v7546_v31  ;;  %v4464_v57 = vand.u32 4294901760, %v4463_v3  ;;  %v12847_v43 = vld [vmem:[#allocation83_spill] sm:$0xff]  ;;  %v4481_v45 = vsub.f32 %v10398_v41, %v12319_v2  ;;  %v12321_v54 = vand.u32 4294901760, %v10405_v44 }
 0x41a   :  { %v7550_v25 = vpack.c.bf16 %v12847_v43, %v12846_v37  ;;  %7727 = vmatprep.subr.bf16.mxu1 %v7726_v60  ;;  %v7548_v8 = vpack.c.bf16 %v3698_v46, %v3686_v6  ;;  %v4476_v14 = vand.u32 4294901760, %v4475_v29  ;;  %v12848_v7 = vand.u32 4294901760, %v10396_v38 }
 0x41b   :  { %12845 = vst [vmem:[#allocation61_spill] sm:$0xff] %v10629_v48  ;;  %v12849_v3 = vand.u32 4294901760, %v10411_v51  ;;  %v4493_v60 = vsub.f32 %v10405_v44, %v12321_v54  ;;  %v7552_v19 = vpack.c.bf16 %v12851_v52, %v12850_v9  ;;  %v12854_v43 = vand.u32 4294901760, %v10417_v53  ;;  %v12857_v9 = vld [vmem:[#allocation45_spill] sm:$0xff]  ;;  %v12858_v44 = vld [vmem:[#allocation54_spill] sm:$0xff] }
 0x41c   :  { %v10649_v31 = vsub.f32 %v10396_v38, %v12848_v7  ;;  %7549 = vmatpush1.bf16.msra.mxu0 %v7548_v8  ;;  %v7728_v2 = vpack.c.bf16 %v4476_v14, %v4464_v57  ;;  %v12852_v38 = vand.u32 4294901760, %v10420_v26  ;;  %v4482_v46 = vand.u32 4294901760, %v4481_v45  ;;  %v12855_v8 = vld [vmem:[#allocation30_spill] sm:$0xff]  ;;  %v12856_v57 = vld [vmem:[#allocation32_spill] sm:$0xff] }
 0x41d   :  { %v10654_v56 = vsub.f32 %v10411_v51, %v12849_v3  ;;  %v12853_v51 = vand.u32 4294901760, %v10427_v1  ;;  %v10671_v54 = vsub.f32 %v10417_v53, %v12854_v43  ;;  %7551 = vmatprep.subr.bf16.mxu0 %v7550_v25  ;;  %v7554_v14 = vpack.c.bf16 %v12856_v57, %v12855_v8  ;;  %v12863_v57 = vld [vmem:[#allocation48_spill] sm:$0xff]  ;;  %v12864_v8 = vld [vmem:[#allocation58_spill] sm:$0xff] }
 0x41e   :  { %v4487_v7 = vsub.f32 %v10420_v26, %v12852_v38  ;;  %v12859_v26 = vld [vmem:[#allocation51_spill] sm:$0xff]  ;;  %7729 = vmatpush1.bf16.msra.mxu1 %v7728_v2  ;;  %v12862_v25 = vand.u32 4294901760, %v10442_v32 }
 0x41f   :  { %v4499_v3 = vsub.f32 %v10427_v1, %v12853_v51  ;;  %v4494_v1 = vand.u32 4294901760, %v4493_v60  ;;  %3734 = vmatmul.mubr.f32.vlgmr.msra.gmra.mrb[16].mxu0 %v12861_v18 }
 0x420   :  { %v4488_v53 = vand.u32 4294901760, %v4487_v7  ;;  %v4505_v45 = vsub.f32 %v10442_v32, %v12862_v25  ;;  %7553 = vmatpush1.bf16.msra.mxu0 %v7552_v19  ;;  %v12867_v7 = vand.u32 4294901760, %v10450_v12  ;;  %3867 = vmatprep.mubr.f32.mxu0 %v12485_v20  ;;  %v12868_v25 = vld [vmem:[#allocation57_spill] sm:$0xff] }
 0x421   :  { %v4500_v43 = vand.u32 4294901760, %v4499_v3  ;;  %v7730_v60 = vpack.c.bf16 %v4494_v1, %v4482_v46  ;;  %7555 = vmatprep.subr.bf16.mxu0 %v7554_v14  ;;  %v12872_v1 = vld [vmem:[#allocation70_spill] sm:$0xff] }
 0x422   :  { %v4517_v3 = vsub.f32 %v10450_v12, %v12867_v7  ;;  %v12874_v12 = vld [vmem:[#allocation82_spill] sm:$0xff] }
 0x423   :  { %7731 = vmatprep.subr.bf16.mxu1 %v7730_v60  ;;  %v12878_v60 = vld [vmem:[#allocation12_spill] sm:$0xff] }
 0x424   :  { %v4518_v15 = vand.u32 4294901760, %v4517_v3  ;;  %v12880_v3 = vld [vmem:[#allocation93_spill] sm:$0xff] }
 0x441   :  { %v2910_v29 = vpop.permute.xlu0 %2909  ;;  %v2898_v6 = vpop.permute.xlu1 %2897 }
 0x442   :  { %v2900_v37 = vmul.f32 %v2898_v6, %v12857_v9  ;;  %v2901_v38 = vmul.f32 %v2898_v6, %v12858_v44  ;;  %v2902_v41 = vmul.f32 %v2898_v6, %v12859_v26  ;;  %v2903_v51 = vmul.f32 %v2898_v6, %v12860_v55 }
 0x443   :  { %v2912_v52 = vmul.f32 %v2910_v29, %v12863_v57  ;;  %v2913_v9 = vmul.f32 %v2910_v29, %v12864_v8  ;;  %v7732_v55 = vpack.c.bf16 %v4500_v43, %v4488_v53  ;;  %v2914_v57 = vmul.f32 %v2910_v29, %v12868_v25  ;;  %v12869_v8 = vld [vmem:[#allocation31_spill] sm:$0xff]  ;;  %v12873_v43 = vld [vmem:[#allocation90_spill] sm:$0xff] }
 0x444   :  { %v2904_v44 = vadd.f32 %v12865_v13, %v2900_v37  ;;  %v2905_v26 = vadd.f32 %v12866_v36, %v2901_v38  ;;  %v2906_v32 = vadd.f32 %v12869_v8, %v2902_v41  ;;  %v12870_v37 = vld [vmem:[#allocation34_spill] sm:$0xff]  ;;  %v12871_v36 = vand.u32 4294901760, %v10436_v0  ;;  %v12875_v41 = vld [vmem:[#allocation53_spill] sm:$0xff] }
 0x445   :  { %v2907_v13 = vadd.f32 %v12870_v37, %v2903_v51  ;;  %v2915_v46 = vmul.f32 %v2910_v29, %v12872_v1  ;;  %v4506_v53 = vand.u32 4294901760, %v4505_v45  ;;  %v12876_v51 = vld [vmem:[#allocation72_spill] sm:$0xff]  ;;  %7733 = vmatpush1.bf16.msra.mxu1 %v7732_v55 }
 0x446   :  { %v10688_v6 = vpop.permute.xlu0 %2945  ;;  %v2922_v2 = vpop.permute.xlu1 %2921  ;;  %v10700_v19 = vsub.f32 %v10436_v0, %v12871_v36  ;;  %v2916_v14 = vadd.f32 %v2912_v52, %v2904_v44  ;;  %v2917_v38 = vadd.f32 %v2913_v9, %v2905_v26  ;;  %v7556_v0 = vpack.c.bf16 %v10197_v62, %v10195_v34  ;;  %v12877_v9 = vld [vmem:[#allocation25_spill] sm:$0xff] }
 0x447   :  { %v2948_v7 = vmul.f32 %v10688_v6, %v12873_v43  ;;  %v2949_v25 = vmul.f32 %v10688_v6, %v12874_v12  ;;  %v2924_v8 = vmul.f32 %v2922_v2, %v12875_v41  ;;  %v2925_v37 = vmul.f32 %v2922_v2, %v12876_v51  ;;  %v12879_v51 = vld [vmem:[#allocation56_spill] sm:$0xff] }
 0x448   :  { %v12346_v44 = vand.u32 4294901760, %v10464_v21  ;;  %v2951_v52 = vmul.f32 %v10688_v6, %v12877_v9  ;;  %v2918_v29 = vadd.f32 %v2914_v57, %v2906_v32  ;;  %v2919_v45 = vadd.f32 %v2915_v46, %v2907_v13  ;;  %7557 = vmatpush1.bf16.msra.mxu0 %v7556_v0  ;;  %v12882_v57 = vld [vmem:[#allocation97_spill] sm:$0xff]  ;;  %v12883_v46 = vld [vmem:[#allocation79_spill] sm:$0xff] }
 0x449   :  { %v2927_v36 = vmul.f32 %v2922_v2, %v12878_v60  ;;  %v2928_v43 = vadd.f32 %v2924_v8, %v2916_v14  ;;  %v2929_v1 = vadd.f32 %v2925_v37, %v2917_v38  ;;  %v7734_v62 = vpack.c.bf16 %v4518_v15, %v4506_v53  ;;  %v12884_v38 = vld [vmem:[#allocation16_spill] sm:$0xff] }
 0x44a   :  { %v4511_v26 = vsub.f32 %v10464_v21, %v12346_v44  ;;  %v12881_v34 = vand.u32 4294901760, %v10629_v48  ;;  %v7558_v13 = vpack.c.bf16 %v12882_v57, %v10199_v22  ;;  %v2926_v14 = vmul.f32 %v2922_v2, %v12883_v46  ;;  %v12950_v46 = vld [vmem:[#allocation95_spill] sm:$0xff] }
 0x44b   :  { %v2934_v12 = vpop.permute.xlu1 %2933  ;;  %7735 = vmatprep.subr.bf16.mxu1 %v7734_v62  ;;  %v12352_v53 = vand.u32 4294901760, %v10649_v31  ;;  %v12351_v44 = vand.u32 4294901760, %v10654_v56  ;;  %v2931_v60 = vadd.f32 %v2927_v36, %v2919_v45 }
 0x44c   :  { %v2936_v55 = vmul.f32 %v2934_v12, %v12879_v51  ;;  %v2937_v41 = vmul.f32 %v2934_v12, %v12880_v3  ;;  %v4523_v32 = vsub.f32 %v10629_v48, %v12881_v34  ;;  %v2939_v8 = vmul.f32 %v2934_v12, %v12884_v38  ;;  %7559 = vmatprep.subr.bf16.mxu0 %v7558_v13  ;;  %v12885_v3 = vld [vmem:[#allocation18_spill] sm:$0xff]  ;;  %v12886_v13 = vld [vmem:[#allocation21_spill] sm:$0xff]  ;;  %v12951_v38 = vld [vmem:[#allocation59_spill] sm:$0xff] }
 0x44d   :  { %v4512_v0 = vand.u32 4294901760, %v4511_v26  ;;  %v2938_v34 = vmul.f32 %v2934_v12, %v12885_v3  ;;  %v4529_v2 = vsub.f32 %v10649_v31, %v12352_v53  ;;  %v4541_v62 = vsub.f32 %v10654_v56, %v12351_v44  ;;  %v12940_v53 = vld [vmem:[#allocation24_spill] sm:$0xff]  ;;  %v12949_v3 = vld [vmem:[#allocation49_spill] sm:$0xff] }
 0x44e   :  { %v2940_v37 = vadd.f32 %v2936_v55, %v2928_v43  ;;  %v2941_v9 = vadd.f32 %v2937_v41, %v2929_v1  ;;  %v4524_v15 = vand.u32 4294901760, %v4523_v32  ;;  %v7560_v1 = vpack.c.bf16 %v10209_v35, %v10207_v27 }
 0x44f   :  { %v2930_v43 = vadd.f32 %v2926_v14, %v2918_v29  ;;  %v2943_v41 = vadd.f32 %v2939_v8, %v2931_v60  ;;  %v4530_v12 = vand.u32 4294901760, %v4529_v2  ;;  %v7562_v55 = vpack.c.bf16 %v10217_v47, %v10214_v61 }
 0x450   :  { %v2952_v51 = vadd.f32 %v2948_v7, %v2940_v37  ;;  %v2953_v48 = vadd.f32 %v2949_v25, %v2941_v9  ;;  %v7736_v57 = vpack.c.bf16 %v4524_v15, %v4512_v0  ;;  %v4542_v7 = vand.u32 4294901760, %v4541_v62  ;;  %7561 = vmatpush1.bf16.msra.mxu0 %v7560_v1 }
 0x451   :  { %v12350_v25 = vand.u32 4294901760, %v10671_v54  ;;  %v12349_v9 = vand.u32 4294901760, %v10700_v19  ;;  %v2942_v36 = vadd.f32 %v2938_v34, %v2930_v43  ;;  %v7564_v32 = vpack.c.bf16 %v10228_v49, %v10226_v10  ;;  %7563 = vmatprep.subr.bf16.mxu0 %v7562_v55  ;;  %v12891_v55 = vld [vmem:[#allocation71_spill] sm:$0xff] }
 0x452   :  { %v6460_v26 = vmul.f32 -1.442695, %v2952_v51  ;;  %v6461_v45 = vmul.f32 -1.442695, %v2953_v48  ;;  %7737 = vmatpush1.bf16.msra.mxu1 %v7736_v57  ;;  %v7738_v29 = vpack.c.bf16 %v4542_v7, %v4530_v12  ;;  %v2955_v60 = vadd.f32 %v2951_v52, %v2943_v41  ;;  %v12888_v41 = vld [vmem:[#allocation55_spill] sm:$0xff] }
 0x453   :  { %v4535_v48 = vsub.f32 %v10671_v54, %v12350_v25  ;;  %v4547_v51 = vsub.f32 %v10700_v19, %v12349_v9  ;;  %v7566_v57 = vpack.c.bf16 %v10243_v23, %v10241_v59  ;;  %v2950_v14 = vmul.f32 %v10688_v6, %v12886_v13  ;;  %v12887_v6 = vld [vmem:[#allocation47_spill] sm:$0xff]  ;;  %v12939_v25 = vld [vmem:[#allocation130_spill] sm:$0xff] }
 0x454   :  { %8473 = vpow2.f32 %v6460_v26  ;;  %7739 = vmatprep.subr.bf16.mxu1 %v7738_v29  ;;  %7565 = vmatpush1.bf16.msra.mxu0 %v7564_v32  ;;  %v7568_v0 = vpack.c.bf16 %v12831_v33, %v12830_v16  ;;  %v7742_v15 = vpack.c.bf16 %v10222_v11, %v10220_v40  ;;  %v7570_v52 = vpack.c.bf16 %v10275_v28, %v10269_v24  ;;  %v12889_v26 = vld [vmem:[#allocation52_spill] sm:$0xff]  ;;  %v12892_v29 = vld [vmem:[#allocation74_spill] sm:$0xff] }
 0x455   :  { %8475 = vpow2.f32 %v6461_v45  ;;  %v4536_v8 = vand.u32 4294901760, %v4535_v48  ;;  %v4548_v37 = vand.u32 4294901760, %v4547_v51  ;;  %7567 = vmatprep.subr.bf16.mxu0 %v7566_v57  ;;  %v2954_v34 = vadd.f32 %v2950_v14, %v2942_v36  ;;  %v12890_v36 = vld [vmem:[#allocation64_spill] sm:$0xff]  ;;  %v12893_v48 = vld [vmem:[#allocation78_spill] sm:$0xff] }
 0x456   :  { %v6462_v62 = vmul.f32 -1.442695, %v2955_v60  ;;  %v7744_v1 = vpack.c.bf16 %v12887_v6, %v10235_v63  ;;  %v7572_v43 = vpack.c.bf16 %v12835_v5, %v12834_v30  ;;  %v7746_v45 = vpack.c.bf16 %v12889_v26, %v12888_v41 }
 0x457   :  { %v7740_v2 = vpack.c.bf16 %v4548_v37, %v4536_v8  ;;  %v7574_v12 = vpack.c.bf16 %v12838_v17, %v12837_v4  ;;  %8477 = vtanh.f32 %v2954_v34  ;;  %v7748_v32 = vpack.c.bf16 %v12891_v55, %v12890_v36 }
 0x458   :  { %7569 = vmatpush1.bf16.msra.mxu0 %v7568_v0  ;;  %8479 = vpow2.f32 %v6462_v62  ;;  %v7750_v51 = vpack.c.bf16 %v12893_v48, %v12892_v29  ;;  %v7576_v60 = vpack.c.bf16 %v12840_v42, %v12839_v58  ;;  %v7578_v8 = vpack.c.bf16 %v12842_v50, %v12841_v39 }
 0x459   :  { %7741 = vmatpush1.bf16.msra.mxu1 %v7740_v2  ;;  %7571 = vmatprep.subr.bf16.mxu0 %v7570_v52  ;;  %v12894_v37 = vand.u32 4294901760, %v10226_v10  ;;  %v12895_v0 = vand.u32 4294901760, %v10228_v49  ;;  %v12896_v52 = vand.u32 4294901760, %v10235_v63  ;;  %v12897_v34 = vand.u32 4294901760, %v12887_v6 }
 0x45a   :  { %7743 = vmatprep.subr.bf16.mxu1 %v7742_v15  ;;  %v12900_v10 = vand.u32 4294901760, %v12888_v41  ;;  %v12901_v49 = vand.u32 4294901760, %v12889_v26  ;;  %v12902_v63 = vand.u32 4294901760, %v12830_v16  ;;  %v12903_v6 = vand.u32 4294901760, %v12831_v33 }
 0x45b   :  { %v10782_v15 = vpack.c.bf16 %v12895_v0, %v12894_v37  ;;  %v10788_v2 = vpack.c.bf16 %v12897_v34, %v12896_v52  ;;  %v12907_v41 = vand.u32 4294901760, %v12891_v55  ;;  %v12908_v26 = vand.u32 4294901760, %v10269_v24 }
 0x45c   :  { %4584 = vmatmul.mubr.f32.vlgmr.msra.gmra.mrb[16].mxu1 %v12861_v18  ;;  %7573 = vmatpush1.bf16.msra.mxu0 %v7572_v43  ;;  %v12899_v43 = vand.u32 4294901760, %v10243_v23  ;;  %v10800_v37 = vpack.c.bf16 %v12901_v49, %v12900_v10  ;;  %v10806_v0 = vpack.c.bf16 %v12903_v6, %v12902_v63  ;;  %v12906_v23 = vand.u32 4294901760, %v12890_v36  ;;  %v12922_v6 = vld [vmem:[#allocation107_spill] sm:$0xff] }
 0x45d   :  { %7745 = vmatpush1.bf16.msra.mxu1 %v7744_v1  ;;  %7575 = vmatprep.subr.bf16.mxu0 %v7574_v12  ;;  %v12898_v1 = vand.u32 4294901760, %v10241_v59  ;;  %v12905_v12 = vld [vmem:[#allocation101_spill] sm:$0xff]  ;;  %v12909_v16 = vand.u32 4294901760, %v10275_v28  ;;  %v12910_v33 = vand.u32 4294901760, %v12892_v29  ;;  %v12913_v36 = vand.u32 4294901760, %v12835_v5  ;;  %v12917_v29 = vld [vmem:[#allocation122_spill] sm:$0xff] }
 0x45e   :  { %v8474_v7 = vpop.eup %8473  ;;  %7747 = vmatprep.subr.bf16.mxu1 %v7746_v45  ;;  %v12904_v45 = vld [vmem:[#allocation100_spill] sm:$0xff]  ;;  %4718 = vmatprep.mubr.f32.mxu1 %v12485_v20  ;;  %v12915_v24 = vand.u32 4294901760, %v12905_v12  ;;  %v12919_v49 = vand.u32 4294901760, %v12838_v17  ;;  %v12920_v5 = vld [vmem:[#allocation106_spill] sm:$0xff] }
 0x45f   :  { %v8476_v57 = vpop.eup %8475  ;;  %v2959_v14 = vadd.f32 1.0, %v8474_v7  ;;  %v10794_v7 = vpack.c.bf16 %v12899_v43, %v12898_v1  ;;  %v7752_v59 = vpack.c.bf16 %v12905_v12, %v12904_v45  ;;  %v10821_v52 = vpack.c.bf16 %v12909_v16, %v12908_v26  ;;  %v12924_v12 = vld [vmem:[#allocation111_spill] sm:$0xff]  ;;  %v12926_v26 = vld [vmem:[#allocation117_spill] sm:$0xff] }
 0x460   :  { %v2965_v62 = vadd.f32 1.0, %v8476_v57  ;;  %v10815_v57 = vpack.c.bf16 %v12907_v41, %v12906_v23  ;;  %v12912_v1 = vand.u32 4294901760, %v12834_v30  ;;  %v12914_v43 = vand.u32 4294901760, %v12904_v45  ;;  %7577 = vmatpush1.bf16.msra.mxu0 %v7576_v60  ;;  %v12925_v41 = vld [vmem:[#allocation112_spill] sm:$0xff]  ;;  %v12927_v16 = vld [vmem:[#allocation119_spill] sm:$0xff] }
 0x461   :  { %8481 = vrcp.f32 %v2959_v14  ;;  %v12911_v14 = vand.u32 4294901760, %v12893_v48  ;;  %7749 = vmatpush1.bf16.msra.mxu1 %v7748_v32  ;;  %v12918_v48 = vand.u32 4294901760, %v12837_v4  ;;  %v12921_v63 = vand.u32 4294901760, %v12920_v5  ;;  %7579 = vmatprep.subr.bf16.mxu0 %v7578_v8  ;;  %v8478_v60 = vpop.eup %8477 }
 0x462   :  { %8483 = vrcp.f32 %v2965_v62  ;;  %v10833_v55 = vpack.c.bf16 %v12913_v36, %v12912_v1  ;;  %v10839_v28 = vpack.c.bf16 %v12915_v24, %v12914_v43  ;;  %v12916_v62 = vld [vmem:[#allocation121_spill] sm:$0xff]  ;;  %v12923_v23 = vand.u32 4294901760, %v12922_v6  ;;  %7751 = vmatprep.subr.bf16.mxu1 %v7750_v51  ;;  %v8480_v17 = vpop.eup %8479  ;;  %v12929_v1 = vld [vmem:[#allocation68_spill] sm:$0xff]  ;;  %v12930_v36 = vld [vmem:[#allocation123_spill] sm:$0xff] }
 0x463   :  { %v10827_v34 = vpack.c.bf16 %v12911_v14, %v12910_v33  ;;  %v7580_v10 = vpack.c.bf16 %v12917_v29, %v12916_v62  ;;  %v10847_v30 = vpack.c.bf16 %v12919_v49, %v12918_v48  ;;  %v7754_v32 = vpack.c.bf16 %v12922_v6, %v12920_v5  ;;  %v12928_v14 = vld [vmem:[#allocation17_spill] sm:$0xff]  ;;  %v12931_v43 = vld [vmem:[#allocation124_spill] sm:$0xff]  ;;  %v12932_v24 = vld [vmem:[#allocation19_spill] sm:$0xff] }
 0x464   :  { %v10853_v45 = vpack.c.bf16 %v12923_v23, %v12921_v63  ;;  %v7756_v4 = vpack.c.bf16 %v12925_v41, %v12924_v12  ;;  %v7758_v33 = vpack.c.bf16 %v12927_v16, %v12926_v26  ;;  %v7760_v8 = vpack.c.bf16 %v12931_v43, %v12930_v36  ;;  %v12934_v5 = vld [vmem:[#allocation127_spill] sm:$0xff]  ;;  %v12935_v6 = vld [vmem:[#allocation20_spill] sm:$0xff] }
 0x465   :  { %7753 = vmatpush1.bf16.msra.mxu1 %v7752_v59  ;;  %7581 = vmatpush1.bf16.msra.mxu0 %v7580_v10  ;;  %v2972_v48 = vadd.f32 1.0, %v8480_v17  ;;  %v12933_v10 = vld [vmem:[#allocation125_spill] sm:$0xff]  ;;  %v12936_v23 = vld [vmem:[#allocation15_spill] sm:$0xff] }
 0x466   :  { %7755 = vmatprep.subr.bf16.mxu1 %v7754_v32  ;;  %7583 = vmatprep.subr.bf16.mxu0 %v12928_v14  ;;  %v7762_v63 = vpack.c.bf16 %v12934_v5, %v12933_v10  ;;  %v12942_v17 = vld [vmem:[#allocation133_spill] sm:$0xff] }
 0x467   :  { %8485 = vrcp.f32 %v2972_v48  ;;  %v7772_v48 = vpack.c.bf16 %v10700_v19, %v10671_v54 }
 0x468   :  { %3870 = vmatmul.mubr.f32.vlgmr.msra.gmra.mrb[16].mxu0 %v12929_v1 }
 0x469   :  { %7757 = vmatpush1.bf16.msra.mxu1 %v7756_v4  ;;  %7585 = vmatpush1.bf16.msra.mxu0 %v12932_v24  ;;  %v12938_v4 = vld [vmem:[#allocation128_spill] sm:$0xff] }
 0x46a   :  { %7759 = vmatprep.subr.bf16.mxu1 %v7758_v33  ;;  %7587 = vmatprep.subr.bf16.mxu0 %v12935_v6  ;;  %v7764_v44 = vpack.c.bf16 %v12939_v25, %v12938_v4 }
 0x46b   :  { %v8482_v51 = vpop.eup %8481  ;;  %3971 = vmatprep.mubr.f32.mxu0 %v12485_v20 }
 0x46c   :  { %v8484_v59 = vpop.eup %8483  ;;  %v2976_v49 = vmul.f32 %v8482_v51, %v8478_v60  ;;  %v12941_v60 = vld [vmem:[#allocation131_spill] sm:$0xff]  ;;  %v12943_v51 = vld [vmem:[#allocation26_spill] sm:$0xff] }
 0x46d   :  { %v2975_v32 = vmul.f32 %v8484_v59, %v12936_v23  ;;  %7761 = vmatpush1.bf16.msra.mxu1 %v7760_v8  ;;  %7589 = vmatpush1.bf16.msra.mxu0 %v12940_v53  ;;  %v7766_v33 = vpack.c.bf16 %v12942_v17, %v12941_v60  ;;  %v12944_v59 = vld [vmem:[#allocation61_spill] sm:$0xff]  ;;  %v12945_v23 = vld [vmem:[#allocation22_spill] sm:$0xff]  ;;  %v7770_v8 = vpack.c.bf16 %v10654_v56, %v10649_v31  ;;  %v12968_v17 = vld [vmem:[#allocation28_spill] sm:$0xff] }
 0x46e   :  { %7763 = vmatprep.subr.bf16.mxu1 %v7762_v63  ;;  %7591 = vmatprep.subr.bf16.mxu0 %v12943_v51  ;;  %v12947_v63 = vld [vmem:[#allocation65_spill] sm:$0xff] }
 0x46f   :  { %v10871_v9 = vadd.f32 %v2976_v49, %v2975_v32  ;;  %v7768_v49 = vpack.c.bf16 %v12944_v59, %v10464_v21  ;;  %v12946_v32 = vld [vmem:[#allocation92_spill] sm:$0xff]  ;;  %v12970_v60 = vld [vmem:[#allocation29_spill] sm:$0xff] }
 0x470   :  { %v12971_v51 = vand.u32 4294901760, %v12970_v60 }
 0x471   :  { %12937 = vst [vmem:[#allocation67_spill] sm:$0xff] %v10871_v9  ;;  %8487 = vtanh.f32 %v10871_v9  ;;  %7765 = vmatpush1.bf16.msra.mxu1 %v7764_v44  ;;  %7593 = vmatpush1.bf16.msra.mxu0 %v12945_v23  ;;  %v12948_v9 = vld [vmem:[#allocation84_spill] sm:$0xff]  ;;  %v8486_v44 = vpop.eup %8485  ;;  %v12967_v23 = vld [vmem:[#allocation114_spill] sm:$0xff] }
 0x472   :  { %7767 = vmatprep.subr.bf16.mxu1 %v7766_v33  ;;  %7595 = vmatprep.subr.bf16.mxu0 %v12946_v32  ;;  %v12966_v32 = vmov 3  }
 0x475   :  { %7769 = vmatpush1.bf16.msra.mxu1 %v7768_v49  ;;  %7597 = vmatpush1.bf16.msra.mxu0 %v12947_v63  ;;  %v12952_v49 = vld [vmem:[#allocation73_spill] sm:$0xff] }
 0x476   :  { %7771 = vmatprep.subr.bf16.mxu1 %v7770_v8  ;;  %7599 = vmatprep.subr.bf16.mxu0 %v12948_v9  ;;  %v12953_v63 = vld [vmem:[#allocation77_spill] sm:$0xff]  ;;  %v12954_v8 = vld [vmem:[#allocation80_spill] sm:$0xff]  ;;  %v12955_v9 = vld [vmem:[#allocation87_spill] sm:$0xff] }
 0x479   :  { %7773 = vmatpush1.bf16.msra.mxu1 %v7772_v48  ;;  %7601 = vmatpush1.bf16.msra.mxu0 %v12949_v3  ;;  %v12956_v48 = vmov 1  }
 0x47a   :  { %7775 = vmatprep.subr.bf16.mxu1 %v12950_v46  ;;  %7603 = vmatprep.subr.bf16.mxu0 %v12951_v38  ;;  %v12959_v46 = vld [vmem:[#allocation50_spill] sm:$0xff] }
 0x47b   :  { %v8488_v13 = vpop.eup %8487 }
 0x47c   :  { %v2979_v33 = vmul.f32 %v8488_v13, %v8486_v44  ;;  %4721 = vmatmul.mubr.f32.vlgmr.msra.gmra.mrb[16].mxu1 %v12929_v1  ;;  %v12957_v13 = vmov 0   ;;  %v12958_v44 = vld [vmem:[#allocation104_spill] sm:$0xff]  ;;  %v12960_v1 = vld [vmem:[#allocation109_spill] sm:$0xff] }
 0x47d   :  { %7605 = vmatpush1.bf16.msra.mxu0 %v12952_v49  ;;  %7777 = vmatpush1.bf16.msra.mxu1 %v12953_v63  ;;  %v12961_v49 = vld [vmem:[#allocation62_spill] sm:$0xff]  ;;  %v12962_v63 = vld [vmem:[#allocation23_spill] sm:$0xff] }
 0x47e   :  { %3006 = vperm.xlu0 %8406, %v2979_v33   ;;  %2982 = vperm.xlu1 %8404, %v2979_v33   ;;  %v12963_v38 = vand.u32 4294901760, %v12962_v63 }
 0x47f   :  { %7607 = vmatprep.subr.bf16.mxu0 %v12954_v8  ;;  %7779 = vmatprep.subr.bf16.mxu1 %v12955_v9  ;;  %v12964_v8 = vld [vmem:[#allocation83_spill] sm:$0xff] }
 0x480   :  { %4823 = vmatprep.mubr.f32.mxu1 %v12485_v20  ;;  %v12965_v3 = vand.u32 4294901760, %v12964_v8  ;;  %v12975_v8 = vld [vmem:[#allocation99_spill] sm:$0xff] }
 0x481   :  { %7609 = vmatpush1.bf16.msra.mxu0 %v12958_v44  ;;  %7781 = vmatpush1.bf16.msra.mxu1 %v12959_v46  ;;  %v12972_v46 = vld [vmem:[#allocation75_spill] sm:$0xff] }
 0x482   :  { %8405 = vset.pattern.permute.xlu1 %v12956_v48  ;;  %8409 = vset.pattern.permute.xlu0 %v12957_v13  ;;  %v7614_v9 = vpack.c.bf16 %v12965_v3, %v12963_v38  ;;  %v12969_v13 = vand.u32 4294901760, %v12968_v17  ;;  %v12976_v3 = vld [vmem:[#allocation69_spill] sm:$0xff]  ;;  %v12977_v38 = vld [vmem:[#allocation30_spill] sm:$0xff]  ;;  %v12979_v17 = vld [vmem:[#allocation32_spill] sm:$0xff] }
 0x483   :  { %2994 = vperm.xlu1 %8405, %v2979_v33   ;;  %7611 = vmatprep.subr.bf16.mxu0 %v12960_v1  ;;  %v12973_v1 = vand.u32 4294901760, %v10464_v21 }
 0x484   :  { %7783 = vmatprep.subr.bf16.mxu1 %v12961_v49  ;;  %v7616_v44 = vpack.c.bf16 %v12971_v51, %v12969_v13  ;;  %v12974_v49 = vand.u32 4294901760, %v12944_v59  ;;  %v12981_v51 = vld [vmem:[#allocation86_spill] sm:$0xff]  ;;  %v12985_v59 = vmov 4  }
 0x485   :  { %7613 = vmatpush1.bf16.msra.mxu0 %v12967_v23  ;;  %7785 = vmatpush1.bf16.msra.mxu1 %v12972_v46  ;;  %v12980_v23 = vand.u32 4294901760, %v12979_v17  ;;  %v12982_v13 = vand.u32 4294901760, %v12981_v51  ;;  %v12983_v46 = vld [vmem:[#allocation89_spill] sm:$0xff]  ;;  %v12990_v17 = vand.u32 4294901760, %v10649_v31 }
 0x486   :  { %v10920_v63 = vpack.c.bf16 %v12974_v49, %v12973_v1  ;;  %7787 = vmatprep.subr.bf16.mxu1 %v12975_v8  ;;  %7615 = vmatprep.subr.bf16.mxu0 %v7614_v9  ;;  %v12984_v25 = vand.u32 4294901760, %v12983_v46  ;;  %v12986_v49 = vld [vmem:[#allocation105_spill] sm:$0xff]  ;;  %v12987_v9 = vand.u32 4294901760, %v10199_v22  ;;  %v12995_v22 = vand.u32 4294901760, %v10207_v27  ;;  %v13002_v27 = vld [vmem:[#allocation126_spill] sm:$0xff] }
 0x487   :  { %8407 = vset.pattern.permute.xlu1 %v12966_v32  ;;  %v12978_v32 = vand.u32 4294901760, %v12977_v38  ;;  %v12988_v1 = vld [vmem:[#allocation97_spill] sm:$0xff] }
 0x488   :  { %3018 = vperm.xlu1 %8407, %v2979_v33   ;;  %3975 = vmatmul.mubr.f32.vlgmr.msra.gmra.mrb[16].mxu0 %v12976_v3  ;;  %v7620_v21 = vpack.c.bf16 %v12984_v25, %v12982_v13  ;;  %v12989_v8 = vand.u32 4294901760, %v12988_v1  ;;  %v12992_v46 = vld [vmem:[#allocation113_spill] sm:$0xff]  ;;  %v12993_v25 = vand.u32 4294901760, %v10671_v54  ;;  %v12997_v13 = vld [vmem:[#allocation118_spill] sm:$0xff]  ;;  %v13000_v54 = vld [vmem:[#allocation120_spill] sm:$0xff] }
 0x489   :  { %v7618_v60 = vpack.c.bf16 %v12980_v23, %v12978_v32  ;;  %7617 = vmatpush1.bf16.msra.mxu0 %v7616_v44  ;;  %4140 = vmatprep.mubr.f32.mxu0 %v12485_v20  ;;  %v12991_v23 = vand.u32 4294901760, %v10654_v56  ;;  %v12994_v44 = vand.u32 4294901760, %v10700_v19  ;;  %v12998_v56 = vand.u32 4294901760, %v10214_v61  ;;  %v13001_v19 = vld [vmem:[#allocation76_spill] sm:$0xff]  ;;  %v13007_v1 = vld [vmem:[#allocation134_spill] sm:$0xff] }
 0x48a   :  { %7789 = vmatpush1.bf16.msra.mxu1 %v12986_v49  ;;  %v7622_v38 = vpack.c.bf16 %v12989_v8, %v12987_v9  ;;  %v12996_v8 = vand.u32 4294901760, %v10209_v35  ;;  %v13003_v35 = vld [vmem:[#allocation129_spill] sm:$0xff]  ;;  %v13004_v61 = vld [vmem:[#allocation132_spill] sm:$0xff] }
 0x48b   :  { %v10943_v32 = vpack.c.bf16 %v12991_v23, %v12990_v17  ;;  %7791 = vmatprep.subr.bf16.mxu1 %v12992_v46  ;;  %v10950_v51 = vpack.c.bf16 %v12994_v44, %v12993_v25  ;;  %7619 = vmatprep.subr.bf16.mxu0 %v7618_v60  ;;  %v13006_v60 = vand.u32 4294901760, %v10222_v11  ;;  %v13011_v11 = vand.u32 4294901760, %v12842_v50  ;;  %v13034_v17 = vld [vmem:[#allocation49_spill] sm:$0xff]  ;;  %v13035_v23 = vld [vmem:[#allocation59_spill] sm:$0xff] }
 0x48c   :  { %8408 = vset.pattern.permute.xlu1 %v12985_v59  ;;  %v7624_v31 = vpack.c.bf16 %v12996_v8, %v12995_v22  ;;  %v13015_v50 = vand.u32 4294901760, %v12925_v41  ;;  %v13023_v41 = vld [vmem:[#allocation130_spill] sm:$0xff]  ;;  %v13036_v25 = vld [vmem:[#allocation95_spill] sm:$0xff]  ;;  %v13037_v44 = vld [vmem:[#allocation73_spill] sm:$0xff] }
 0x48d   :  { %3030 = vperm.xlu1 %8408, %v2979_v33   ;;  %7621 = vmatpush1.bf16.msra.mxu0 %v7620_v21  ;;  %v12999_v33 = vand.u32 4294901760, %v10217_v47  ;;  %v13005_v47 = vand.u32 4294901760, %v10220_v40  ;;  %v13010_v40 = vand.u32 4294901760, %v12841_v39  ;;  %v13014_v39 = vand.u32 4294901760, %v12924_v12  ;;  %v13038_v22 = vld [vmem:[#allocation77_spill] sm:$0xff]  ;;  %v13039_v8 = vld [vmem:[#allocation80_spill] sm:$0xff] }
 0x48e   :  { %7793 = vmatpush1.bf16.msra.mxu1 %v12997_v13  ;;  %7623 = vmatprep.subr.bf16.mxu0 %v7622_v38  ;;  %v13022_v12 = vand.u32 4294901760, %v12938_v4  ;;  %v13033_v4 = vld [vmem:[#allocation84_spill] sm:$0xff] }
 0x48f   :  { %v7626_v9 = vpack.c.bf16 %v12999_v33, %v12998_v56  ;;  %7795 = vmatprep.subr.bf16.mxu1 %v13000_v54  ;;  %v7806_v21 = vpack.c.bf16 %v13006_v60, %v13005_v47  ;;  %v13044_v56 = vld [vmem:[#allocation62_spill] sm:$0xff]  ;;  %v13047_v47 = vld [vmem:[#allocation99_spill] sm:$0xff] }
 0x490   :  { %v13045_v33 = vld [vmem:[#allocation114_spill] sm:$0xff] }
 0x491   :  { %8410 = vset.pattern.permute.xlu1 %v12956_v48  ;;  %7625 = vmatpush1.bf16.msra.mxu0 %v7624_v31  ;;  %v13042_v31 = vld [vmem:[#allocation50_spill] sm:$0xff] }
 0x492   :  { %7797 = vmatpush1.bf16.msra.mxu1 %v13001_v19  ;;  %7627 = vmatprep.subr.bf16.mxu0 %v7626_v9  ;;  %v13046_v9 = vld [vmem:[#allocation75_spill] sm:$0xff] }
 0x493   :  { %7799 = vmatprep.subr.bf16.mxu1 %v13002_v27 }
 0x495   :  { %7629 = vmatpush1.bf16.msra.mxu0 %v10782_v15  ;;  %v13008_v15 = vand.u32 4294901760, %v12839_v58  ;;  %v13013_v58 = vand.u32 4294901760, %v12917_v29  ;;  %v13020_v29 = vand.u32 4294901760, %v12933_v10  ;;  %v13030_v10 = vld [vmem:[#allocation22_spill] sm:$0xff] }
 0x496   :  { %7801 = vmatpush1.bf16.msra.mxu1 %v13003_v35  ;;  %7631 = vmatprep.subr.bf16.mxu0 %v10794_v7  ;;  %v13009_v7 = vand.u32 4294901760, %v12840_v42 }
 0x497   :  { %7803 = vmatprep.subr.bf16.mxu1 %v13004_v61 }
 0x498   :  { %v7640_v38 = vpack.c.bf16 %v13009_v7, %v13008_v15  ;;  %v13050_v7 = vld [vmem:[#allocation33_spill] sm:$0xff] }
 0x499   :  { %7633 = vmatpush1.bf16.msra.mxu0 %v10806_v0  ;;  %v7642_v0 = vpack.c.bf16 %v13011_v11, %v13010_v40  ;;  %v13052_v40 = vld [vmem:[#allocation48_spill] sm:$0xff]  ;;  %v13053_v11 = vld [vmem:[#allocation58_spill] sm:$0xff] }
 0x49a   :  { %7805 = vmatpush1.bf16.msra.mxu1 %v13007_v1  ;;  %7635 = vmatprep.subr.bf16.mxu0 %v10821_v52  ;;  %v13012_v52 = vand.u32 4294901760, %v12916_v62 }
 0x49b   :  { %7807 = vmatprep.subr.bf16.mxu1 %v7806_v21 }
 0x49c   :  { %v7644_v42 = vpack.c.bf16 %v13013_v58, %v13012_v52 }
 0x49d   :  { %4827 = vmatmul.mubr.f32.vlgmr.msra.gmra.mrb[16].mxu1 %v12976_v3  ;;  %7637 = vmatpush1.bf16.msra.mxu0 %v10833_v55  ;;  %v13017_v55 = vand.u32 4294901760, %v12927_v16 }
 0x49e   :  { %7809 = vmatpush1.bf16.msra.mxu1 %v10788_v2  ;;  %7639 = vmatprep.subr.bf16.mxu0 %v10847_v30  ;;  %v7820_v2 = vpack.c.bf16 %v13015_v50, %v13014_v39  ;;  %v13021_v30 = vand.u32 4294901760, %v12934_v5  ;;  %v13031_v5 = vld [vmem:[#allocation92_spill] sm:$0xff] }
 0x49f   :  { %7811 = vmatprep.subr.bf16.mxu1 %v10800_v37  ;;  %4993 = vmatprep.mubr.f32.mxu1 %v12485_v20  ;;  %v13016_v37 = vand.u32 4294901760, %v12926_v26  ;;  %v13024_v26 = vand.u32 4294901760, %v13023_v41  ;;  %v13056_v39 = vld [vmem:[#allocation72_spill] sm:$0xff]  ;;  %v13061_v41 = vld [vmem:[#allocation51_spill] sm:$0xff] }
 0x4a1   :  { %7641 = vmatpush1.bf16.msra.mxu0 %v7640_v38  ;;  %v7828_v16 = vpack.c.bf16 %v13024_v26, %v13022_v12  ;;  %v13051_v38 = vld [vmem:[#allocation88_spill] sm:$0xff] }
 0x4a2   :  { %7813 = vmatpush1.bf16.msra.mxu1 %v10815_v57  ;;  %7643 = vmatprep.subr.bf16.mxu0 %v7642_v0  ;;  %v7822_v57 = vpack.c.bf16 %v13017_v55, %v13016_v37  ;;  %v13057_v37 = vld [vmem:[#allocation70_spill] sm:$0xff] }
 0x4a3   :  { %7815 = vmatprep.subr.bf16.mxu1 %v10827_v34  ;;  %v13018_v34 = vand.u32 4294901760, %v12930_v36  ;;  %v13026_v36 = vld [vmem:[#allocation131_spill] sm:$0xff] }
 0x4a5   :  { %7645 = vmatpush1.bf16.msra.mxu0 %v7644_v42 }
 0x4a6   :  { %7817 = vmatpush1.bf16.msra.mxu1 %v10839_v28  ;;  %7647 = vmatprep.subr.bf16.mxu0 %v12928_v14  ;;  %v13019_v28 = vand.u32 4294901760, %v12931_v43  ;;  %v13025_v14 = vld [vmem:[#allocation26_spill] sm:$0xff]  ;;  %v13027_v43 = vand.u32 4294901760, %v13026_v36 }
 0x4a7   :  { %7819 = vmatprep.subr.bf16.mxu1 %v10853_v45  ;;  %v7826_v45 = vpack.c.bf16 %v13021_v30, %v13020_v29  ;;  %v13059_v29 = vld [vmem:[#allocation93_spill] sm:$0xff] }
 0x4a8   :  { %4142 = vmatmul.mubr.f32.vlgmr.msra.gmra.mrb[16].mxu0 %v12861_v18  ;;  %v7824_v62 = vpack.c.bf16 %v13019_v28, %v13018_v34  ;;  %v13058_v28 = vld [vmem:[#allocation56_spill] sm:$0xff] }
 0x4a9   :  { %7649 = vmatpush1.bf16.msra.mxu0 %v12932_v24  ;;  %4243 = vmatprep.mubr.f32.mxu0 %v12485_v20  ;;  %v13028_v24 = vld [vmem:[#allocation133_spill] sm:$0xff] }
 0x4aa   :  { %7821 = vmatpush1.bf16.msra.mxu1 %v7820_v2  ;;  %7651 = vmatprep.subr.bf16.mxu0 %v12935_v6  ;;  %v13029_v6 = vand.u32 4294901760, %v13028_v24 }
 0x4ab   :  { %7823 = vmatprep.subr.bf16.mxu1 %v7822_v57 }
 0x4ac   :  { %v7830_v3 = vpack.c.bf16 %v13029_v6, %v13027_v43 }
 0x4ad   :  { %7653 = vmatpush1.bf16.msra.mxu0 %v12940_v53  ;;  %v13032_v53 = vld [vmem:[#allocation65_spill] sm:$0xff] }
 0x4ae   :  { %7825 = vmatpush1.bf16.msra.mxu1 %v7824_v62  ;;  %7655 = vmatprep.subr.bf16.mxu0 %v13025_v14 }
 0x4af   :  { %7827 = vmatprep.subr.bf16.mxu1 %v7826_v45  ;;  %v13060_v45 = vld [vmem:[#allocation36_spill] sm:$0xff] }
 0x4b1   :  { %7657 = vmatpush1.bf16.msra.mxu0 %v13030_v10 }
 0x4b2   :  { %7829 = vmatpush1.bf16.msra.mxu1 %v7828_v16  ;;  %7659 = vmatprep.subr.bf16.mxu0 %v13031_v5  ;;  %v13062_v16 = vld [vmem:[#allocation57_spill] sm:$0xff]  ;;  %v13064_v5 = vld [vmem:[#allocation82_spill] sm:$0xff] }
 0x4b3   :  { %7831 = vmatprep.subr.bf16.mxu1 %v7830_v3  ;;  %v13063_v3 = vld [vmem:[#allocation90_spill] sm:$0xff] }
 0x4b5   :  { %7661 = vmatpush1.bf16.msra.mxu0 %v13032_v53 }
 0x4b6   :  { %7833 = vmatpush1.bf16.msra.mxu1 %v10920_v63  ;;  %7663 = vmatprep.subr.bf16.mxu0 %v13033_v4  ;;  %v13040_v63 = vld [vmem:[#allocation87_spill] sm:$0xff]  ;;  %v13065_v4 = vld [vmem:[#allocation12_spill] sm:$0xff] }
 0x4b7   :  { %7835 = vmatprep.subr.bf16.mxu1 %v10943_v32  ;;  %v13041_v32 = vld [vmem:[#allocation104_spill] sm:$0xff] }
 0x4b9   :  { %7665 = vmatpush1.bf16.msra.mxu0 %v13034_v17 }
 0x4ba   :  { %7837 = vmatpush1.bf16.msra.mxu1 %v10950_v51  ;;  %7667 = vmatprep.subr.bf16.mxu0 %v13035_v23  ;;  %v13043_v51 = vld [vmem:[#allocation109_spill] sm:$0xff]  ;;  %v13066_v23 = vld [vmem:[#allocation35_spill] sm:$0xff] }
 0x4bb   :  { %7839 = vmatprep.subr.bf16.mxu1 %v13036_v25 }
 0x4bd   :  { %4995 = vmatmul.mubr.f32.vlgmr.msra.gmra.mrb[16].mxu1 %v12861_v18  ;;  %7669 = vmatpush1.bf16.msra.mxu0 %v13037_v44 }
 0x4be   :  { %7841 = vmatpush1.bf16.msra.mxu1 %v13038_v22  ;;  %7671 = vmatprep.subr.bf16.mxu0 %v13039_v8 }
 0x4bf   :  { %7843 = vmatprep.subr.bf16.mxu1 %v13040_v63  ;;  %5097 = vmatprep.mubr.f32.mxu1 %v12485_v20  ;;  %v13067_v63 = vld [vmem:[#allocation16_spill] sm:$0xff] }
 0x4c1   :  { %7673 = vmatpush1.bf16.msra.mxu0 %v13041_v32 }
 0x4c2   :  { %7845 = vmatpush1.bf16.msra.mxu1 %v13042_v31  ;;  %7675 = vmatprep.subr.bf16.mxu0 %v13043_v51 }
 0x4c3   :  { %7847 = vmatprep.subr.bf16.mxu1 %v13044_v56 }
 0x4c5   :  { %7677 = vmatpush1.bf16.msra.mxu0 %v13045_v33  ;;  %v13068_v33 = vld [vmem:[#allocation25_spill] sm:$0xff] }
 0x4c6   :  { %7849 = vmatpush1.bf16.msra.mxu1 %v13046_v9 }
 0x4c7   :  { %7851 = vmatprep.subr.bf16.mxu1 %v13047_v47  ;;  %v13069_v47 = vld [vmem:[#allocation79_spill] sm:$0xff] }
 0x4c8   :  { %4245 = vmatmul.mubr.f32.vlgmr.msra.gmra.mrb[16].mxu0 %v12861_v18 }
 0x4c9   :  { %6714 = vmatprep.mubr.msk.f32.mxu0 %vm8674_vm0, %v12485_v20 }
 0x4ca   :  { %7853 = vmatpush1.bf16.msra.mxu1 %v12986_v49  ;;  %v13048_v49 = vld [vmem:[#allocation45_spill] sm:$0xff] }
 0x4cb   :  { %7855 = vmatprep.subr.bf16.mxu1 %v12992_v46  ;;  %v13049_v46 = vld [vmem:[#allocation54_spill] sm:$0xff] }
 0x4ce   :  { %7857 = vmatpush1.bf16.msra.mxu1 %v12997_v13 }
 0x4cf   :  { %7859 = vmatprep.subr.bf16.mxu1 %v13000_v54 }
 0x4d2   :  { %7861 = vmatpush1.bf16.msra.mxu1 %v13001_v19 }
 0x4d3   :  { %7863 = vmatprep.subr.bf16.mxu1 %v13002_v27 }
 0x4d6   :  { %7865 = vmatpush1.bf16.msra.mxu1 %v13003_v35 }
 0x4d7   :  { %7867 = vmatprep.subr.bf16.mxu1 %v13004_v61 }
 0x4da   :  { %7869 = vmatpush1.bf16.msra.mxu1 %v13007_v1  ;;  %v13054_v1 = vld [vmem:[#allocation60_spill] sm:$0xff] }
 0x4dd   :  { %5099 = vmatmul.mubr.f32.vlgmr.msra.gmra.mrb[16].mxu1 %v12861_v18  ;;  %v13055_v18 = vld [vmem:[#allocation53_spill] sm:$0xff] }
 0x4de   :  { %6749 = vmatprep.mubr.msk.f32.mxu1 %vm8674_vm0, %v12485_v20 }
 0x4fd   :  { %v2983_v60 = vpop.permute.xlu1 %2982  ;;  %v3007_v0 = vpop.permute.xlu0 %3006 }
 0x4fe   :  { %v2985_v21 = vmul.f32 %v2983_v60, %v13048_v49  ;;  %v2986_v15 = vmul.f32 %v2983_v60, %v13049_v46  ;;  %v2988_v58 = vmul.f32 %v2983_v60, %v13054_v1  ;;  %v3009_v42 = vmul.f32 %v3007_v0, %v13055_v18 }
 0x4ff   :  { %v3010_v50 = vmul.f32 %v3007_v0, %v13056_v39  ;;  %v2987_v26 = vmul.f32 %v2983_v60, %v13061_v41  ;;  %v3012_v17 = vmul.f32 %v3007_v0, %v13065_v4  ;;  %v3011_v60 = vmul.f32 %v3007_v0, %v13069_v47 }
 0x500   :  { %v2989_v54 = vadd.f32 %v13050_v7, %v2985_v21  ;;  %v2990_v19 = vadd.f32 %v13051_v38, %v2986_v15  ;;  %v2992_v12 = vadd.f32 %v13060_v45, %v2988_v58  ;;  %v13071_v38 = vld [vmem:[#allocation21_spill] sm:$0xff] }
 0x501   :  { %v2991_v25 = vadd.f32 %v13066_v23, %v2987_v26  ;;  %v12362_v23 = vmov 0.0|0.0  }
 0x502   :  { %v2995_v13 = vpop.permute.xlu1 %2994  ;;  %7870 = vmatprep.subr.bf16.mxu0 %v12362_v23  ;;  %7894 = vmatprep.subr.bf16.mxu1 %v12362_v23 }
 0x503   :  { %v2997_v27 = vmul.f32 %v2995_v13, %v13052_v40  ;;  %v2998_v35 = vmul.f32 %v2995_v13, %v13053_v11  ;;  %v3000_v55 = vmul.f32 %v2995_v13, %v13057_v37  ;;  %v2999_v14 = vmul.f32 %v2995_v13, %v13062_v16  ;;  %v13070_v13 = vld [vmem:[#allocation18_spill] sm:$0xff] }
 0x505   :  { %v3001_v61 = vadd.f32 %v2997_v27, %v2989_v54  ;;  %v3002_v52 = vadd.f32 %v2998_v35, %v2990_v19  ;;  %v3004_v36 = vadd.f32 %v3000_v55, %v2992_v12  ;;  %v3003_v31 = vadd.f32 %v2999_v14, %v2991_v25 }
 0x507   :  { %v3019_v2 = vpop.permute.xlu1 %3018  ;;  %v3013_v57 = vadd.f32 %v3009_v42, %v3001_v61  ;;  %v3014_v34 = vadd.f32 %v3010_v50, %v3002_v52  ;;  %v3016_v8 = vadd.f32 %v3012_v17, %v3004_v36  ;;  %v3015_v15 = vadd.f32 %v3011_v60, %v3003_v31  ;;  %v5139_v17 = vld [vmem:[#allocation7 + $0x10] sm:$0xff]  ;;  %v5142_v31 = vld [vmem:[#allocation7 + $0x28] sm:$0xff] }
 0x508   :  { %v3021_v62 = vmul.f32 %v3019_v2, %v13058_v28  ;;  %v3022_v30 = vmul.f32 %v3019_v2, %v13059_v29  ;;  %v3024_v32 = vmul.f32 %v3019_v2, %v13067_v63  ;;  %v3023_v7 = vmul.f32 %v3019_v2, %v13070_v13 }
 0x50a   :  { %v3025_v24 = vadd.f32 %v3021_v62, %v3013_v57  ;;  %v3026_v6 = vadd.f32 %v3022_v30, %v3014_v34  ;;  %v3028_v21 = vadd.f32 %v3024_v32, %v3016_v8  ;;  %v3027_v27 = vadd.f32 %v3023_v7, %v3015_v15  ;;  %v13072_v30 = vld [vmem:[#allocation67_spill] sm:$0xff]  ;;  %v5141_v32 = vld [vmem:[#allocation7 + $0x20] sm:$0xff] }
 0x50b   :  { %v5160_v8 = vand.u32 4294901760, %v5139_v17 }
 0x50c   :  { %v3031_v43 = vpop.permute.xlu1 %3030 }
 0x50d   :  { %v3033_v10 = vmul.f32 %v3031_v43, %v13063_v3  ;;  %v3034_v53 = vmul.f32 %v3031_v43, %v13064_v5  ;;  %v3036_v9 = vmul.f32 %v3031_v43, %v13068_v33  ;;  %v3035_v19 = vmul.f32 %v3031_v43, %v13071_v38 }
 0x50e   :  { %v13074_v43 = vmov 2   ;;  %v11108_v7 = vsub.f32 %v5139_v17, %v5160_v8  ;;  %v5145_v17 = vld [vmem:[#allocation7 + $0x40] sm:$0xff] }
 0x50f   :  { %v3037_v44 = vadd.f32 %v3033_v10, %v3025_v24  ;;  %v3038_v22 = vadd.f32 %v3034_v53, %v3026_v6  ;;  %v3040_v54 = vadd.f32 %v3036_v9, %v3028_v21  ;;  %v3039_v61 = vadd.f32 %v3035_v19, %v3027_v27  ;;  %v5137_v10 = vld [vmem:[#allocation7] sm:$0xff]  ;;  %v5138_v53 = vld [vmem:[#allocation7 + $0x8] sm:$0xff]  ;;  %v5144_v19 = vld [vmem:[#allocation7 + $0x38] sm:$0xff] }
 0x510   :  { %v13075_v24 = vmov 3   ;;  %v13076_v6 = vmov 0   ;;  %v5154_v25 = vand.u32 4294901760, %v5137_v10  ;;  %v5169_v9 = vand.u32 4294901760, %v5142_v31 }
 0x511   :  { %v6463_v51 = vmul.f32 -1.442695, %v3037_v44  ;;  %v6464_v56 = vmul.f32 -1.442695, %v3038_v22  ;;  %v6465_v35 = vmul.f32 -1.442695, %v3040_v54 }
 0x512   :  { %v5157_v44 = vand.u32 4294901760, %v5138_v53  ;;  %v5140_v22 = vld [vmem:[#allocation7 + $0x18] sm:$0xff]  ;;  %v11104_v21 = vsub.f32 %v5137_v10, %v5154_v25  ;;  %v5143_v54 = vld [vmem:[#allocation7 + $0x30] sm:$0xff] }
 0x513   :  { %8489 = vpow2.f32 %v6463_v51  ;;  %v5163_v51 = vand.u32 4294901760, %v5140_v22 }
 0x514   :  { %8491 = vpow2.f32 %v6464_v56  ;;  %v5166_v56 = vand.u32 4294901760, %v5141_v32  ;;  %v11102_v60 = vpack.c.bf16 %v5157_v44, %v5154_v25  ;;  %v11106_v15 = vsub.f32 %v5138_v53, %v5157_v44  ;;  %v5146_v25 = vld [vmem:[#allocation7 + $0x48] sm:$0xff] }
 0x515   :  { %8493 = vpow2.f32 %v6465_v35  ;;  %v11110_v27 = vpack.c.bf16 %v5163_v51, %v5160_v8  ;;  %v11112_v35 = vsub.f32 %v5140_v22, %v5163_v51 }
 0x516   :  { %8495 = vtanh.f32 %v3039_v61  ;;  %v11114_v61 = vpack.c.bf16 %v5169_v9, %v5166_v56  ;;  %7872 = vmatpush3.bf16.msra.mxu0 %v11102_v60 }
 0x517   :  { %13077 = vst [vmem:[#allocation98_spill] sm:$0xff] %v11110_v27  ;;  %7873 = vmatprep.subr.bf16.mxu0 %v12362_v23 }
 0x518   :  { %13078 = vst [vmem:[#allocation102_spill] sm:$0xff] %v11114_v61 }
 0x51a   :  { %7875 = vmatpush3.bf16.msra.mxu0 %v11110_v27 }
 0x51b   :  { %7876 = vmatprep.subr.bf16.mxu0 %v12362_v23 }
 0x51d   :  { %v8490_v52 = vpop.eup %8489 }
 0x51e   :  { %v8492_v58 = vpop.eup %8491  ;;  %v3044_v42 = vadd.f32 1.0, %v8490_v52  ;;  %v11116_v52 = vsub.f32 %v5141_v32, %v5166_v56  ;;  %7878 = vmatpush3.bf16.msra.mxu0 %v11114_v61 }
 0x51f   :  { %v3050_v50 = vadd.f32 1.0, %v8492_v58  ;;  %v8494_v0 = vpop.eup %8493  ;;  %v12360_v58 = vand.u32 4294901760, %v11104_v21  ;;  %7879 = vmatprep.subr.bf16.mxu0 %v12362_v23 }
 0x520   :  { %8497 = vrcp.f32 %v3044_v42  ;;  %v8496_v55 = vpop.eup %8495  ;;  %v3057_v62 = vadd.f32 1.0, %v8494_v0  ;;  %v12358_v42 = vand.u32 4294901760, %v11106_v15  ;;  %v11122_v0 = vsub.f32 %v5142_v31, %v5169_v9  ;;  %v5147_v31 = vld [vmem:[#allocation7 + $0x50] sm:$0xff] }
 0x521   :  { %8499 = vrcp.f32 %v3050_v50  ;;  %v12356_v50 = vand.u32 4294901760, %v11108_v7 }
 0x522   :  { %8501 = vrcp.f32 %v3057_v62  ;;  %v5175_v62 = vand.u32 4294901760, %v5144_v19 }
 0x524   :  { %v11152_v9 = vsub.f32 %v5144_v19, %v5175_v62 }
 0x52a   :  { %v8498_v57 = vpop.eup %8497 }
 0x52b   :  { %v8500_v34 = vpop.eup %8499  ;;  %v3061_v2 = vmul.f32 %v8498_v57, %v8496_v55  ;;  %v12355_v55 = vand.u32 4294901760, %v11112_v35  ;;  %v12354_v57 = vand.u32 4294901760, %v11116_v52 }
 0x52c   :  { %v3060_v45 = vmul.f32 %v8500_v34, %v13072_v30  ;;  %v8502_v26 = vpop.eup %8501  ;;  %v5172_v34 = vand.u32 4294901760, %v5143_v54  ;;  %v5255_v30 = vsub.f32 %v11106_v15, %v12358_v42  ;;  %v5149_v42 = vld [vmem:[#allocation7 + $0x60] sm:$0xff] }
 0x52e   :  { %v11088_v12 = vadd.f32 %v3061_v2, %v3060_v45  ;;  %v5248_v2 = vsub.f32 %v11104_v21, %v12360_v58  ;;  %v5262_v45 = vsub.f32 %v11108_v7, %v12356_v50  ;;  %v11143_v10 = vpack.c.bf16 %v5175_v62, %v5172_v34 }
 0x52f   :  { %v11145_v53 = vsub.f32 %v5143_v54, %v5172_v34  ;;  %v5256_v22 = vand.u32 4294901760, %v5255_v30  ;;  %v5148_v34 = vld [vmem:[#allocation7 + $0x58] sm:$0xff]  ;;  %v5178_v30 = vand.u32 4294901760, %v5145_v17 }
 0x530   :  { %13073 = vst [vmem:[#allocation81_spill] sm:$0xff] %v11088_v12  ;;  %8503 = vtanh.f32 %v11088_v12  ;;  %13079 = vst [vmem:[#allocation103_spill] sm:$0xff] %v11143_v10  ;;  %v5249_v44 = vand.u32 4294901760, %v5248_v2  ;;  %v5263_v8 = vand.u32 4294901760, %v5262_v45  ;;  %7881 = vmatpush3.bf16.msra.mxu0 %v11143_v10 }
 0x531   :  { %v12359_v54 = vand.u32 4294901760, %v11145_v53 }
 0x533   :  { %v5290_v45 = vsub.f32 %v11145_v53, %v12359_v54  ;;  %v5152_v54 = vld [vmem:[#allocation7 + $0x78] sm:$0xff] }
 0x53a   :  { %v8504_v14 = vpop.eup %8503 }
 0x53b   :  { %v3064_v36 = vmul.f32 %v8504_v14, %v8502_v26  ;;  %v12357_v26 = vand.u32 4294901760, %v11122_v0  ;;  %v5269_v14 = vsub.f32 %v11112_v35, %v12355_v55  ;;  %v5181_v55 = vand.u32 4294901760, %v5146_v25 }
 0x53d   :  { %3079 = vperm.xlu1 %8410, %v3064_v36   ;;  %3067 = vperm.xlu0 %8409, %v3064_v36   ;;  %v5283_v32 = vsub.f32 %v11122_v0, %v12357_v26  ;;  %v5270_v51 = vand.u32 4294901760, %v5269_v14  ;;  %v12364_v26 = vand.u32 4294901760, %v11152_v9  ;;  %v5184_v14 = vand.u32 4294901760, %v5147_v31 }
 0x53e   :  { %v11160_v62 = vpack.c.bf16 %v5181_v55, %v5178_v30 }
 0x53f   :  { %v5284_v2 = vand.u32 4294901760, %v5283_v32  ;;  %v7898_v50 = vpack.c.bf16 %v5270_v51, %v5263_v8  ;;  %v5297_v8 = vsub.f32 %v11152_v9, %v12364_v26  ;;  %v11169_v32 = vsub.f32 %v5146_v25, %v5181_v55  ;;  %v5151_v51 = vld [vmem:[#allocation7 + $0x70] sm:$0xff]  ;;  %v11193_v26 = vld [vmem:[%s11843_s5] sm:$0xf] }
 0x540   :  { %13080 = vst [vmem:[#allocation108_spill] sm:$0xff] %v11160_v62 }
 0x541   :  { %8411 = vset.pattern.permute.xlu1 %v13074_v43  ;;  %8412 = vset.pattern.permute.xlu0 %v13075_v24  ;;  %v5298_v58 = vand.u32 4294901760, %v5297_v8 }
 0x542   :  { %3091 = vperm.xlu1 %8411, %v3064_v36   ;;  %3103 = vperm.xlu0 %8412, %v3064_v36  }
 0x546   :  { %8413 = vset.pattern.permute.xlu1 %v12985_v59  ;;  %8415 = vset.pattern.permute.xlu0 %v12956_v48  ;;  %v12368_v48 = vand.u32 4294901760, %v11169_v32 }
 0x547   :  { %3115 = vperm.xlu1 %8413, %v3064_v36   ;;  %v5276_v36 = vsub.f32 %v11116_v52, %v12354_v57  ;;  %v7895_v57 = vpack.c.bf16 %v5256_v22, %v5249_v44  ;;  %v5187_v44 = vand.u32 4294901760, %v5148_v34  ;;  %v5150_v22 = vld [vmem:[#allocation7 + $0x68] sm:$0xff] }
 0x548   :  { %v5311_v8 = vsub.f32 %v11169_v32, %v12368_v48 }
 0x549   :  { %v5277_v56 = vand.u32 4294901760, %v5276_v36  ;;  %7896 = vmatpush3.bf16.msra.mxu1 %v7895_v57  ;;  %v11162_v36 = vsub.f32 %v5145_v17, %v5178_v30  ;;  %v11171_v57 = vsub.f32 %v5147_v31, %v5184_v14  ;;  %v11174_v17 = vsub.f32 %v5148_v34, %v5187_v44 }
 0x54a   :  { %7897 = vmatprep.subr.bf16.mxu1 %v12362_v23  ;;  %v5190_v30 = vand.u32 4294901760, %v5149_v42  ;;  %v5196_v34 = vand.u32 4294901760, %v5151_v51  ;;  %v11201_v12 = vpack.c.bf16 %v5187_v44, %v5184_v14  ;;  %v5312_v10 = vand.u32 4294901760, %v5311_v8 }
 0x54b   :  { %8414 = vset.pattern.permute.xlu1 %v13076_v6  ;;  %v7901_v19 = vpack.c.bf16 %v5284_v2, %v5277_v56  ;;  %v5291_v56 = vand.u32 4294901760, %v5290_v45  ;;  %v12365_v2 = vand.u32 4294901760, %v11162_v36  ;;  %v12376_v23 = vand.u32 4294901760, %v11171_v57 }
 0x54c   :  { %v5193_v6 = vand.u32 4294901760, %v5150_v22  ;;  %v5324_v25 = vand.u32 4294901760, %v11174_v17  ;;  %v11183_v31 = vsub.f32 %v5149_v42, %v5190_v30  ;;  %v13082_v45 = vmov 0.0|0.0   ;;  %13083 = vst [vmem:[#allocation115_spill] sm:$0xff] %v11201_v12 }
 0x54d   :  { %7899 = vmatpush3.bf16.msra.mxu1 %v7898_v50  ;;  %v5304_v55 = vsub.f32 %v11162_v36, %v12365_v2  ;;  %7882 = vmatprep.subr.bf16.mxu0 %v13082_v45  ;;  %v5199_v50 = vand.u32 4294901760, %v5152_v54  ;;  %v5318_v42 = vsub.f32 %v11171_v57, %v12376_v23  ;;  %v7904_v43 = vpack.c.bf16 %v5298_v58, %v5291_v56  ;;  %v13085_v23 = vld [vmem:[#allocation42_spill] sm:$0xff] }
 0x54e   :  { %13081 = vst [vmem:[#allocation110_spill] sm:$0xff] %v11183_v31  ;;  %7900 = vmatprep.subr.bf16.mxu1 %v13082_v45  ;;  %v5325_v2 = vsub.f32 %v11174_v17, %v5324_v25  ;;  %v11199_v24 = vsub.f32 %v5150_v22, %v5193_v6  ;;  %v5331_v48 = vand.u32 4294901760, %v11183_v31  ;;  %7884 = vmatpush3.bf16.msra.mxu0 %v11160_v62 }
 0x54f   :  { %v5305_v59 = vand.u32 4294901760, %v5304_v55  ;;  %v11206_v27 = vsub.f32 %v5151_v51, %v5196_v34  ;;  %v11208_v20 = vsub.f32 %v5152_v54, %v5199_v50  ;;  %v3389_v22 = vrot.slane %v11193_v26, %v13085_v23  ;;  %7885 = vmatprep.subr.bf16.mxu0 %v13082_v45 }
 0x550   :  { %v5338_v61 = vand.u32 4294901760, %v11199_v24  ;;  %v11214_v58 = vpack.c.bf16 %v5193_v6, %v5190_v30  ;;  %v5326_v44 = vand.u32 4294901760, %v5325_v2  ;;  %v5332_v56 = vsub.f32 %v11183_v31, %v5331_v48 }
 0x551   :  { %7902 = vmatpush3.bf16.msra.mxu1 %v7901_v19  ;;  %13084 = vst [vmem:[#allocation116_spill] sm:$0xff] %v11206_v27  ;;  %v5319_v19 = vand.u32 4294901760, %v5318_v42  ;;  %v5345_v51 = vand.u32 4294901760, %v11206_v27  ;;  %v11220_v54 = vpack.c.bf16 %v5199_v50, %v5196_v34  ;;  %v7907_v30 = vpack.c.bf16 %v5312_v10, %v5305_v59 }
 0x552   :  { %7903 = vmatprep.subr.bf16.mxu1 %v13082_v45  ;;  %7887 = vmatpush3.bf16.msra.mxu0 %v11201_v12  ;;  %v5339_v2 = vsub.f32 %v11199_v24, %v5338_v61  ;;  %v5352_v8 = vand.u32 4294901760, %v11208_v20  ;;  %v5333_v6 = vand.u32 4294901760, %v5332_v56  ;;  %v13086_v34 = vand.u32 4294901760, %v11104_v21 }
 0x553   :  { %7888 = vmatprep.subr.bf16.mxu0 %v13082_v45  ;;  %v7910_v42 = vpack.c.bf16 %v5326_v44, %v5319_v19  ;;  %v5346_v55 = vsub.f32 %v11206_v27, %v5345_v51  ;;  %v13087_v23 = vand.u32 4294901760, %v11106_v15  ;;  %v13088_v50 = vand.u32 4294901760, %v11108_v7 }
 0x554   :  { %v13090_v59 = vand.u32 4294901760, %v11116_v52  ;;  %v13091_v19 = vand.u32 4294901760, %v11122_v0  ;;  %v13092_v56 = vand.u32 4294901760, %v11145_v53  ;;  %v13093_v27 = vand.u32 4294901760, %v11152_v9 }
 0x555   :  { %7905 = vmatpush3.bf16.msra.mxu1 %v7904_v43  ;;  %v11246_v14 = vpack.c.bf16 %v13087_v23, %v13086_v34  ;;  %v13089_v43 = vand.u32 4294901760, %v11112_v35  ;;  %v13094_v34 = vand.u32 4294901760, %v11162_v36 }
 0x556   :  { %7906 = vmatprep.subr.bf16.mxu1 %v13082_v45  ;;  %v11258_v44 = vpack.c.bf16 %v13091_v19, %v13090_v59  ;;  %v11264_v23 = vpack.c.bf16 %v13093_v27, %v13092_v56  ;;  %7890 = vmatpush3.bf16.msra.mxu0 %v11214_v58  ;;  %v13096_v59 = vand.u32 4294901760, %v11171_v57  ;;  %v11280_v27 = vpack.c.bf16 %v5338_v61, %v5331_v48  ;;  %v13100_v61 = vld [vmem:[#allocation44_spill] sm:$0xff] }
 0x557   :  { %v11252_v31 = vpack.c.bf16 %v13089_v43, %v13088_v50  ;;  %v13095_v50 = vand.u32 4294901760, %v11169_v32  ;;  %7891 = vmatprep.subr.bf16.mxu0 %v13082_v45  ;;  %v5347_v56 = vand.u32 4294901760, %v5346_v55 }
 0x558   :  { %13098 = vst [vmem:[#allocation85_spill] sm:$0xff] %v11280_v27 }
 0x559   :  { %7908 = vmatpush3.bf16.msra.mxu1 %v7907_v30  ;;  %v11272_v43 = vpack.c.bf16 %v13095_v50, %v13094_v34  ;;  %v11282_v30 = vpack.c.bf16 %v5352_v8, %v5345_v51 }
 0x55a   :  { %7909 = vmatprep.subr.bf16.mxu1 %v13082_v45  ;;  %7893 = vmatpush3.bf16.msra.mxu0 %v11220_v54 }
 0x55b   :  { %13099 = vst [vmem:[#allocation27_spill] sm:$0xff] %v11282_v30  ;;  %7918 = vmatprep.subr.bf16.mxu0 %v13082_v45 }
 0x55d   :  { %7911 = vmatpush3.bf16.msra.mxu1 %v7910_v42 }
 0x55e   :  { %7912 = vmatprep.subr.bf16.mxu1 %v13082_v45 }
 0x59b   :  { %v4246_v10 = vpop.f32.mrb[16].mxu0 }
 0x59c   :  { %v8190_v12 = vadd.f32 %v4246_v10, %v3389_v22  ;;  %v4248_v62 = vpop.f32.mrb[17].mxu0  ;;  %v5353_v22 = vsub.f32 %v11208_v20, %v5352_v8  ;;  %v11276_v10 = vpack.c.bf16 %v5324_v25, %v13096_v59  ;;  %v3393_v25 = vrot.slane %v11193_v26, %v13100_v61 }
 0x59d   :  { %v5340_v62 = vand.u32 4294901760, %v5339_v2 }
 0x59e   :  { %13097 = vst [vmem:[#allocation66_spill] sm:$0xff] %v11276_v10  ;;  %v6475_v19 = vmul.f32 -1.442695, %v8190_v12  ;;  %v5354_v34 = vand.u32 4294901760, %v5353_v22 }
 0x59f   :  { %v7913_v2 = vpack.c.bf16 %v5340_v62, %v5333_v6  ;;  %v13101_v6 = vld [vmem:[#allocation46_spill] sm:$0xff] }
 0x5a0   :  { %8505 = vpow2.f32 %v6475_v19  ;;  %v7916_v12 = vpack.c.bf16 %v5354_v34, %v5347_v56  ;;  %v3397_v55 = vrot.slane %v11193_v26, %v13101_v6  ;;  %v13103_v6 = vld [vmem:[#allocation37_spill] sm:$0xff] }
 0x5a1   :  { %7914 = vmatpush3.bf16.msra.mxu1 %v7913_v2 }
 0x5a2   :  { %7915 = vmatprep.subr.bf16.mxu1 %v13082_v45 }
 0x5a5   :  { %7917 = vmatpush3.bf16.msra.mxu1 %v7916_v12 }
 0x5a6   :  { %7942 = vmatprep.subr.bf16.mxu1 %v13082_v45 }
 0x5aa   :  { %v8506_v48 = vpop.eup %8505 }
 0x5ab   :  { %v5108_v51 = vadd.f32 1.0, %v8506_v48 }
 0x5ad   :  { %8507 = vrcp.f32 %v5108_v51 }
 0x5b0   :  { %v5100_v8 = vpop.f32.mrb[16].mxu1 }
 0x5b1   :  { %v8191_v42 = vadd.f32 %v5100_v8, %v3393_v25  ;;  %v5102_v62 = vpop.f32.mrb[17].mxu1  ;;  %v13102_v25 = vld [vmem:[#allocation38_spill] sm:$0xff]  ;;  %v13104_v8 = vld [vmem:[#allocation39_spill] sm:$0xff] }
 0x5b2   :  { %v8192_v22 = vadd.f32 %v5102_v62, %v3397_v55 }
 0x5b3   :  { %8509 = vtanh.f32 %v8191_v42 }
 0x5b4   :  { %v6476_v50 = vmul.f32 -1.442695, %v8192_v22 }
 0x5b6   :  { %8511 = vpow2.f32 %v6476_v50 }
 0x5b7   :  { %v8508_v2 = vpop.eup %8507 }
 0x5bc   :  { %v3080_v59 = vpop.permute.xlu1 %3079  ;;  %v3068_v19 = vpop.permute.xlu0 %3067 }
 0x5bd   :  { %v3070_v56 = vmul.f32 %v3068_v19, %v13048_v49  ;;  %v3071_v34 = vmul.f32 %v3068_v19, %v13049_v46  ;;  %v3073_v12 = vmul.f32 %v3068_v19, %v13054_v1  ;;  %v8510_v48 = vpop.eup %8509  ;;  %v3082_v26 = vmul.f32 %v3080_v59, %v13052_v40 }
 0x5be   :  { %v3083_v61 = vmul.f32 %v3080_v59, %v13053_v11  ;;  %v5118_v22 = vmul.f32 %v8510_v48, %v8508_v2  ;;  %v3085_v50 = vmul.f32 %v3080_v59, %v13057_v37  ;;  %v3072_v49 = vmul.f32 %v3068_v19, %v13061_v41  ;;  %v13105_v48 = vld [vmem:[#allocation91_spill] sm:$0xff] }
 0x5bf   :  { %v3074_v51 = vadd.f32 %v13102_v25, %v3070_v56  ;;  %v3075_v55 = vadd.f32 %v13103_v6, %v3071_v34  ;;  %v3077_v42 = vadd.f32 %v13104_v8, %v3073_v12 }
 0x5c0   :  { %v8512_v27 = vpop.eup %8511  ;;  %v3076_v6 = vadd.f32 %v13105_v48, %v3072_v49  ;;  %8513 = vtanh.f32 %v5118_v22 }
 0x5c1   :  { %v3092_v62 = vpop.permute.xlu1 %3091  ;;  %v3086_v46 = vadd.f32 %v3082_v26, %v3074_v51  ;;  %v3087_v30 = vadd.f32 %v3083_v61, %v3075_v55  ;;  %v3104_v1 = vpop.permute.xlu0 %3103  ;;  %v3089_v10 = vadd.f32 %v3085_v50, %v3077_v42  ;;  %v5115_v26 = vadd.f32 1.0, %v8512_v27 }
 0x5c2   :  { %v3094_v40 = vmul.f32 %v3092_v62, %v13055_v18  ;;  %v3095_v11 = vmul.f32 %v3092_v62, %v13056_v39  ;;  %v3097_v56 = vmul.f32 %v3092_v62, %v13065_v4  ;;  %v3106_v12 = vmul.f32 %v3104_v1, %v13058_v28 }
 0x5c3   :  { %v3107_v2 = vmul.f32 %v3104_v1, %v13059_v29  ;;  %v3084_v55 = vmul.f32 %v3080_v59, %v13062_v16  ;;  %8515 = vrcp.f32 %v5115_v26  ;;  %v3109_v49 = vmul.f32 %v3104_v1, %v13067_v63 }
 0x5c4   :  { %v3098_v34 = vadd.f32 %v3094_v40, %v3086_v46  ;;  %v3099_v25 = vadd.f32 %v3095_v11, %v3087_v30  ;;  %v3101_v50 = vadd.f32 %v3097_v56, %v3089_v10  ;;  %v3096_v40 = vmul.f32 %v3092_v62, %v13069_v47 }
 0x5c5   :  { %v3088_v46 = vadd.f32 %v3084_v55, %v3076_v6  ;;  %v3108_v59 = vmul.f32 %v3104_v1, %v13070_v13  ;;  %v13106_v1 = vmov 0.0  }
 0x5c6   :  { %v3116_v19 = vpop.permute.xlu1 %3115  ;;  %v3110_v61 = vadd.f32 %v3106_v12, %v3098_v34  ;;  %v3111_v51 = vadd.f32 %v3107_v2, %v3099_v25  ;;  %v3113_v34 = vadd.f32 %v3109_v49, %v3101_v50  ;;  %v13108_v49 = vpack.c.bf16 %v11106_v15, %v11104_v21 }
 0x5c7   :  { %v3118_v8 = vmul.f32 %v3116_v19, %v13063_v3  ;;  %v3119_v42 = vmul.f32 %v3116_v19, %v13064_v5  ;;  %v3121_v22 = vmul.f32 %v3116_v19, %v13068_v33  ;;  %v3100_v25 = vadd.f32 %v3096_v40, %v3088_v46 }
 0x5c8   :  { %v3120_v2 = vmul.f32 %v3116_v19, %v13071_v38 }
 0x5c9   :  { %v3122_v11 = vadd.f32 %v3118_v8, %v3110_v61  ;;  %v3123_v30 = vadd.f32 %v3119_v42, %v3111_v51  ;;  %v3125_v10 = vadd.f32 %v3121_v22, %v3113_v34  ;;  %v3112_v56 = vadd.f32 %v3108_v59, %v3100_v25  ;;  %v13111_v59 = vld [vmem:[#allocation103_spill] sm:$0xff] }
 0x5ca   :  { %v8514_v12 = vpop.eup %8513  ;;  %v13110_v25 = vpack.c.bf16 %v11112_v35, %v11108_v7  ;;  %v13115_v7 = vpack.c.bf16 %v11152_v9, %v11145_v53  ;;  %v13116_v35 = vld [vmem:[#allocation115_spill] sm:$0xff]  ;;  %v13118_v53 = vpack.c.bf16 %v11174_v17, %v11171_v57  ;;  %v13121_v57 = vmov 4  }
 0x5cb   :  { %v6466_v48 = vmul.f32 -1.442695, %v3122_v11  ;;  %v6467_v27 = vmul.f32 -1.442695, %v3123_v30  ;;  %v6468_v26 = vmul.f32 -1.442695, %v3125_v10  ;;  %v3124_v61 = vadd.f32 %v3120_v2, %v3112_v56 }
 0x5cc   :  { %v13107_v11 = vld [vmem:[#allocation98_spill] sm:$0xff]  ;;  %v13112_v10 = vld [vmem:[#allocation81_spill] sm:$0xff]  ;;  %v13122_v17 = vmov 2  }
 0x5cd   :  { %8517 = vpow2.f32 %v6466_v48  ;;  %v8516_v62 = vpop.eup %8515  ;;  %v13109_v48 = vld [vmem:[#allocation102_spill] sm:$0xff] }
 0x5ce   :  { %8519 = vpow2.f32 %v6467_v27  ;;  %v5120_v6 = vmul.f32 %v8516_v62, %v8514_v12  ;;  %v13113_v62 = vpack.c.bf16 %v11122_v0, %v11116_v52  ;;  %v13117_v52 = vpack.c.bf16 %v11169_v32, %v11162_v36  ;;  %v13119_v36 = vld [vmem:[#allocation110_spill] sm:$0xff] }
 0x5cf   :  { %8521 = vpow2.f32 %v6468_v26  ;;  %v13120_v32 = vpack.c.bf16 %v11199_v24, %v13119_v36 }
 0x5d0   :  { %v11317_v51 = vand.u32 4294901760, %v5120_v6  ;;  %8523 = vtanh.f32 %v3124_v61  ;;  %v13123_v61 = vld [vmem:[#allocation116_spill] sm:$0xff] }
 0x5d1   :  { %v13124_v24 = vpack.c.bf16 %v11208_v20, %v13123_v61  ;;  %v13126_v20 = vmov 0  }
 0x5d2   :  { %v11320_v8 = vsub.f32 %v5120_v6, %v11317_v51  ;;  %6750 = vmatmul.mubr.f32.vlgmr.msra.gmra.mrb[18].mxu1 %v11317_v51  ;;  %v13114_v6 = vld [vmem:[#allocation108_spill] sm:$0xff] }
 0x5d3   :  { %7944 = vmatpush3.bf16.msra.mxu1 %v11102_v60  ;;  %6819 = vmatprep.mubr.msk.f32.mxu1 %vm8674_vm0, %v13106_v1 }
 0x5d4   :  { %v5236_v46 = vand.u32 4294901760, %v11320_v8  ;;  %7945 = vmatprep.subr.bf16.mxu1 %v13082_v45 }
 0x5d6   :  { %v5237_v40 = vsub.f32 %v11320_v8, %v5236_v46 }
 0x5d7   :  { %v8518_v55 = vpop.eup %8517  ;;  %7947 = vmatpush3.bf16.msra.mxu1 %v13107_v11 }
 0x5d8   :  { %v8520_v42 = vpop.eup %8519  ;;  %v3129_v50 = vadd.f32 1.0, %v8518_v55  ;;  %v5238_v30 = vand.u32 4294901760, %v5237_v40  ;;  %7948 = vmatprep.subr.bf16.mxu1 %v13082_v45  ;;  %v13131_v55 = vld [vmem:[#allocation54_spill] sm:$0xff]  ;;  %v13134_v40 = vld [vmem:[#allocation43_spill] sm:$0xff] }
 0x5d9   :  { %v3135_v19 = vadd.f32 1.0, %v8520_v42  ;;  %v8522_v27 = vpop.eup %8521  ;;  %v13132_v42 = vld [vmem:[#allocation60_spill] sm:$0xff] }
 0x5da   :  { %8525 = vrcp.f32 %v3129_v50  ;;  %6715 = vmatmul.mubr.f32.vlgmr.msra.gmra.mrb[18].mxu0 %v5238_v30  ;;  %v8524_v34 = vpop.eup %8523  ;;  %v3142_v15 = vadd.f32 1.0, %v8522_v27  ;;  %v13135_v30 = vld [vmem:[#allocation48_spill] sm:$0xff] }
 0x5db   :  { %8527 = vrcp.f32 %v3135_v19  ;;  %7920 = vmatpush3.bf16.msra.mxu0 %v13108_v49  ;;  %7950 = vmatpush3.bf16.msra.mxu1 %v13109_v48  ;;  %v13133_v19 = vld [vmem:[#allocation40_spill] sm:$0xff] }
 0x5dc   :  { %7921 = vmatprep.subr.bf16.mxu0 %v13082_v45  ;;  %7951 = vmatprep.subr.bf16.mxu1 %v13082_v45  ;;  %8529 = vrcp.f32 %v3142_v15 }
 0x5dd   :  { %6784 = vmatprep.mubr.msk.f32.mxu0 %vm8674_vm0, %v13106_v1 }
 0x5df   :  { %7923 = vmatpush3.bf16.msra.mxu0 %v13110_v25  ;;  %7953 = vmatpush3.bf16.msra.mxu1 %v13111_v59 }
 0x5e0   :  { %7924 = vmatprep.subr.bf16.mxu0 %v13082_v45  ;;  %7954 = vmatprep.subr.bf16.mxu1 %v13082_v45 }
 0x5e3   :  { %7926 = vmatpush3.bf16.msra.mxu0 %v13113_v62  ;;  %7956 = vmatpush3.bf16.msra.mxu1 %v13114_v6 }
 0x5e4   :  { %v8526_v22 = vpop.eup %8525  ;;  %7927 = vmatprep.subr.bf16.mxu0 %v13082_v45  ;;  %7957 = vmatprep.subr.bf16.mxu1 %v13082_v45 }
 0x5e5   :  { %v8528_v21 = vpop.eup %8527  ;;  %v3146_v12 = vmul.f32 %v8526_v22, %v8524_v34 }
 0x5e6   :  { %v3145_v56 = vmul.f32 %v8528_v21, %v13112_v10  ;;  %v8530_v0 = vpop.eup %8529 }
 0x5e7   :  { %7929 = vmatpush3.bf16.msra.mxu0 %v13115_v7  ;;  %7959 = vmatpush3.bf16.msra.mxu1 %v13116_v35 }
 0x5e8   :  { %v11346_v2 = vadd.f32 %v3146_v12, %v3145_v56  ;;  %7930 = vmatprep.subr.bf16.mxu0 %v13082_v45  ;;  %7960 = vmatprep.subr.bf16.mxu1 %v13082_v45 }
 0x5ea   :  { %8531 = vtanh.f32 %v11346_v2 }
 0x5eb   :  { %7932 = vmatpush3.bf16.msra.mxu0 %v13117_v52  ;;  %7962 = vmatpush3.bf16.msra.mxu1 %v11214_v58 }
 0x5ec   :  { %7933 = vmatprep.subr.bf16.mxu0 %v13082_v45  ;;  %7963 = vmatprep.subr.bf16.mxu1 %v13082_v45 }
 0x5ef   :  { %7935 = vmatpush3.bf16.msra.mxu0 %v13118_v53  ;;  %7965 = vmatpush3.bf16.msra.mxu1 %v11220_v54 }
 0x5f0   :  { %7936 = vmatprep.subr.bf16.mxu0 %v13082_v45  ;;  %7990 = vmatprep.subr.bf16.mxu1 %v13082_v45 }
 0x5f2   :  { %6820 = vmatmul.mubr.f32.vlgmr.msra.gmra.mrb[20].mxu1 %v5236_v46 }
 0x5f3   :  { %7938 = vmatpush3.bf16.msra.mxu0 %v13120_v32  ;;  %7992 = vmatpush3.bf16.msra.mxu1 %v11102_v60  ;;  %v13125_v60 = vmov 3  }
 0x5f4   :  { %v8532_v26 = vpop.eup %8531  ;;  %7939 = vmatprep.subr.bf16.mxu0 %v13082_v45  ;;  %7993 = vmatprep.subr.bf16.mxu1 %v13082_v45 }
 0x5f5   :  { %v3149_v9 = vmul.f32 %v8532_v26, %v8530_v0  ;;  %6889 = vmatprep.mubr.msk.f32.mxu1 %vm8674_vm0, %v13106_v1  ;;  %v13138_v0 = vld [vmem:[#allocation41_spill] sm:$0xff] }
 0x5f7   :  { %3164 = vperm.xlu0 %8415, %v3149_v9   ;;  %3152 = vperm.xlu1 %8414, %v3149_v9  }
 0x5f8   :  { %7941 = vmatpush3.bf16.msra.mxu0 %v13124_v24  ;;  %7995 = vmatpush3.bf16.msra.mxu1 %v13107_v11 }
 0x5f9   :  { %7966 = vmatprep.subr.bf16.mxu0 %v13082_v45  ;;  %7996 = vmatprep.subr.bf16.mxu1 %v13082_v45 }
 0x5fb   :  { %8418 = vset.pattern.permute.xlu0 %v13121_v57  ;;  %8416 = vset.pattern.permute.xlu1 %v13122_v17 }
 0x5fc   :  { %3200 = vperm.xlu0 %8418, %v3149_v9   ;;  %3176 = vperm.xlu1 %8416, %v3149_v9  }
 0x5fd   :  { %6785 = vmatmul.mubr.f32.vlgmr.msra.gmra.mrb[20].mxu0 %v11320_v8  ;;  %7998 = vmatpush3.bf16.msra.mxu1 %v13109_v48  ;;  %v13136_v48 = vld [vmem:[#allocation58_spill] sm:$0xff] }
 0x5fe   :  { %7968 = vmatpush3.bf16.msra.mxu0 %v11246_v14  ;;  %7999 = vmatprep.subr.bf16.mxu1 %v13082_v45  ;;  %v13128_v14 = vld [vmem:[#allocation85_spill] sm:$0xff] }
 0x5ff   :  { %7969 = vmatprep.subr.bf16.mxu0 %v13082_v45  ;;  %6854 = vmatprep.mubr.msk.f32.mxu0 %vm8674_vm0, %v13106_v1 }
 0x600   :  { %8417 = vset.pattern.permute.xlu1 %v13125_v60  ;;  %8421 = vset.pattern.permute.xlu0 %v13122_v17 }
 0x601   :  { %3188 = vperm.xlu1 %8417, %v3149_v9   ;;  %8001 = vmatpush3.bf16.msra.mxu1 %v13111_v59  ;;  %v13137_v59 = vld [vmem:[#allocation94_spill] sm:$0xff] }
 0x602   :  { %7971 = vmatpush3.bf16.msra.mxu0 %v11252_v31  ;;  %8002 = vmatprep.subr.bf16.mxu1 %v13082_v45  ;;  %v13127_v31 = vld [vmem:[#allocation66_spill] sm:$0xff] }
 0x603   :  { %7972 = vmatprep.subr.bf16.mxu0 %v13082_v45 }
 0x605   :  { %8419 = vset.pattern.permute.xlu1 %v13126_v20  ;;  %8004 = vmatpush3.bf16.msra.mxu1 %v13114_v6 }
 0x606   :  { %7974 = vmatpush3.bf16.msra.mxu0 %v11258_v44  ;;  %8005 = vmatprep.subr.bf16.mxu1 %v13082_v45 }
 0x607   :  { %7975 = vmatprep.subr.bf16.mxu0 %v13082_v45 }
 0x609   :  { %8007 = vmatpush3.bf16.msra.mxu1 %v13116_v35 }
 0x60a   :  { %7977 = vmatpush3.bf16.msra.mxu0 %v11264_v23  ;;  %8008 = vmatprep.subr.bf16.mxu1 %v13082_v45  ;;  %v13130_v23 = vld [vmem:[#allocation45_spill] sm:$0xff] }
 0x60b   :  { %7978 = vmatprep.subr.bf16.mxu0 %v13082_v45 }
 0x60d   :  { %8010 = vmatpush3.bf16.msra.mxu1 %v11214_v58  ;;  %v13129_v58 = vld [vmem:[#allocation27_spill] sm:$0xff] }
 0x60e   :  { %7980 = vmatpush3.bf16.msra.mxu0 %v11272_v43  ;;  %8011 = vmatprep.subr.bf16.mxu1 %v13082_v45 }
 0x60f   :  { %7981 = vmatprep.subr.bf16.mxu0 %v13082_v45 }
 0x611   :  { %8013 = vmatpush3.bf16.msra.mxu1 %v11220_v54 }
 0x612   :  { %7983 = vmatpush3.bf16.msra.mxu0 %v13127_v31  ;;  %8038 = vmatprep.subr.bf16.mxu1 %v13082_v45 }
 0x613   :  { %7984 = vmatprep.subr.bf16.mxu0 %v13082_v45 }
 0x614   :  { %6890 = vmatmul.mubr.f32.vlgmr.msra.gmra.mrb[22].mxu1 %v11317_v51 }
 0x615   :  { %6959 = vmatprep.mubr.msk.f32.mxu1 %vm8674_vm0, %v13106_v1 }
 0x616   :  { %7986 = vmatpush3.bf16.msra.mxu0 %v13128_v14 }
 0x617   :  { %7987 = vmatprep.subr.bf16.mxu0 %v13082_v45 }
 0x61a   :  { %7989 = vmatpush3.bf16.msra.mxu0 %v13129_v58 }
 0x61b   :  { %8014 = vmatprep.subr.bf16.mxu0 %v13082_v45 }
 0x61d   :  { %6855 = vmatmul.mubr.f32.vlgmr.msra.gmra.mrb[22].mxu0 %v11317_v51 }
 0x61e   :  { %6924 = vmatprep.mubr.msk.f32.mxu0 %vm8674_vm0, %v13106_v1 }
 0x676   :  { %v3153_v54 = vpop.permute.xlu1 %3152  ;;  %v3165_v44 = vpop.permute.xlu0 %3164 }
 0x677   :  { %v3155_v43 = vmul.f32 %v3153_v54, %v13130_v23  ;;  %v3156_v8 = vmul.f32 %v3153_v54, %v13131_v55  ;;  %v3158_v50 = vmul.f32 %v3153_v54, %v13132_v42  ;;  %v3167_v49 = vmul.f32 %v3165_v44, %v13135_v30 }
 0x678   :  { %v3168_v27 = vmul.f32 %v3165_v44, %v13136_v48  ;;  %v3157_v25 = vmul.f32 %v3153_v54, %v13061_v41  ;;  %v3170_v10 = vmul.f32 %v3165_v44, %v13057_v37  ;;  %v3169_v20 = vmul.f32 %v3165_v44, %v13062_v16 }
 0x679   :  { %v3159_v46 = vadd.f32 %v13133_v19, %v3155_v43  ;;  %v3160_v11 = vadd.f32 %v13134_v40, %v3156_v8  ;;  %v3162_v21 = vadd.f32 %v13137_v59, %v3158_v50 }
 0x67a   :  { %v3161_v26 = vadd.f32 %v13138_v0, %v3157_v25 }
 0x67b   :  { %v3177_v51 = vpop.permute.xlu1 %3176  ;;  %v3171_v34 = vadd.f32 %v3167_v49, %v3159_v46  ;;  %v3172_v22 = vadd.f32 %v3168_v27, %v3160_v11  ;;  %v3201_v56 = vpop.permute.xlu0 %3200  ;;  %v3174_v53 = vadd.f32 %v3170_v10, %v3162_v21 }
 0x67c   :  { %v3179_v15 = vmul.f32 %v3177_v51, %v13055_v18  ;;  %v3180_v12 = vmul.f32 %v3177_v51, %v13056_v39  ;;  %v3182_v9 = vmul.f32 %v3177_v51, %v13065_v4  ;;  %v3203_v36 = vmul.f32 %v3201_v56, %v13063_v3 }
 0x67d   :  { %v3204_v32 = vmul.f32 %v3201_v56, %v13064_v5  ;;  %v3173_v54 = vadd.f32 %v3169_v20, %v3161_v26  ;;  %v3181_v43 = vmul.f32 %v3177_v51, %v13069_v47  ;;  %v3206_v40 = vmul.f32 %v3201_v56, %v13068_v33 }
 0x67e   :  { %v3183_v6 = vadd.f32 %v3179_v15, %v3171_v34  ;;  %v3184_v7 = vadd.f32 %v3180_v12, %v3172_v22  ;;  %v3186_v58 = vadd.f32 %v3182_v9, %v3174_v53  ;;  %v3205_v44 = vmul.f32 %v3201_v56, %v13071_v38 }
 0x67f   :  { %v3185_v11 = vadd.f32 %v3181_v43, %v3173_v54  ;;  %v13139_v53 = vmov 1  }
 0x680   :  { %v3189_v62 = vpop.permute.xlu1 %3188 }
 0x681   :  { %v3191_v35 = vmul.f32 %v3189_v62, %v13058_v28  ;;  %v3192_v52 = vmul.f32 %v3189_v62, %v13059_v29  ;;  %v3194_v24 = vmul.f32 %v3189_v62, %v13067_v63  ;;  %v3193_v46 = vmul.f32 %v3189_v62, %v13070_v13 }
 0x683   :  { %v3195_v17 = vadd.f32 %v3191_v35, %v3183_v6  ;;  %v3196_v61 = vadd.f32 %v3192_v52, %v3184_v7  ;;  %v3198_v19 = vadd.f32 %v3194_v24, %v3186_v58  ;;  %v3197_v27 = vadd.f32 %v3193_v46, %v3185_v11  ;;  %v5122_v24 = vld [vmem:[#allocation6 + $0x8] sm:$0xff] }
 0x685   :  { %v3207_v31 = vadd.f32 %v3203_v36, %v3195_v17  ;;  %v3208_v14 = vadd.f32 %v3204_v32, %v3196_v61  ;;  %v3210_v49 = vadd.f32 %v3206_v40, %v3198_v19  ;;  %v3209_v22 = vadd.f32 %v3205_v44, %v3197_v27  ;;  %v5121_v61 = vld [vmem:[#allocation6] sm:$0xff] }
 0x686   :  { %v5795_v20 = vand.u32 4294901760, %v5121_v61  ;;  %v11489_v44 = vld [vmem:[#allocation6 + $0x20] sm:$0xff] }
 0x687   :  { %v6469_v8 = vmul.f32 -1.442695, %v3207_v31  ;;  %v6470_v50 = vmul.f32 -1.442695, %v3208_v14  ;;  %v6471_v34 = vmul.f32 -1.442695, %v3210_v49 }
 0x688   :  { %v5798_v31 = vand.u32 4294901760, %v5122_v24  ;;  %v11461_v58 = vsub.f32 %v5121_v61, %v5795_v20 }
 0x689   :  { %8533 = vpow2.f32 %v6469_v8  ;;  %v11467_v8 = vld [vmem:[#allocation6 + $0x18] sm:$0xff] }
 0x68a   :  { %8535 = vpow2.f32 %v6470_v50  ;;  %v11463_v54 = vsub.f32 %v5122_v24, %v5798_v31  ;;  %v12395_v50 = vand.u32 4294901760, %v11461_v58  ;;  %v5804_v46 = vand.u32 4294901760, %v11467_v8 }
 0x68b   :  { %8537 = vpow2.f32 %v6471_v34  ;;  %v11491_v34 = vld [vmem:[#allocation6 + $0x28] sm:$0xff] }
 0x68c   :  { %8539 = vtanh.f32 %v3209_v22  ;;  %v12394_v19 = vand.u32 4294901760, %v11463_v54  ;;  %v5889_v40 = vsub.f32 %v11461_v58, %v12395_v50  ;;  %v11487_v27 = vsub.f32 %v11467_v8, %v5804_v46 }
 0x68e   :  { %v5896_v11 = vsub.f32 %v11463_v54, %v12394_v19  ;;  %v5890_v22 = vand.u32 4294901760, %v5889_v40 }
 0x693   :  { %v8534_v25 = vpop.eup %8533 }
 0x694   :  { %v8536_v59 = vpop.eup %8535  ;;  %v3214_v21 = vadd.f32 1.0, %v8534_v25  ;;  %v5897_v25 = vand.u32 4294901760, %v5896_v11 }
 0x695   :  { %v3220_v51 = vadd.f32 1.0, %v8536_v59  ;;  %v8538_v15 = vpop.eup %8537 }
 0x696   :  { %8541 = vrcp.f32 %v3214_v21  ;;  %v8540_v12 = vpop.eup %8539  ;;  %v3227_v6 = vadd.f32 1.0, %v8538_v15  ;;  %v12390_v21 = vand.u32 4294901760, %v11487_v27  ;;  %v5810_v15 = vand.u32 4294901760, %v11491_v34 }
 0x697   :  { %8543 = vrcp.f32 %v3220_v51  ;;  %v5807_v51 = vand.u32 4294901760, %v11489_v44 }
 0x698   :  { %8545 = vrcp.f32 %v3227_v6  ;;  %v5910_v6 = vsub.f32 %v11487_v27, %v12390_v21 }
 0x6a0   :  { %v8542_v10 = vpop.eup %8541 }
 0x6a1   :  { %v8544_v62 = vpop.eup %8543  ;;  %v3231_v7 = vmul.f32 %v8542_v10, %v8540_v12  ;;  %v8039_v10 = vpack.c.bf16 %v5897_v25, %v5890_v22  ;;  %v11540_v25 = vld [vmem:[#allocation6 + $0x40] sm:$0xff] }
 0x6a2   :  { %v3230_v35 = vmul.f32 %v8544_v62, %v11346_v2  ;;  %v8546_v56 = vpop.eup %8545 }
 0x6a3   :  { %8040 = vmatpush3.bf16.msra.mxu1 %v8039_v10 }
 0x6a4   :  { %v11454_v52 = vadd.f32 %v3231_v7, %v3230_v35  ;;  %8041 = vmatprep.subr.bf16.mxu1 %v13082_v45 }
 0x6a5   :  { %v5391_v2 = vpop.f32.mrb[18].mxu1 }
 0x6a6   :  { %8547 = vtanh.f32 %v11454_v52  ;;  %v6751_v17 = vpop.f32.mrb[19].mxu1 }
 0x6ad   :  { %v5240_v9 = vpop.f32.mrb[18].mxu0 }
 0x6ae   :  { %v5392_v36 = vadd.f32 %v5391_v2, %v5240_v9  ;;  %v6716_v32 = vpop.f32.mrb[19].mxu0  ;;  %v5911_v2 = vand.u32 4294901760, %v5910_v6  ;;  %v12397_v6 = vand.u32 4294901760, %v11540_v25 }
 0x6b0   :  { %v8548_v0 = vpop.eup %8547 }
 0x6b1   :  { %v3234_v26 = vmul.f32 %v8548_v0, %v8546_v56  ;;  %v11506_v56 = vsub.f32 %v11489_v44, %v5807_v51  ;;  %v11511_v0 = vsub.f32 %v11491_v34, %v5810_v15 }
 0x6b3   :  { %3261 = vperm.xlu0 %8421, %v3234_v26   ;;  %3237 = vperm.xlu1 %8419, %v3234_v26   ;;  %v12389_v61 = vand.u32 4294901760, %v11506_v56  ;;  %v12388_v24 = vand.u32 4294901760, %v11511_v0 }
 0x6b5   :  { %v5924_v22 = vsub.f32 %v11511_v0, %v12388_v24 }
 0x6b7   :  { %8420 = vset.pattern.permute.xlu1 %v13139_v53  ;;  %8424 = vset.pattern.permute.xlu0 %v13121_v57  ;;  %v11515_v53 = vld [vmem:[#allocation6 + $0x38] sm:$0xff] }
 0x6b8   :  { %3249 = vperm.xlu1 %8420, %v3234_v26   ;;  %v12400_v32 = vand.u32 4294901760, %v11515_v53  ;;  %v13142_v34 = vand.u32 4294901760, %v11515_v53 }
 0x6ba   :  { %v11532_v11 = vsub.f32 %v11515_v53, %v12400_v32  ;;  %v5135_v32 = vld [vmem:[#allocation6 + $0x70] sm:$0xff] }
 0x6bc   :  { %8422 = vset.pattern.permute.xlu1 %v13125_v60  ;;  %v11465_v60 = vld [vmem:[#allocation6 + $0x10] sm:$0xff] }
 0x6bd   :  { %3273 = vperm.xlu1 %8422, %v3234_v26  }
 0x6c1   :  { %8423 = vset.pattern.permute.xlu1 %v13121_v57  ;;  %v5801_v57 = vand.u32 4294901760, %v11465_v60 }
 0x6c2   :  { %3285 = vperm.xlu1 %8423, %v3234_v26   ;;  %v11513_v26 = vld [vmem:[#allocation6 + $0x30] sm:$0xff] }
 0x6c3   :  { %v11482_v49 = vsub.f32 %v11465_v60, %v5801_v57  ;;  %v11582_v19 = vpack.c.bf16 %v5804_v46, %v5801_v57  ;;  %v5133_v60 = vld [vmem:[#allocation6 + $0x60] sm:$0xff]  ;;  %v13141_v44 = vand.u32 4294901760, %v11513_v26 }
 0x6c4   :  { %v5831_v46 = vand.u32 4294901760, %v5133_v60 }
 0x6c5   :  { %v5584_v14 = vpop.f32.mrb[20].mxu1  ;;  %v12393_v59 = vand.u32 4294901760, %v11482_v49 }
 0x6c6   :  { %v6821_v43 = vpop.f32.mrb[21].mxu1 }
 0x6c7   :  { %v5903_v62 = vsub.f32 %v11482_v49, %v12393_v59 }
 0x6c9   :  { %v5904_v9 = vand.u32 4294901760, %v5903_v62  ;;  %v12392_v62 = vand.u32 4294901760, %v11532_v11 }
 0x6cb   :  { %v8042_v43 = vpack.c.bf16 %v5911_v2, %v5904_v9  ;;  %v5925_v9 = vand.u32 4294901760, %v5924_v22  ;;  %v11549_v2 = vpack.c.bf16 %v5798_v31, %v5795_v20  ;;  %v11567_v20 = vld [vmem:[#allocation6 + $0x50] sm:$0xff]  ;;  %v11569_v31 = vld [vmem:[#allocation6 + $0x58] sm:$0xff] }
 0x6cc   :  { %v5825_v59 = vand.u32 4294901760, %v11567_v20 }
 0x6cd   :  { %8043 = vmatpush3.bf16.msra.mxu1 %v8042_v43  ;;  %v5938_v43 = vsub.f32 %v11532_v11, %v12392_v62  ;;  %8016 = vmatpush3.bf16.msra.mxu0 %v11549_v2 }
 0x6ce   :  { %8044 = vmatprep.subr.bf16.mxu1 %v13082_v45  ;;  %8017 = vmatprep.subr.bf16.mxu0 %v13082_v45 }
 0x6d0   :  { %v5495_v12 = vpop.f32.mrb[20].mxu0 }
 0x6d1   :  { %v5496_v7 = vadd.f32 %v5495_v12, %v5392_v36  ;;  %v6786_v35 = vpop.f32.mrb[21].mxu0  ;;  %v12401_v36 = vand.u32 4294901760, %v11513_v26  ;;  %v11542_v12 = vld [vmem:[#allocation6 + $0x48] sm:$0xff]  ;;  %8019 = vmatpush3.bf16.msra.mxu0 %v11582_v19 }
 0x6d2   :  { %8020 = vmatprep.subr.bf16.mxu0 %v13082_v45 }
 0x6d3   :  { %v11519_v17 = vadd.f32 %v5584_v14, %v5496_v7  ;;  %v11527_v40 = vsub.f32 %v11513_v26, %v12401_v36  ;;  %v5917_v14 = vsub.f32 %v11506_v56, %v12389_v61  ;;  %v12396_v7 = vand.u32 4294901760, %v11542_v12  ;;  %v5136_v36 = vld [vmem:[#allocation6 + $0x78] sm:$0xff] }
 0x6d4   :  { %v11560_v61 = vsub.f32 %v11540_v25, %v12397_v6  ;;  %v5134_v6 = vld [vmem:[#allocation6 + $0x68] sm:$0xff] }
 0x6d5   :  { %v12391_v10 = vand.u32 4294901760, %v11527_v40  ;;  %v5918_v35 = vand.u32 4294901760, %v5917_v14  ;;  %v11565_v14 = vsub.f32 %v11542_v12, %v12396_v7 }
 0x6d6   :  { %v12399_v62 = vand.u32 4294901760, %v11560_v61 }
 0x6d7   :  { %v5931_v24 = vsub.f32 %v11527_v40, %v12391_v10  ;;  %v8045_v21 = vpack.c.bf16 %v5925_v9, %v5918_v35  ;;  %v5939_v10 = vand.u32 4294901760, %v5938_v43  ;;  %v12398_v35 = vand.u32 4294901760, %v11565_v14 }
 0x6d8   :  { %v5828_v9 = vand.u32 4294901760, %v11569_v31  ;;  %v5945_v43 = vsub.f32 %v11560_v61, %v12399_v62 }
 0x6d9   :  { %v5932_v22 = vand.u32 4294901760, %v5931_v24  ;;  %8046 = vmatpush3.bf16.msra.mxu1 %v8045_v21  ;;  %v11588_v21 = vsub.f32 %v11567_v20, %v5825_v59  ;;  %v5952_v50 = vsub.f32 %v11565_v14, %v12398_v35  ;;  %v11610_v35 = vsub.f32 %v5133_v60, %v5831_v46 }
 0x6da   :  { %8047 = vmatprep.subr.bf16.mxu1 %v13082_v45  ;;  %v11594_v7 = vsub.f32 %v11569_v31, %v5828_v9  ;;  %v5946_v8 = vand.u32 4294901760, %v5945_v43  ;;  %v11605_v31 = vpack.c.bf16 %v5810_v15, %v5807_v51  ;;  %v11622_v51 = vpack.c.bf16 %v13142_v34, %v13141_v44 }
 0x6db   :  { %v8048_v24 = vpack.c.bf16 %v5939_v10, %v5932_v22  ;;  %v12403_v57 = vand.u32 4294901760, %v11588_v21  ;;  %v5834_v10 = vand.u32 4294901760, %v5134_v6  ;;  %v5953_v20 = vand.u32 4294901760, %v5952_v50 }
 0x6dc   :  { %v12402_v22 = vand.u32 4294901760, %v11594_v7  ;;  %13140 = vst [vmem:[#allocation31_spill] sm:$0xff] %v11605_v31  ;;  %8022 = vmatpush3.bf16.msra.mxu0 %v11605_v31  ;;  %v12407_v60 = vand.u32 4294901760, %v11610_v35 }
 0x6dd   :  { %8049 = vmatpush3.bf16.msra.mxu1 %v8048_v24  ;;  %v5959_v43 = vsub.f32 %v11588_v21, %v12403_v57  ;;  %v11612_v24 = vsub.f32 %v5134_v6, %v5834_v10  ;;  %v8051_v62 = vpack.c.bf16 %v5953_v20, %v5946_v8  ;;  %8023 = vmatprep.subr.bf16.mxu0 %v13082_v45  ;;  %v5837_v20 = vand.u32 4294901760, %v5135_v32 }
 0x6de   :  { %8050 = vmatprep.subr.bf16.mxu1 %v13082_v45  ;;  %v5966_v50 = vsub.f32 %v11594_v7, %v12402_v22  ;;  %v5973_v26 = vsub.f32 %v11610_v35, %v12407_v60  ;;  %v5840_v22 = vand.u32 4294901760, %v5136_v36 }
 0x6df   :  { %v5960_v15 = vand.u32 4294901760, %v5959_v43  ;;  %v12406_v8 = vand.u32 4294901760, %v11612_v24  ;;  %v11634_v44 = vsub.f32 %v5135_v32, %v5837_v20 }
 0x6e0   :  { %v5967_v6 = vand.u32 4294901760, %v5966_v50  ;;  %8025 = vmatpush3.bf16.msra.mxu0 %v11622_v51  ;;  %v13144_v50 = vand.u32 4294901760, %v11542_v12  ;;  %v5974_v57 = vand.u32 4294901760, %v5973_v26  ;;  %v11643_v31 = vsub.f32 %v5136_v36, %v5840_v22 }
 0x6e1   :  { %8052 = vmatpush3.bf16.msra.mxu1 %v8051_v62  ;;  %v5980_v43 = vsub.f32 %v11612_v24, %v12406_v8  ;;  %v13143_v62 = vand.u32 4294901760, %v11540_v25  ;;  %8026 = vmatprep.subr.bf16.mxu0 %v13082_v45  ;;  %v11653_v36 = vpack.c.bf16 %v5828_v9, %v5825_v59 }
 0x6e2   :  { %8053 = vmatprep.subr.bf16.mxu1 %v13082_v45  ;;  %v8054_v53 = vpack.c.bf16 %v5967_v6, %v5960_v15  ;;  %v12409_v6 = vand.u32 4294901760, %v11634_v44  ;;  %v12408_v32 = vand.u32 4294901760, %v11643_v31 }
 0x6e3   :  { %v11641_v34 = vpack.c.bf16 %v13144_v50, %v13143_v62  ;;  %v5981_v15 = vand.u32 4294901760, %v5980_v43  ;;  %v11661_v62 = vpack.c.bf16 %v5834_v10, %v5831_v46  ;;  %v13148_v46 = vld [vmem:[#allocation13_spill] sm:$0xff] }
 0x6e4   :  { %v5987_v25 = vsub.f32 %v11634_v44, %v12409_v6  ;;  %v5994_v26 = vsub.f32 %v11643_v31, %v12408_v32 }
 0x6e5   :  { %8055 = vmatpush3.bf16.msra.mxu1 %v8054_v53  ;;  %v8057_v60 = vpack.c.bf16 %v5981_v15, %v5974_v57  ;;  %8028 = vmatpush3.bf16.msra.mxu0 %v11641_v34  ;;  %v11670_v15 = vpack.c.bf16 %v5840_v22, %v5837_v20 }
 0x6e6   :  { %8056 = vmatprep.subr.bf16.mxu1 %v13082_v45  ;;  %8029 = vmatprep.subr.bf16.mxu0 %v13082_v45  ;;  %v5988_v53 = vand.u32 4294901760, %v5987_v25  ;;  %v5995_v57 = vand.u32 4294901760, %v5994_v26 }
 0x6e7   :  { %v5790_v8 = vpop.f32.mrb[22].mxu1 }
 0x6e8   :  { %v6891_v12 = vpop.f32.mrb[23].mxu1  ;;  %v8060_v43 = vpack.c.bf16 %v5995_v57, %v5988_v53 }
 0x6e9   :  { %8058 = vmatpush3.bf16.msra.mxu1 %v8057_v60  ;;  %8031 = vmatpush3.bf16.msra.mxu0 %v11653_v36 }
 0x6ea   :  { %8059 = vmatprep.subr.bf16.mxu1 %v13082_v45  ;;  %8032 = vmatprep.subr.bf16.mxu0 %v13082_v45 }
 0x6ed   :  { %8061 = vmatpush3.bf16.msra.mxu1 %v8060_v43  ;;  %8034 = vmatpush3.bf16.msra.mxu0 %v11661_v62 }
 0x6ee   :  { %8086 = vmatprep.subr.bf16.mxu1 %v13082_v45  ;;  %8035 = vmatprep.subr.bf16.mxu0 %v13082_v45 }
 0x6f0   :  { %v5703_v59 = vpop.f32.mrb[22].mxu0 }
 0x6f1   :  { %v5704_v9 = vadd.f32 %v5703_v59, %v11519_v17  ;;  %v6856_v50 = vpop.f32.mrb[23].mxu0  ;;  %8037 = vmatpush3.bf16.msra.mxu0 %v11670_v15  ;;  %v13145_v59 = vld [vmem:[#allocation96_spill] sm:$0xff] }
 0x6f2   :  { %8062 = vmatprep.subr.bf16.mxu0 %v13082_v45  ;;  %v13146_v50 = vld [vmem:[#allocation63_spill] sm:$0xff] }
 0x6f3   :  { %v11667_v60 = vadd.f32 %v5790_v8, %v5704_v9 }
 0x732   :  { %v3238_v26 = vpop.permute.xlu1 %3237  ;;  %v3262_v22 = vpop.permute.xlu0 %3261 }
 0x733   :  { %v3240_v53 = vmul.f32 %v3238_v26, %v13130_v23  ;;  %v3241_v57 = vmul.f32 %v3238_v26, %v13131_v55  ;;  %v3243_v10 = vmul.f32 %v3238_v26, %v13132_v42  ;;  %v3264_v12 = vmul.f32 %v3262_v22, %v13055_v18 }
 0x734   :  { %v3265_v23 = vmul.f32 %v3262_v22, %v13056_v39 }
 0x735   :  { %v3244_v9 = vadd.f32 %v13145_v59, %v3240_v53  ;;  %v3245_v32 = vadd.f32 %v13146_v50, %v3241_v57  ;;  %v13147_v50 = vld [vmem:[#allocation14_spill] sm:$0xff] }
 0x737   :  { %v3250_v43 = vpop.permute.xlu1 %3249 }
 0x738   :  { %v3252_v6 = vmul.f32 %v3250_v43, %v13135_v30  ;;  %v3253_v20 = vmul.f32 %v3250_v43, %v13136_v48  ;;  %v3255_v55 = vmul.f32 %v3250_v43, %v13057_v37  ;;  %v3247_v48 = vadd.f32 %v13147_v50, %v3243_v10 }
 0x73a   :  { %v3256_v8 = vadd.f32 %v3252_v6, %v3244_v9  ;;  %v3257_v25 = vadd.f32 %v3253_v20, %v3245_v32  ;;  %v3242_v6 = vmul.f32 %v3238_v26, %v13061_v41  ;;  %v3254_v32 = vmul.f32 %v3250_v43, %v13062_v16 }
 0x73b   :  { %v3259_v42 = vadd.f32 %v3255_v55, %v3247_v48 }
 0x73c   :  { %v3274_v17 = vpop.permute.xlu1 %3273  ;;  %v3268_v59 = vadd.f32 %v3264_v12, %v3256_v8  ;;  %v3269_v30 = vadd.f32 %v3265_v23, %v3257_v25  ;;  %v3266_v23 = vmul.f32 %v3262_v22, %v13069_v47 }
 0x73d   :  { %v3276_v53 = vmul.f32 %v3274_v17, %v13058_v28  ;;  %v3277_v57 = vmul.f32 %v3274_v17, %v13059_v29  ;;  %v3267_v28 = vmul.f32 %v3262_v22, %v13065_v4  ;;  %v3246_v29 = vadd.f32 %v13148_v46, %v3242_v6 }
 0x73e   :  { %v3279_v10 = vmul.f32 %v3274_v17, %v13067_v63 }
 0x73f   :  { %v3280_v18 = vadd.f32 %v3276_v53, %v3268_v59  ;;  %v3281_v9 = vadd.f32 %v3277_v57, %v3269_v30  ;;  %v3271_v12 = vadd.f32 %v3267_v28, %v3259_v42  ;;  %v3258_v41 = vadd.f32 %v3254_v32, %v3246_v29 }
 0x740   :  { %v13149_v29 = vpack.c.bf16 %v11463_v54, %v11461_v58 }
 0x741   :  { %v3286_v20 = vpop.permute.xlu1 %3285  ;;  %v3270_v4 = vadd.f32 %v3266_v23, %v3258_v41  ;;  %v13154_v41 = vpack.c.bf16 %v11565_v14, %v11560_v61  ;;  %v13158_v23 = vand.u32 4294901760, %v11461_v58  ;;  %v13162_v58 = vand.u32 4294901760, %v11506_v56 }
 0x742   :  { %v3288_v39 = vmul.f32 %v3286_v20, %v13063_v3  ;;  %v3289_v37 = vmul.f32 %v3286_v20, %v13064_v5  ;;  %v3291_v43 = vmul.f32 %v3286_v20, %v13068_v33  ;;  %v3283_v3 = vadd.f32 %v3279_v10, %v3271_v12 }
 0x743   :  { %v3278_v5 = vmul.f32 %v3274_v17, %v13070_v13  ;;  %v3290_v46 = vmul.f32 %v3286_v20, %v13071_v38  ;;  %v13152_v10 = vpack.c.bf16 %v11511_v0, %v11506_v56  ;;  %v13153_v12 = vpack.c.bf16 %v11532_v11, %v11527_v40 }
 0x744   :  { %v3292_v8 = vadd.f32 %v3288_v39, %v3280_v18  ;;  %v3293_v25 = vadd.f32 %v3289_v37, %v3281_v9  ;;  %v3295_v55 = vadd.f32 %v3291_v43, %v3283_v3  ;;  %v13157_v43 = vpack.c.bf16 %v11643_v31, %v11634_v44 }
 0x745   :  { %v3282_v53 = vadd.f32 %v3278_v5, %v3270_v4  ;;  %v13159_v3 = vand.u32 4294901760, %v11463_v54  ;;  %v13161_v4 = vand.u32 4294901760, %v11487_v27  ;;  %v13163_v54 = vand.u32 4294901760, %v11511_v0 }
 0x746   :  { %v6472_v26 = vmul.f32 -1.442695, %v3292_v8  ;;  %v6473_v16 = vmul.f32 -1.442695, %v3293_v25  ;;  %v6474_v57 = vmul.f32 -1.442695, %v3295_v55  ;;  %v13151_v25 = vpack.c.bf16 %v11487_v27, %v11482_v49 }
 0x747   :  { %v3294_v63 = vadd.f32 %v3290_v46, %v3282_v53  ;;  %v13150_v8 = vld [vmem:[#allocation31_spill] sm:$0xff]  ;;  %v8111_v5 = vpack.c.bf16 %v13159_v3, %v13158_v23  ;;  %v13165_v27 = vand.u32 4294901760, %v11532_v11  ;;  %v13166_v56 = vand.u32 4294901760, %v11560_v61 }
 0x748   :  { %8549 = vpow2.f32 %v6472_v26  ;;  %v13155_v26 = vpack.c.bf16 %v11594_v7, %v11588_v21  ;;  %v13167_v0 = vand.u32 4294901760, %v11565_v14  ;;  %v13169_v11 = vand.u32 4294901760, %v11594_v7 }
 0x749   :  { %8551 = vpow2.f32 %v6473_v16  ;;  %v13156_v16 = vpack.c.bf16 %v11612_v24, %v11610_v35  ;;  %v13170_v61 = vand.u32 4294901760, %v11610_v35  ;;  %v13171_v14 = vand.u32 4294901760, %v11612_v24 }
 0x74a   :  { %8553 = vpow2.f32 %v6474_v57  ;;  %v13172_v7 = vand.u32 4294901760, %v11634_v44 }
 0x74b   :  { %8555 = vtanh.f32 %v3294_v63 }
 0x752   :  { %v8550_v59 = vpop.eup %8549 }
 0x753   :  { %v8552_v30 = vpop.eup %8551  ;;  %v3299_v50 = vadd.f32 1.0, %v8550_v59 }
 0x754   :  { %v3305_v48 = vadd.f32 1.0, %v8552_v30  ;;  %v8554_v33 = vpop.eup %8553 }
 0x755   :  { %8557 = vrcp.f32 %v3299_v50  ;;  %v8556_v47 = vpop.eup %8555  ;;  %v3312_v13 = vadd.f32 1.0, %v8554_v33 }
 0x756   :  { %8559 = vrcp.f32 %v3305_v48 }
 0x757   :  { %8561 = vrcp.f32 %v3312_v13 }
 0x75f   :  { %v8558_v22 = vpop.eup %8557 }
 0x760   :  { %v8560_v6 = vpop.eup %8559  ;;  %v3316_v17 = vmul.f32 %v8558_v22, %v8556_v47 }
 0x761   :  { %v3315_v32 = vmul.f32 %v8560_v6, %v11454_v52  ;;  %v8562_v42 = vpop.eup %8561  ;;  %v6477_v6 = vld [vmem:[%s11846_s8] ss:$0 sm:$0xff] }
 0x763   :  { %v3317_v38 = vadd.f32 %v3316_v17, %v3315_v32 }
 0x765   :  { %8563 = vtanh.f32 %v3317_v38 }
 0x76f   :  { %v8564_v20 = vpop.eup %8563 }
 0x770   :  { %v3319_v18 = vmul.f32 %v8564_v20, %v8562_v42 }
 0x772   :  { %v11715_v9 = vand.u32 4294901760, %v3319_v18 }
 0x774   :  { %v5876_v39 = vsub.f32 %v3319_v18, %v11715_v9  ;;  %6960 = vmatmul.mubr.f32.vlgmr.msra.gmra.mrb[24].mxu1 %v11715_v9 }
 0x775   :  { %8088 = vmatpush3.bf16.msra.mxu1 %v11549_v2  ;;  %7029 = vmatprep.mubr.msk.f32.mxu1 %vm8674_vm0, %v13106_v1 }
 0x776   :  { %8089 = vmatprep.subr.bf16.mxu1 %v13082_v45  ;;  %v5877_v52 = vand.u32 4294901760, %v5876_v39 }
 0x778   :  { %v5878_v37 = vsub.f32 %v5876_v39, %v5877_v52 }
 0x779   :  { %8091 = vmatpush3.bf16.msra.mxu1 %v11582_v19 }
 0x77a   :  { %8092 = vmatprep.subr.bf16.mxu1 %v13082_v45  ;;  %v5879_v28 = vand.u32 4294901760, %v5878_v37 }
 0x77c   :  { %6925 = vmatmul.mubr.f32.vlgmr.msra.gmra.mrb[24].mxu0 %v5879_v28 }
 0x77d   :  { %8064 = vmatpush3.bf16.msra.mxu0 %v13149_v29  ;;  %8094 = vmatpush3.bf16.msra.mxu1 %v13150_v8 }
 0x77e   :  { %8065 = vmatprep.subr.bf16.mxu0 %v13082_v45  ;;  %8095 = vmatprep.subr.bf16.mxu1 %v13082_v45 }
 0x77f   :  { %6994 = vmatprep.mubr.msk.f32.mxu0 %vm8674_vm0, %v13106_v1 }
 0x781   :  { %8067 = vmatpush3.bf16.msra.mxu0 %v13151_v25  ;;  %8097 = vmatpush3.bf16.msra.mxu1 %v11622_v51 }
 0x782   :  { %8068 = vmatprep.subr.bf16.mxu0 %v13082_v45  ;;  %8098 = vmatprep.subr.bf16.mxu1 %v13082_v45 }
 0x785   :  { %8070 = vmatpush3.bf16.msra.mxu0 %v13152_v10  ;;  %8100 = vmatpush3.bf16.msra.mxu1 %v11641_v34 }
 0x786   :  { %8071 = vmatprep.subr.bf16.mxu0 %v13082_v45  ;;  %8101 = vmatprep.subr.bf16.mxu1 %v13082_v45 }
 0x789   :  { %8073 = vmatpush3.bf16.msra.mxu0 %v13153_v12  ;;  %8103 = vmatpush3.bf16.msra.mxu1 %v11653_v36 }
 0x78a   :  { %8074 = vmatprep.subr.bf16.mxu0 %v13082_v45  ;;  %8104 = vmatprep.subr.bf16.mxu1 %v13082_v45 }
 0x78d   :  { %8076 = vmatpush3.bf16.msra.mxu0 %v13154_v41  ;;  %8106 = vmatpush3.bf16.msra.mxu1 %v11661_v62 }
 0x78e   :  { %8077 = vmatprep.subr.bf16.mxu0 %v13082_v45  ;;  %8107 = vmatprep.subr.bf16.mxu1 %v13082_v45 }
 0x791   :  { %8079 = vmatpush3.bf16.msra.mxu0 %v13155_v26  ;;  %8109 = vmatpush3.bf16.msra.mxu1 %v11670_v15 }
 0x792   :  { %8080 = vmatprep.subr.bf16.mxu0 %v13082_v45  ;;  %8134 = vmatprep.subr.bf16.mxu1 %v13082_v45 }
 0x794   :  { %7030 = vmatmul.mubr.f32.vlgmr.msra.gmra.mrb[26].mxu1 %v5877_v52 }
 0x795   :  { %8082 = vmatpush3.bf16.msra.mxu0 %v13156_v16  ;;  %8136 = vmatpush3.bf16.msra.mxu1 %v11549_v2  ;;  %v13160_v2 = vand.u32 4294901760, %v11482_v49  ;;  %v13164_v49 = vand.u32 4294901760, %v11527_v40  ;;  %v13168_v40 = vand.u32 4294901760, %v11588_v21  ;;  %v13173_v21 = vand.u32 4294901760, %v11643_v31 }
 0x796   :  { %8083 = vmatprep.subr.bf16.mxu0 %v13082_v45  ;;  %8137 = vmatprep.subr.bf16.mxu1 %v13082_v45 }
 0x797   :  { %7099 = vmatprep.mubr.msk.f32.mxu1 %vm8674_vm0, %v13106_v1  ;;  %v8114_v55 = vpack.c.bf16 %v13161_v4, %v13160_v2 }
 0x799   :  { %8085 = vmatpush3.bf16.msra.mxu0 %v13157_v43  ;;  %8139 = vmatpush3.bf16.msra.mxu1 %v11582_v19  ;;  %v8117_v19 = vpack.c.bf16 %v13163_v54, %v13162_v58 }
 0x79a   :  { %8110 = vmatprep.subr.bf16.mxu0 %v13082_v45  ;;  %8140 = vmatprep.subr.bf16.mxu1 %v13082_v45 }
 0x79c   :  { %6995 = vmatmul.mubr.f32.vlgmr.msra.gmra.mrb[26].mxu0 %v5876_v39 }
 0x79d   :  { %8112 = vmatpush3.bf16.msra.mxu0 %v8111_v5  ;;  %8142 = vmatpush3.bf16.msra.mxu1 %v13150_v8 }
 0x79e   :  { %8113 = vmatprep.subr.bf16.mxu0 %v13082_v45  ;;  %8143 = vmatprep.subr.bf16.mxu1 %v13082_v45 }
 0x79f   :  { %7064 = vmatprep.mubr.msk.f32.mxu0 %vm8674_vm0, %v13106_v1  ;;  %v8120_v1 = vpack.c.bf16 %v13165_v27, %v13164_v49 }
 0x7a1   :  { %8115 = vmatpush3.bf16.msra.mxu0 %v8114_v55  ;;  %8145 = vmatpush3.bf16.msra.mxu1 %v11622_v51  ;;  %v8123_v51 = vpack.c.bf16 %v13167_v0, %v13166_v56 }
 0x7a2   :  { %8116 = vmatprep.subr.bf16.mxu0 %v13082_v45  ;;  %8146 = vmatprep.subr.bf16.mxu1 %v13082_v45 }
 0x7a5   :  { %8118 = vmatpush3.bf16.msra.mxu0 %v8117_v19  ;;  %8148 = vmatpush3.bf16.msra.mxu1 %v11641_v34  ;;  %v8126_v34 = vpack.c.bf16 %v13169_v11, %v13168_v40 }
 0x7a6   :  { %8119 = vmatprep.subr.bf16.mxu0 %v13082_v45  ;;  %8149 = vmatprep.subr.bf16.mxu1 %v13082_v45 }
 0x7a9   :  { %8121 = vmatpush3.bf16.msra.mxu0 %v8120_v1  ;;  %8151 = vmatpush3.bf16.msra.mxu1 %v11653_v36  ;;  %v8129_v36 = vpack.c.bf16 %v13171_v14, %v13170_v61 }
 0x7aa   :  { %8122 = vmatprep.subr.bf16.mxu0 %v13082_v45  ;;  %8152 = vmatprep.subr.bf16.mxu1 %v13082_v45 }
 0x7ad   :  { %8124 = vmatpush3.bf16.msra.mxu0 %v8123_v51  ;;  %8154 = vmatpush3.bf16.msra.mxu1 %v11661_v62  ;;  %v8132_v62 = vpack.c.bf16 %v13173_v21, %v13172_v7 }
 0x7ae   :  { %8125 = vmatprep.subr.bf16.mxu0 %v13082_v45  ;;  %8155 = vmatprep.subr.bf16.mxu1 %v13082_v45 }
 0x7b1   :  { %8127 = vmatpush3.bf16.msra.mxu0 %v8126_v34  ;;  %8157 = vmatpush3.bf16.msra.mxu1 %v11670_v15 }
 0x7b2   :  { %8128 = vmatprep.subr.bf16.mxu0 %v13082_v45 }
 0x7b4   :  { %7100 = vmatmul.mubr.f32.vlgmr.msra.gmra.mrb[28].mxu1 %v11715_v9 }
 0x7b5   :  { %8130 = vmatpush3.bf16.msra.mxu0 %v8129_v36 }
 0x7b6   :  { %8131 = vmatprep.subr.bf16.mxu0 %v13082_v45 }
 0x7b9   :  { %8133 = vmatpush3.bf16.msra.mxu0 %v8132_v62 }
 0x7bc   :  { %7065 = vmatmul.mubr.f32.vlgmr.msra.gmra.mrb[28].mxu0 %v11715_v9 }
 0x847   :  { %v6032_v15 = vpop.f32.mrb[24].mxu1 }
 0x848   :  { %v6961_v35 = vpop.f32.mrb[25].mxu1 }
 0x84f   :  { %v5881_v46 = vpop.f32.mrb[24].mxu0 }
 0x850   :  { %v5882_v24 = vadd.f32 %v5881_v46, %v11667_v60  ;;  %v6926_v53 = vpop.f32.mrb[25].mxu0 }
 0x852   :  { %v6033_v57 = vadd.f32 %v6032_v15, %v5882_v24 }
 0x867   :  { %v6225_v63 = vpop.f32.mrb[26].mxu1 }
 0x868   :  { %v7031_v59 = vpop.f32.mrb[27].mxu1 }
 0x86f   :  { %v6136_v30 = vpop.f32.mrb[26].mxu0 }
 0x870   :  { %v6137_v50 = vadd.f32 %v6136_v30, %v6033_v57  ;;  %v6996_v44 = vpop.f32.mrb[27].mxu0 }
 0x872   :  { %v6226_v48 = vadd.f32 %v6225_v63, %v6137_v50 }
 0x887   :  { %v6431_v31 = vpop.f32.mrb[28].mxu1 }
 0x888   :  { %v7101_v33 = vpop.f32.mrb[29].mxu1 }
 0x88f   :  { %v6344_v47 = vpop.f32.mrb[28].mxu0 }
 0x890   :  { %v6345_v45 = vadd.f32 %v6344_v47, %v6226_v48  ;;  %v7066_v22 = vpop.f32.mrb[29].mxu0 }
 0x892   :  { %v6432_v13 = vadd.f32 %v6431_v31, %v6345_v45 }
 0x894   :  { %v6442_v17 = vadd.f32 %v6477_v6, %v6432_v13 }
 0x896   :  { %6443 = vst [vmem:[%s11847_s9] sm:$0xff] %v6442_v17 }
 0x897   :  { %6448 = vsyncpa [#allocation3], 1 }
 0x898   :  { %6449 = vsyncpa [#allocation5], 1 }
 0x899   :  { %6450 = vsyncpa [#allocation8], 1 }

</bundles_post_ra>
